<compile_context>
chip_gen: v7x
topology: tpu7x:2x2x1
jax: 0.10.0
libtpu: 0.0.40
codegen_flags: <defaults>
</compile_context>

<pallas_src>
import functools

import jax
import jax.numpy as jnp
from jax import lax
from jax.experimental import pallas as pl
from jax.experimental.pallas import tpu as pltpu

# ---- module constants (from SummaryNet.__init__) ----
C1_OUT, K1_H, K1_W = 64, 3, 30           # conv1: Conv2d(1, 64, (3, 30))
POOL_W = 100                             # MaxPool2d((1, 100))
FC_OUT = 10                              # Linear(64, 10)
C2_OUT, K2_H, K2_W = 8, 3, 15            # conv2: Conv2d(1, 8, (3, 15), dil=(1,40), stride=(1,240))
DIL_W, STRIDE_W = 40, 240


# ---------------- fused Pallas kernel ----------------

def _fused_kernel(x_ref, p2_ref, w1_ref, b1_ref, m5_ref, beff_ref,
                  w2b_ref, b2eff_ref, o_ref, a2_ref, ps_ref, *,
                  NB, PW, P, DPAD, DOUT):
    """Full SummaryNet forward for a tile of NB batch elements.

      x_ref   : (NB, 3, L)          raw input tile (no im2col inflation in HBM)
      p2_ref  : (NB, 1, 45*W2_out)  conv2 taps (tiny wrapper-side gather)
      w1_ref  : (64, 90)            conv1 weight  [c, h*30 + k]
      b1_ref  : (64, 1)
      m5_ref  : (64*P, P*10)        Reshape(raw view) + Linear folded into one matrix
      beff_ref: (1, P*10)
      w2b_ref : (45*W2_out, 8*W2_out)  conv2 weight as a block-diagonal matmul
      b2eff_ref: (1, 8*W2_out)
      o_ref   : (NB, 1, DPAD)       lane-dense packed [x_short | x_long | 0-pad] rows
      a2_ref  : VMEM (90, PW)       per-element patch scratch (taps on sublanes)
      ps_ref  : VMEM (NB, 64*P)     pooled rows, layout r = v*64 + c
    """

    def per_element(b, carry):
        # In-kernel im2col: row (h*30+k) of the patch matrix is the lane-contiguous
        # slice x[b, h, k:k+PW].  90 shifted copies into VMEM scratch, no HBM slab.
        for h in range(K1_H):
            for k in range(K1_W):
                a2_ref[pl.ds(h * K1_W + k, 1), :] = x_ref[pl.ds(b, 1), h, pl.ds(k, PW)]

        # conv1 (+bias+ReLU): ONE K=90 MXU matmul, channels on sublanes.
        conv = jnp.dot(w1_ref[...], a2_ref[...], preferred_element_type=jnp.float32)
        conv = jnp.maximum(conv + b1_ref[...], 0.0)                 # (64, PW)

        # MaxPool(1, 100): transpose once, then each pool window is one sublane-block
        # max producing a lane-dense (1, 64) row; concat gives the (1, 64*P) pooled
        # row in v-major layout (v*64 + c), matching the m5 folding below.
        conv_t = jnp.transpose(conv)                                 # (PW, 64)
        pools = [jnp.max(conv_t[v * POOL_W:(v + 1) * POOL_W, :], axis=0, keepdims=True)
                 for v in range(P)]
        ps_ref[pl.ds(b, 1), :] = jnp.concatenate(pools, axis=1)      # (1, 64*P)
        return carry

    lax.fori_loop(0, NB, per_element, 0)

    # Reshape (raw memory view) + Linear(64 -> 10): folded into one matmul with the
    # precomputed scramble matrix m5 (built in the wrapper).
    x_short = jnp.dot(ps_ref[...], m5_ref[...],
                      preferred_element_type=jnp.float32) + beff_ref[...]      # (NB, P*10)

    # conv2 (dilation 40, stride 240): block-diagonal matmul over the gathered taps.
    x_long = jnp.dot(p2_ref[:, 0, :], w2b_ref[...],
                     preferred_element_type=jnp.float32) + b2eff_ref[...]      # (NB, 8*W2_out)

    # Single lane-dense store: final torch.cat((x_short, x_long)) order + zero pad.
    parts = [x_short, x_long]
    if DPAD > DOUT:
        parts.append(jnp.zeros((NB, DPAD - DOUT), jnp.float32))
    o_ref[:, 0, :] = jnp.concatenate(parts, axis=1)


# ---------------- wrapper (forward pass) ----------------

def summary_net_forward(x, params):
    w1, b1, wfc, bfc, w2, b2 = (params[k] for k in ("w1", "b1", "wfc", "bfc", "w2", "b2"))

    N = x.shape[0]
    assert x.size % (3 * N) == 0, "input not reshapeable to (N, 3, L)"
    L = x.size // (3 * N)
    x = x.reshape(N, 3, L).astype(jnp.float32)      # == torch view(N, 1, 3, L), channel squeezed

    W_out = L - K1_W + 1                                      # conv1 output width
    P = (W_out - POOL_W) // POOL_W + 1                        # maxpool output width
    W2_out = (L - DIL_W * (K2_W - 1) - 1) // STRIDE_W + 1     # conv2 output width
    assert P >= 1 and W2_out >= 1, "L too small for SummaryNet kernels (need L >= 561)"

    PW = P * POOL_W                                           # conv1 positions actually used
    D2 = W2_out * K2_H * K2_W                                 # conv2 taps per element
    DOUT = P * FC_OUT + C2_OUT * W2_out                       # packed output width
    DPAD = ((DOUT + 127) // 128) * 128                        # lane-dense padded output width

    # ---- batch tiling: >= 2 grid steps when N > 1 (v7x has 2 TCs), NB <= 8 per step ----
    NB = 1 if N <= 1 else min(8, -(-N // 2))
    N_pad = ((N + NB - 1) // NB) * NB
    xp = jnp.pad(x, ((0, N_pad - N), (0, 0), (0, 0))) if N_pad != N else x

    # ---- conv2 taps: tiny (non-inflating) gather done once in the wrapper ----
    # p2[n, 0, w*45 + h*15 + k] = x[n, h, w*240 + k*40]
    idx2 = (jnp.arange(W2_out)[:, None] * STRIDE_W
            + jnp.arange(K2_W)[None, :] * DIL_W)                            # (W2_out, 15)
    p2 = xp[:, :, idx2]                                                     # (Np, 3, W2_out, 15)
    p2 = jnp.transpose(p2, (0, 2, 1, 3)).reshape(N_pad, 1, D2)

    # ---- lane-dense weight / bias packing ----
    w1f = w1.reshape(C1_OUT, K1_H * K1_W).astype(jnp.float32)               # (64, 90)
    b1c = b1.reshape(C1_OUT, 1).astype(jnp.float32)

    # Fold the Reshape raw-view scramble + Linear(64->10) into one matrix:
    #   pooled row layout r = v*64 + c  (v = pool window, c = channel)
    #   memory-flat index m = c*P + v   -> view row p = m // 64, view col j = m % 64
    #   m5[v*64 + c, p*10 + o] = wfc[o, m % 64] if (m // 64 == p) else 0
    # NOTE: m5 is dense (64P, 10P) and grows as P^2 -- fine for moderate P.
    m = jnp.arange(C1_OUT)[None, :] * P + jnp.arange(P)[:, None]            # (P, 64)
    gath = wfc.T.astype(jnp.float32)[m % C1_OUT]                            # (P, 64, 10)
    onehot = ((m // C1_OUT)[:, :, None] == jnp.arange(P)[None, None, :])    # (P, 64, P)
    m5 = (onehot[..., None].astype(jnp.float32) * gath[:, :, None, :]
          ).reshape(P * C1_OUT, P * FC_OUT)
    beff = jnp.tile(bfc.astype(jnp.float32), P).reshape(1, P * FC_OUT)

    # conv2 as one matmul on the tap row: w2b[w*45 + t, c*W2_out + w'] = w2[c, t]*(w == w')
    w2f = w2.reshape(C2_OUT, K2_H * K2_W).astype(jnp.float32)               # (8, 45)
    w2b = jnp.einsum("ct,wv->wtcv", w2f, jnp.eye(W2_out, dtype=jnp.float32)
                     ).reshape(D2, C2_OUT * W2_out)
    b2eff = jnp.repeat(b2.astype(jnp.float32), W2_out).reshape(1, C2_OUT * W2_out)

    # ---- VMEM budget / cost hints ----
    lane = lambda n: ((n + 127) // 128) * 128
    sub = lambda n: ((n + 7) // 8) * 8
    blk_bytes = 4 * (NB * sub(3) * lane(L) + NB * sub(1) * lane(D2) + NB * sub(1) * lane(DPAD))
    const_bytes = 4 * (sub(C1_OUT) * lane(K1_H * K1_W) + sub(C1_OUT) * lane(1)
                       + sub(P * C1_OUT) * lane(P * FC_OUT) + sub(1) * lane(P * FC_OUT)
                       + sub(D2) * lane(C2_OUT * W2_out) + sub(1) * lane(C2_OUT * W2_out))
    scratch_bytes = 4 * (sub(K1_H * K1_W) * lane(PW) + sub(NB) * lane(C1_OUT * P))
    vmem_limit = int(min(max(2 * blk_bytes + const_bytes + scratch_bytes + (16 << 20),
                             32 << 20), 48 << 20))
    flops = 2 * N_pad * (C1_OUT * K1_H * K1_W * PW
                         + C1_OUT * P * P * FC_OUT
                         + D2 * C2_OUT * W2_out)
    bytes_accessed = 4 * N_pad * (3 * L + D2 + DPAD) + const_bytes

    out = pl.pallas_call(
        functools.partial(_fused_kernel, NB=NB, PW=PW, P=P, DPAD=DPAD, DOUT=DOUT),
        out_shape=jax.ShapeDtypeStruct((N_pad, 1, DPAD), jnp.float32),
        grid=(N_pad // NB,),
        in_specs=[
            pl.BlockSpec((NB, 3, L), lambda n: (n, 0, 0)),                   # x
            pl.BlockSpec((NB, 1, D2), lambda n: (n, 0, 0)),                  # p2 taps
            pl.BlockSpec((C1_OUT, K1_H * K1_W), lambda n: (0, 0)),           # w1f
            pl.BlockSpec((C1_OUT, 1), lambda n: (0, 0)),                     # b1
            pl.BlockSpec((P * C1_OUT, P * FC_OUT), lambda n: (0, 0)),        # m5
            pl.BlockSpec((1, P * FC_OUT), lambda n: (0, 0)),                 # beff
            pl.BlockSpec((D2, C2_OUT * W2_out), lambda n: (0, 0)),           # w2b
            pl.BlockSpec((1, C2_OUT * W2_out), lambda n: (0, 0)),            # b2eff
        ],
        out_specs=pl.BlockSpec((NB, 1, DPAD), lambda n: (n, 0, 0)),
        scratch_shapes=[
            pltpu.VMEM((K1_H * K1_W, PW), jnp.float32),                      # patch scratch
            pltpu.VMEM((NB, C1_OUT * P), jnp.float32),                       # pooled rows
        ],
        compiler_params=pltpu.CompilerParams(
            dimension_semantics=("parallel",),
            vmem_limit_bytes=vmem_limit),
        cost_estimate=pl.CostEstimate(flops=int(flops), transcendentals=0,
                                      bytes_accessed=int(bytes_accessed)),
    )(xp, p2, w1f, b1c, m5, beff, w2b, b2eff)

    return out.reshape(N_pad, DPAD)[:N, :DOUT]                               # drop padding


# ---------------- pure-JAX reference (for correctness check) ----------------

def reference_forward(x, params):
    w1, b1, wfc, bfc, w2, b2 = (params[k] for k in ("w1", "b1", "wfc", "bfc", "w2", "b2"))
    N = x.shape[0]
    L = x.size // (3 * N)
    xi = x.reshape(N, 1, 3, L).astype(jnp.float32)

    y = lax.conv_general_dilated(xi, w1, (1, 1), "VALID",
                                 dimension_numbers=("NCHW", "OIHW", "NCHW"))
    y = jnp.maximum(y + b1[None, :, None, None], 0.0)
    y = lax.reduce_window(y, -jnp.inf, lax.max,
                          (1, 1, 1, POOL_W), (1, 1, 1, POOL_W), "VALID")
    Pp = y.shape[-1]
    y = y.reshape(N, Pp, C1_OUT)                              # Reshape module (raw view)
    y = y @ wfc.T + bfc                                       # fc
    x_short = y.reshape(N, -1)

    z = lax.conv_general_dilated(xi, w2, (1, STRIDE_W), "VALID",
                                 rhs_dilation=(1, DIL_W),
                                 dimension_numbers=("NCHW", "OIHW", "NCHW"))
    z = z + b2[None, :, None, None]
    x_long = z.reshape(N, -1)
    return jnp.concatenate([x_short, x_long], axis=-1)


if __name__ == "__main__":
    key = jax.random.PRNGKey(0)
    kx, k1, k2, k3, k4, k5, k6 = jax.random.split(key, 7)

    # smallest sensible shape: kernel sizes force L >= 561 (conv2 receptive field)
    N, L = 2, 700
    x = jax.random.normal(kx, (N, 3, L), jnp.float32)

    params = dict(
        w1=0.05 * jax.random.normal(k1, (C1_OUT, 1, K1_H, K1_W), jnp.float32),
        b1=0.05 * jax.random.normal(k2, (C1_OUT,), jnp.float32),
        wfc=0.05 * jax.random.normal(k3, (FC_OUT, C1_OUT), jnp.float32),
        bfc=0.05 * jax.random.normal(k4, (FC_OUT,), jnp.float32),
        w2=0.05 * jax.random.normal(k5, (C2_OUT, 1, K2_H, K2_W), jnp.float32),
        b2=0.05 * jax.random.normal(k6, (C2_OUT,), jnp.float32),
    )

    out = summary_net_forward(x, params)
    out = jax.block_until_ready(out)

    ref = reference_forward(x, params)
    assert out.shape == ref.shape, (out.shape, ref.shape)
    max_err = float(jnp.max(jnp.abs(out - ref)))
    assert jnp.allclose(out, ref, atol=1e-2, rtol=1e-2), f"max abs err = {max_err}"

    print("KERNEL_OK")
</pallas_src>

<mosaic_0001>
module attributes {stable_mosaic.version = 11 : i64} {
  func.func @_fused_kernel(%arg0: i32, %arg1: memref<1x3x700xf32, #tpu.memory_space<vmem>>, %arg2: memref<1x1x45xf32, #tpu.memory_space<vmem>>, %arg3: memref<64x90xf32, #tpu.memory_space<vmem>>, %arg4: memref<64x1xf32, #tpu.memory_space<vmem>>, %arg5: memref<384x60xf32, #tpu.memory_space<vmem>>, %arg6: memref<1x60xf32, #tpu.memory_space<vmem>>, %arg7: memref<45x8xf32, #tpu.memory_space<vmem>>, %arg8: memref<1x8xf32, #tpu.memory_space<vmem>>, %arg9: memref<1x1x128xf32, #tpu.memory_space<vmem>>, %arg10: memref<90x600xf32, #tpu.memory_space<vmem>>, %arg11: memref<1x384xf32, #tpu.memory_space<vmem>>) attributes {dimension_semantics = [#tpu.dimension_semantics<parallel>], iteration_bounds = array<i64: 2>, scalar_prefetch = 0 : i64, scratch_operands = 2 : i64, tpu.core_type = #tpu.core_type<tc>, window_params = [{transform_indices = @transform_0, window_bounds = array<i64: 1, 3, 700>}, {transform_indices = @transform_1, window_bounds = array<i64: 1, 1, 45>}, {pipeline_mode = #tpu.pipeline_mode<synchronous>, transform_indices = @transform_2, window_bounds = array<i64: 64, 90>}, {pipeline_mode = #tpu.pipeline_mode<synchronous>, transform_indices = @transform_3, window_bounds = array<i64: 64, 1>}, {pipeline_mode = #tpu.pipeline_mode<synchronous>, transform_indices = @transform_4, window_bounds = array<i64: 384, 60>}, {pipeline_mode = #tpu.pipeline_mode<synchronous>, transform_indices = @transform_5, window_bounds = array<i64: 1, 60>}, {pipeline_mode = #tpu.pipeline_mode<synchronous>, transform_indices = @transform_6, window_bounds = array<i64: 45, 8>}, {pipeline_mode = #tpu.pipeline_mode<synchronous>, transform_indices = @transform_7, window_bounds = array<i64: 1, 8>}, {transform_indices = @transform_8, window_bounds = array<i64: 1, 1, 128>}]} {
    %c0_i32 = arith.constant 0 : i32
    %0 = arith.index_cast %c0_i32 : i32 to index
    %c0 = arith.constant 0 : index
    %c0_0 = arith.constant 0 : index
    %1 = vector.load %arg1[%0, %c0, %c0_0] : memref<1x3x700xf32, #tpu.memory_space<vmem>>, vector<1x1x600xf32>
    %2 = vector.shape_cast %1 : vector<1x1x600xf32> to vector<1x600xf32>
    %c0_1 = arith.constant 0 : index
    %c0_2 = arith.constant 0 : index
    %3 = vector.load %arg10[%c0_1, %c0_2] : memref<90x600xf32, #tpu.memory_space<vmem>>, vector<1x600xf32>
    tpu.vector_store %arg10[%c0_1, %c0_2], %2 {strides = array<i32>} : memref<90x600xf32, #tpu.memory_space<vmem>>, vector<1x600xf32>,
    %4 = arith.index_cast %c0_i32 : i32 to index
    %c0_3 = arith.constant 0 : index
    %c1 = arith.constant 1 : index
    %5 = vector.load %arg1[%4, %c0_3, %c1] : memref<1x3x700xf32, #tpu.memory_space<vmem>>, vector<1x1x600xf32>
    %6 = vector.shape_cast %5 : vector<1x1x600xf32> to vector<1x600xf32>
    %c1_4 = arith.constant 1 : index
    %c0_5 = arith.constant 0 : index
    %7 = vector.load %arg10[%c1_4, %c0_5] : memref<90x600xf32, #tpu.memory_space<vmem>>, vector<1x600xf32>
    tpu.vector_store %arg10[%c1_4, %c0_5], %6 {strides = array<i32>} : memref<90x600xf32, #tpu.memory_space<vmem>>, vector<1x600xf32>,
    %8 = arith.index_cast %c0_i32 : i32 to index
    %c0_6 = arith.constant 0 : index
    %c2 = arith.constant 2 : index
    %9 = vector.load %arg1[%8, %c0_6, %c2] : memref<1x3x700xf32, #tpu.memory_space<vmem>>, vector<1x1x600xf32>
    %10 = vector.shape_cast %9 : vector<1x1x600xf32> to vector<1x600xf32>
    %c2_7 = arith.constant 2 : index
    %c0_8 = arith.constant 0 : index
    %11 = vector.load %arg10[%c2_7, %c0_8] : memref<90x600xf32, #tpu.memory_space<vmem>>, vector<1x600xf32>
    tpu.vector_store %arg10[%c2_7, %c0_8], %10 {strides = array<i32>} : memref<90x600xf32, #tpu.memory_space<vmem>>, vector<1x600xf32>,
    %12 = arith.index_cast %c0_i32 : i32 to index
    %c0_9 = arith.constant 0 : index
    %c3 = arith.constant 3 : index
    %13 = vector.load %arg1[%12, %c0_9, %c3] : memref<1x3x700xf32, #tpu.memory_space<vmem>>, vector<1x1x600xf32>
    %14 = vector.shape_cast %13 : vector<1x1x600xf32> to vector<1x600xf32>
    %c3_10 = arith.constant 3 : index
    %c0_11 = arith.constant 0 : index
    %15 = vector.load %arg10[%c3_10, %c0_11] : memref<90x600xf32, #tpu.memory_space<vmem>>, vector<1x600xf32>
    tpu.vector_store %arg10[%c3_10, %c0_11], %14 {strides = array<i32>} : memref<90x600xf32, #tpu.memory_space<vmem>>, vector<1x600xf32>,
    %16 = arith.index_cast %c0_i32 : i32 to index
    %c0_12 = arith.constant 0 : index
    %c4 = arith.constant 4 : index
    %17 = vector.load %arg1[%16, %c0_12, %c4] : memref<1x3x700xf32, #tpu.memory_space<vmem>>, vector<1x1x600xf32>
    %18 = vector.shape_cast %17 : vector<1x1x600xf32> to vector<1x600xf32>
    %c4_13 = arith.constant 4 : index
    %c0_14 = arith.constant 0 : index
    %19 = vector.load %arg10[%c4_13, %c0_14] : memref<90x600xf32, #tpu.memory_space<vmem>>, vector<1x600xf32>
    tpu.vector_store %arg10[%c4_13, %c0_14], %18 {strides = array<i32>} : memref<90x600xf32, #tpu.memory_space<vmem>>, vector<1x600xf32>,
    %20 = arith.index_cast %c0_i32 : i32 to index
    %c0_15 = arith.constant 0 : index
    %c5 = arith.constant 5 : index
    %21 = vector.load %arg1[%20, %c0_15, %c5] : memref<1x3x700xf32, #tpu.memory_space<vmem>>, vector<1x1x600xf32>
    %22 = vector.shape_cast %21 : vector<1x1x600xf32> to vector<1x600xf32>
    %c5_16 = arith.constant 5 : index
    %c0_17 = arith.constant 0 : index
    %23 = vector.load %arg10[%c5_16, %c0_17] : memref<90x600xf32, #tpu.memory_space<vmem>>, vector<1x600xf32>
    tpu.vector_store %arg10[%c5_16, %c0_17], %22 {strides = array<i32>} : memref<90x600xf32, #tpu.memory_space<vmem>>, vector<1x600xf32>,
    %24 = arith.index_cast %c0_i32 : i32 to index
    %c0_18 = arith.constant 0 : index
    %c6 = arith.constant 6 : index
    %25 = vector.load %arg1[%24, %c0_18, %c6] : memref<1x3x700xf32, #tpu.memory_space<vmem>>, vector<1x1x600xf32>
    %26 = vector.shape_cast %25 : vector<1x1x600xf32> to vector<1x600xf32>
    %c6_19 = arith.constant 6 : index
    %c0_20 = arith.constant 0 : index
    %27 = vector.load %arg10[%c6_19, %c0_20] : memref<90x600xf32, #tpu.memory_space<vmem>>, vector<1x600xf32>
    tpu.vector_store %arg10[%c6_19, %c0_20], %26 {strides = array<i32>} : memref<90x600xf32, #tpu.memory_space<vmem>>, vector<1x600xf32>,
    %28 = arith.index_cast %c0_i32 : i32 to index
    %c0_21 = arith.constant 0 : index
    %c7 = arith.constant 7 : index
    %29 = vector.load %arg1[%28, %c0_21, %c7] : memref<1x3x700xf32, #tpu.memory_space<vmem>>, vector<1x1x600xf32>
    %30 = vector.shape_cast %29 : vector<1x1x600xf32> to vector<1x600xf32>
    %c7_22 = arith.constant 7 : index
    %c0_23 = arith.constant 0 : index
    %31 = vector.load %arg10[%c7_22, %c0_23] : memref<90x600xf32, #tpu.memory_space<vmem>>, vector<1x600xf32>
    tpu.vector_store %arg10[%c7_22, %c0_23], %30 {strides = array<i32>} : memref<90x600xf32, #tpu.memory_space<vmem>>, vector<1x600xf32>,
    %32 = arith.index_cast %c0_i32 : i32 to index
    %c0_24 = arith.constant 0 : index
    %c8 = arith.constant 8 : index
    %33 = vector.load %arg1[%32, %c0_24, %c8] : memref<1x3x700xf32, #tpu.memory_space<vmem>>, vector<1x1x600xf32>
    %34 = vector.shape_cast %33 : vector<1x1x600xf32> to vector<1x600xf32>
    %c8_25 = arith.constant 8 : index
    %c0_26 = arith.constant 0 : index
    %35 = vector.load %arg10[%c8_25, %c0_26] : memref<90x600xf32, #tpu.memory_space<vmem>>, vector<1x600xf32>
    tpu.vector_store %arg10[%c8_25, %c0_26], %34 {strides = array<i32>} : memref<90x600xf32, #tpu.memory_space<vmem>>, vector<1x600xf32>,
    %36 = arith.index_cast %c0_i32 : i32 to index
    %c0_27 = arith.constant 0 : index
    %c9 = arith.constant 9 : index
    %37 = vector.load %arg1[%36, %c0_27, %c9] : memref<1x3x700xf32, #tpu.memory_space<vmem>>, vector<1x1x600xf32>
    %38 = vector.shape_cast %37 : vector<1x1x600xf32> to vector<1x600xf32>
    %c9_28 = arith.constant 9 : index
    %c0_29 = arith.constant 0 : index
    %39 = vector.load %arg10[%c9_28, %c0_29] : memref<90x600xf32, #tpu.memory_space<vmem>>, vector<1x600xf32>
    tpu.vector_store %arg10[%c9_28, %c0_29], %38 {strides = array<i32>} : memref<90x600xf32, #tpu.memory_space<vmem>>, vector<1x600xf32>,
    %40 = arith.index_cast %c0_i32 : i32 to index
    %c0_30 = arith.constant 0 : index
    %c10 = arith.constant 10 : index
    %41 = vector.load %arg1[%40, %c0_30, %c10] : memref<1x3x700xf32, #tpu.memory_space<vmem>>, vector<1x1x600xf32>
    %42 = vector.shape_cast %41 : vector<1x1x600xf32> to vector<1x600xf32>
    %c10_31 = arith.constant 10 : index
    %c0_32 = arith.constant 0 : index
    %43 = vector.load %arg10[%c10_31, %c0_32] : memref<90x600xf32, #tpu.memory_space<vmem>>, vector<1x600xf32>
    tpu.vector_store %arg10[%c10_31, %c0_32], %42 {strides = array<i32>} : memref<90x600xf32, #tpu.memory_space<vmem>>, vector<1x600xf32>,
    %44 = arith.index_cast %c0_i32 : i32 to index
    %c0_33 = arith.constant 0 : index
    %c11 = arith.constant 11 : index
    %45 = vector.load %arg1[%44, %c0_33, %c11] : memref<1x3x700xf32, #tpu.memory_space<vmem>>, vector<1x1x600xf32>
    %46 = vector.shape_cast %45 : vector<1x1x600xf32> to vector<1x600xf32>
    %c11_34 = arith.constant 11 : index
    %c0_35 = arith.constant 0 : index
    %47 = vector.load %arg10[%c11_34, %c0_35] : memref<90x600xf32, #tpu.memory_space<vmem>>, vector<1x600xf32>
    tpu.vector_store %arg10[%c11_34, %c0_35], %46 {strides = array<i32>} : memref<90x600xf32, #tpu.memory_space<vmem>>, vector<1x600xf32>,
    %48 = arith.index_cast %c0_i32 : i32 to index
    %c0_36 = arith.constant 0 : index
    %c12 = arith.constant 12 : index
    %49 = vector.load %arg1[%48, %c0_36, %c12] : memref<1x3x700xf32, #tpu.memory_space<vmem>>, vector<1x1x600xf32>
    %50 = vector.shape_cast %49 : vector<1x1x600xf32> to vector<1x600xf32>
    %c12_37 = arith.constant 12 : index
    %c0_38 = arith.constant 0 : index
    %51 = vector.load %arg10[%c12_37, %c0_38] : memref<90x600xf32, #tpu.memory_space<vmem>>, vector<1x600xf32>
    tpu.vector_store %arg10[%c12_37, %c0_38], %50 {strides = array<i32>} : memref<90x600xf32, #tpu.memory_space<vmem>>, vector<1x600xf32>,
    %52 = arith.index_cast %c0_i32 : i32 to index
    %c0_39 = arith.constant 0 : index
    %c13 = arith.constant 13 : index
    %53 = vector.load %arg1[%52, %c0_39, %c13] : memref<1x3x700xf32, #tpu.memory_space<vmem>>, vector<1x1x600xf32>
    %54 = vector.shape_cast %53 : vector<1x1x600xf32> to vector<1x600xf32>
    %c13_40 = arith.constant 13 : index
    %c0_41 = arith.constant 0 : index
    %55 = vector.load %arg10[%c13_40, %c0_41] : memref<90x600xf32, #tpu.memory_space<vmem>>, vector<1x600xf32>
    tpu.vector_store %arg10[%c13_40, %c0_41], %54 {strides = array<i32>} : memref<90x600xf32, #tpu.memory_space<vmem>>, vector<1x600xf32>,
    %56 = arith.index_cast %c0_i32 : i32 to index
    %c0_42 = arith.constant 0 : index
    %c14 = arith.constant 14 : index
    %57 = vector.load %arg1[%56, %c0_42, %c14] : memref<1x3x700xf32, #tpu.memory_space<vmem>>, vector<1x1x600xf32>
    %58 = vector.shape_cast %57 : vector<1x1x600xf32> to vector<1x600xf32>
    %c14_43 = arith.constant 14 : index
    %c0_44 = arith.constant 0 : index
    %59 = vector.load %arg10[%c14_43, %c0_44] : memref<90x600xf32, #tpu.memory_space<vmem>>, vector<1x600xf32>
    tpu.vector_store %arg10[%c14_43, %c0_44], %58 {strides = array<i32>} : memref<90x600xf32, #tpu.memory_space<vmem>>, vector<1x600xf32>,
    %60 = arith.index_cast %c0_i32 : i32 to index
    %c0_45 = arith.constant 0 : index
    %c15 = arith.constant 15 : index
    %61 = vector.load %arg1[%60, %c0_45, %c15] : memref<1x3x700xf32, #tpu.memory_space<vmem>>, vector<1x1x600xf32>
    %62 = vector.shape_cast %61 : vector<1x1x600xf32> to vector<1x600xf32>
    %c15_46 = arith.constant 15 : index
    %c0_47 = arith.constant 0 : index
    %63 = vector.load %arg10[%c15_46, %c0_47] : memref<90x600xf32, #tpu.memory_space<vmem>>, vector<1x600xf32>
    tpu.vector_store %arg10[%c15_46, %c0_47], %62 {strides = array<i32>} : memref<90x600xf32, #tpu.memory_space<vmem>>, vector<1x600xf32>,
    %64 = arith.index_cast %c0_i32 : i32 to index
    %c0_48 = arith.constant 0 : index
    %c16 = arith.constant 16 : index
    %65 = vector.load %arg1[%64, %c0_48, %c16] : memref<1x3x700xf32, #tpu.memory_space<vmem>>, vector<1x1x600xf32>
    %66 = vector.shape_cast %65 : vector<1x1x600xf32> to vector<1x600xf32>
    %c16_49 = arith.constant 16 : index
    %c0_50 = arith.constant 0 : index
    %67 = vector.load %arg10[%c16_49, %c0_50] : memref<90x600xf32, #tpu.memory_space<vmem>>, vector<1x600xf32>
    tpu.vector_store %arg10[%c16_49, %c0_50], %66 {strides = array<i32>} : memref<90x600xf32, #tpu.memory_space<vmem>>, vector<1x600xf32>,
    %68 = arith.index_cast %c0_i32 : i32 to index
    %c0_51 = arith.constant 0 : index
    %c17 = arith.constant 17 : index
    %69 = vector.load %arg1[%68, %c0_51, %c17] : memref<1x3x700xf32, #tpu.memory_space<vmem>>, vector<1x1x600xf32>
    %70 = vector.shape_cast %69 : vector<1x1x600xf32> to vector<1x600xf32>
    %c17_52 = arith.constant 17 : index
    %c0_53 = arith.constant 0 : index
    %71 = vector.load %arg10[%c17_52, %c0_53] : memref<90x600xf32, #tpu.memory_space<vmem>>, vector<1x600xf32>
    tpu.vector_store %arg10[%c17_52, %c0_53], %70 {strides = array<i32>} : memref<90x600xf32, #tpu.memory_space<vmem>>, vector<1x600xf32>,
    %72 = arith.index_cast %c0_i32 : i32 to index
    %c0_54 = arith.constant 0 : index
    %c18 = arith.constant 18 : index
    %73 = vector.load %arg1[%72, %c0_54, %c18] : memref<1x3x700xf32, #tpu.memory_space<vmem>>, vector<1x1x600xf32>
    %74 = vector.shape_cast %73 : vector<1x1x600xf32> to vector<1x600xf32>
    %c18_55 = arith.constant 18 : index
    %c0_56 = arith.constant 0 : index
    %75 = vector.load %arg10[%c18_55, %c0_56] : memref<90x600xf32, #tpu.memory_space<vmem>>, vector<1x600xf32>
    tpu.vector_store %arg10[%c18_55, %c0_56], %74 {strides = array<i32>} : memref<90x600xf32, #tpu.memory_space<vmem>>, vector<1x600xf32>,
    %76 = arith.index_cast %c0_i32 : i32 to index
    %c0_57 = arith.constant 0 : index
    %c19 = arith.constant 19 : index
    %77 = vector.load %arg1[%76, %c0_57, %c19] : memref<1x3x700xf32, #tpu.memory_space<vmem>>, vector<1x1x600xf32>
    %78 = vector.shape_cast %77 : vector<1x1x600xf32> to vector<1x600xf32>
    %c19_58 = arith.constant 19 : index
    %c0_59 = arith.constant 0 : index
    %79 = vector.load %arg10[%c19_58, %c0_59] : memref<90x600xf32, #tpu.memory_space<vmem>>, vector<1x600xf32>
    tpu.vector_store %arg10[%c19_58, %c0_59], %78 {strides = array<i32>} : memref<90x600xf32, #tpu.memory_space<vmem>>, vector<1x600xf32>,
    %80 = arith.index_cast %c0_i32 : i32 to index
    %c0_60 = arith.constant 0 : index
    %c20 = arith.constant 20 : index
    %81 = vector.load %arg1[%80, %c0_60, %c20] : memref<1x3x700xf32, #tpu.memory_space<vmem>>, vector<1x1x600xf32>
    %82 = vector.shape_cast %81 : vector<1x1x600xf32> to vector<1x600xf32>
    %c20_61 = arith.constant 20 : index
    %c0_62 = arith.constant 0 : index
    %83 = vector.load %arg10[%c20_61, %c0_62] : memref<90x600xf32, #tpu.memory_space<vmem>>, vector<1x600xf32>
    tpu.vector_store %arg10[%c20_61, %c0_62], %82 {strides = array<i32>} : memref<90x600xf32, #tpu.memory_space<vmem>>, vector<1x600xf32>,
    %84 = arith.index_cast %c0_i32 : i32 to index
    %c0_63 = arith.constant 0 : index
    %c21 = arith.constant 21 : index
    %85 = vector.load %arg1[%84, %c0_63, %c21] : memref<1x3x700xf32, #tpu.memory_space<vmem>>, vector<1x1x600xf32>
    %86 = vector.shape_cast %85 : vector<1x1x600xf32> to vector<1x600xf32>
    %c21_64 = arith.constant 21 : index
    %c0_65 = arith.constant 0 : index
    %87 = vector.load %arg10[%c21_64, %c0_65] : memref<90x600xf32, #tpu.memory_space<vmem>>, vector<1x600xf32>
    tpu.vector_store %arg10[%c21_64, %c0_65], %86 {strides = array<i32>} : memref<90x600xf32, #tpu.memory_space<vmem>>, vector<1x600xf32>,
    %88 = arith.index_cast %c0_i32 : i32 to index
    %c0_66 = arith.constant 0 : index
    %c22 = arith.constant 22 : index
    %89 = vector.load %arg1[%88, %c0_66, %c22] : memref<1x3x700xf32, #tpu.memory_space<vmem>>, vector<1x1x600xf32>
    %90 = vector.shape_cast %89 : vector<1x1x600xf32> to vector<1x600xf32>
    %c22_67 = arith.constant 22 : index
    %c0_68 = arith.constant 0 : index
    %91 = vector.load %arg10[%c22_67, %c0_68] : memref<90x600xf32, #tpu.memory_space<vmem>>, vector<1x600xf32>
    tpu.vector_store %arg10[%c22_67, %c0_68], %90 {strides = array<i32>} : memref<90x600xf32, #tpu.memory_space<vmem>>, vector<1x600xf32>,
    %92 = arith.index_cast %c0_i32 : i32 to index
    %c0_69 = arith.constant 0 : index
    %c23 = arith.constant 23 : index
    %93 = vector.load %arg1[%92, %c0_69, %c23] : memref<1x3x700xf32, #tpu.memory_space<vmem>>, vector<1x1x600xf32>
    %94 = vector.shape_cast %93 : vector<1x1x600xf32> to vector<1x600xf32>
    %c23_70 = arith.constant 23 : index
    %c0_71 = arith.constant 0 : index
    %95 = vector.load %arg10[%c23_70, %c0_71] : memref<90x600xf32, #tpu.memory_space<vmem>>, vector<1x600xf32>
    tpu.vector_store %arg10[%c23_70, %c0_71], %94 {strides = array<i32>} : memref<90x600xf32, #tpu.memory_space<vmem>>, vector<1x600xf32>,
    %96 = arith.index_cast %c0_i32 : i32 to index
    %c0_72 = arith.constant 0 : index
    %c24 = arith.constant 24 : index
    %97 = vector.load %arg1[%96, %c0_72, %c24] : memref<1x3x700xf32, #tpu.memory_space<vmem>>, vector<1x1x600xf32>
    %98 = vector.shape_cast %97 : vector<1x1x600xf32> to vector<1x600xf32>
    %c24_73 = arith.constant 24 : index
    %c0_74 = arith.constant 0 : index
    %99 = vector.load %arg10[%c24_73, %c0_74] : memref<90x600xf32, #tpu.memory_space<vmem>>, vector<1x600xf32>
    tpu.vector_store %arg10[%c24_73, %c0_74], %98 {strides = array<i32>} : memref<90x600xf32, #tpu.memory_space<vmem>>, vector<1x600xf32>,
    %100 = arith.index_cast %c0_i32 : i32 to index
    %c0_75 = arith.constant 0 : index
    %c25 = arith.constant 25 : index
    %101 = vector.load %arg1[%100, %c0_75, %c25] : memref<1x3x700xf32, #tpu.memory_space<vmem>>, vector<1x1x600xf32>
    %102 = vector.shape_cast %101 : vector<1x1x600xf32> to vector<1x600xf32>
    %c25_76 = arith.constant 25 : index
    %c0_77 = arith.constant 0 : index
    %103 = vector.load %arg10[%c25_76, %c0_77] : memref<90x600xf32, #tpu.memory_space<vmem>>, vector<1x600xf32>
    tpu.vector_store %arg10[%c25_76, %c0_77], %102 {strides = array<i32>} : memref<90x600xf32, #tpu.memory_space<vmem>>, vector<1x600xf32>,
    %104 = arith.index_cast %c0_i32 : i32 to index
    %c0_78 = arith.constant 0 : index
    %c26 = arith.constant 26 : index
    %105 = vector.load %arg1[%104, %c0_78, %c26] : memref<1x3x700xf32, #tpu.memory_space<vmem>>, vector<1x1x600xf32>
    %106 = vector.shape_cast %105 : vector<1x1x600xf32> to vector<1x600xf32>
    %c26_79 = arith.constant 26 : index
    %c0_80 = arith.constant 0 : index
    %107 = vector.load %arg10[%c26_79, %c0_80] : memref<90x600xf32, #tpu.memory_space<vmem>>, vector<1x600xf32>
    tpu.vector_store %arg10[%c26_79, %c0_80], %106 {strides = array<i32>} : memref<90x600xf32, #tpu.memory_space<vmem>>, vector<1x600xf32>,
    %108 = arith.index_cast %c0_i32 : i32 to index
    %c0_81 = arith.constant 0 : index
    %c27 = arith.constant 27 : index
    %109 = vector.load %arg1[%108, %c0_81, %c27] : memref<1x3x700xf32, #tpu.memory_space<vmem>>, vector<1x1x600xf32>
    %110 = vector.shape_cast %109 : vector<1x1x600xf32> to vector<1x600xf32>
    %c27_82 = arith.constant 27 : index
    %c0_83 = arith.constant 0 : index
    %111 = vector.load %arg10[%c27_82, %c0_83] : memref<90x600xf32, #tpu.memory_space<vmem>>, vector<1x600xf32>
    tpu.vector_store %arg10[%c27_82, %c0_83], %110 {strides = array<i32>} : memref<90x600xf32, #tpu.memory_space<vmem>>, vector<1x600xf32>,
    %112 = arith.index_cast %c0_i32 : i32 to index
    %c0_84 = arith.constant 0 : index
    %c28 = arith.constant 28 : index
    %113 = vector.load %arg1[%112, %c0_84, %c28] : memref<1x3x700xf32, #tpu.memory_space<vmem>>, vector<1x1x600xf32>
    %114 = vector.shape_cast %113 : vector<1x1x600xf32> to vector<1x600xf32>
    %c28_85 = arith.constant 28 : index
    %c0_86 = arith.constant 0 : index
    %115 = vector.load %arg10[%c28_85, %c0_86] : memref<90x600xf32, #tpu.memory_space<vmem>>, vector<1x600xf32>
    tpu.vector_store %arg10[%c28_85, %c0_86], %114 {strides = array<i32>} : memref<90x600xf32, #tpu.memory_space<vmem>>, vector<1x600xf32>,
    %116 = arith.index_cast %c0_i32 : i32 to index
    %c0_87 = arith.constant 0 : index
    %c29 = arith.constant 29 : index
    %117 = vector.load %arg1[%116, %c0_87, %c29] : memref<1x3x700xf32, #tpu.memory_space<vmem>>, vector<1x1x600xf32>
    %118 = vector.shape_cast %117 : vector<1x1x600xf32> to vector<1x600xf32>
    %c29_88 = arith.constant 29 : index
    %c0_89 = arith.constant 0 : index
    %119 = vector.load %arg10[%c29_88, %c0_89] : memref<90x600xf32, #tpu.memory_space<vmem>>, vector<1x600xf32>
    tpu.vector_store %arg10[%c29_88, %c0_89], %118 {strides = array<i32>} : memref<90x600xf32, #tpu.memory_space<vmem>>, vector<1x600xf32>,
    %120 = arith.index_cast %c0_i32 : i32 to index
    %c1_90 = arith.constant 1 : index
    %c0_91 = arith.constant 0 : index
    %121 = vector.load %arg1[%120, %c1_90, %c0_91] : memref<1x3x700xf32, #tpu.memory_space<vmem>>, vector<1x1x600xf32>
    %122 = vector.shape_cast %121 : vector<1x1x600xf32> to vector<1x600xf32>
    %c30 = arith.constant 30 : index
    %c0_92 = arith.constant 0 : index
    %123 = vector.load %arg10[%c30, %c0_92] : memref<90x600xf32, #tpu.memory_space<vmem>>, vector<1x600xf32>
    tpu.vector_store %arg10[%c30, %c0_92], %122 {strides = array<i32>} : memref<90x600xf32, #tpu.memory_space<vmem>>, vector<1x600xf32>,
    %124 = arith.index_cast %c0_i32 : i32 to index
    %c1_93 = arith.constant 1 : index
    %c1_94 = arith.constant 1 : index
    %125 = vector.load %arg1[%124, %c1_93, %c1_94] : memref<1x3x700xf32, #tpu.memory_space<vmem>>, vector<1x1x600xf32>
    %126 = vector.shape_cast %125 : vector<1x1x600xf32> to vector<1x600xf32>
    %c31 = arith.constant 31 : index
    %c0_95 = arith.constant 0 : index
    %127 = vector.load %arg10[%c31, %c0_95] : memref<90x600xf32, #tpu.memory_space<vmem>>, vector<1x600xf32>
    tpu.vector_store %arg10[%c31, %c0_95], %126 {strides = array<i32>} : memref<90x600xf32, #tpu.memory_space<vmem>>, vector<1x600xf32>,
    %128 = arith.index_cast %c0_i32 : i32 to index
    %c1_96 = arith.constant 1 : index
    %c2_97 = arith.constant 2 : index
    %129 = vector.load %arg1[%128, %c1_96, %c2_97] : memref<1x3x700xf32, #tpu.memory_space<vmem>>, vector<1x1x600xf32>
    %130 = vector.shape_cast %129 : vector<1x1x600xf32> to vector<1x600xf32>
    %c32 = arith.constant 32 : index
    %c0_98 = arith.constant 0 : index
    %131 = vector.load %arg10[%c32, %c0_98] : memref<90x600xf32, #tpu.memory_space<vmem>>, vector<1x600xf32>
    tpu.vector_store %arg10[%c32, %c0_98], %130 {strides = array<i32>} : memref<90x600xf32, #tpu.memory_space<vmem>>, vector<1x600xf32>,
    %132 = arith.index_cast %c0_i32 : i32 to index
    %c1_99 = arith.constant 1 : index
    %c3_100 = arith.constant 3 : index
    %133 = vector.load %arg1[%132, %c1_99, %c3_100] : memref<1x3x700xf32, #tpu.memory_space<vmem>>, vector<1x1x600xf32>
    %134 = vector.shape_cast %133 : vector<1x1x600xf32> to vector<1x600xf32>
    %c33 = arith.constant 33 : index
    %c0_101 = arith.constant 0 : index
    %135 = vector.load %arg10[%c33, %c0_101] : memref<90x600xf32, #tpu.memory_space<vmem>>, vector<1x600xf32>
    tpu.vector_store %arg10[%c33, %c0_101], %134 {strides = array<i32>} : memref<90x600xf32, #tpu.memory_space<vmem>>, vector<1x600xf32>,
    %136 = arith.index_cast %c0_i32 : i32 to index
    %c1_102 = arith.constant 1 : index
    %c4_103 = arith.constant 4 : index
    %137 = vector.load %arg1[%136, %c1_102, %c4_103] : memref<1x3x700xf32, #tpu.memory_space<vmem>>, vector<1x1x600xf32>
    %138 = vector.shape_cast %137 : vector<1x1x600xf32> to vector<1x600xf32>
    %c34 = arith.constant 34 : index
    %c0_104 = arith.constant 0 : index
    %139 = vector.load %arg10[%c34, %c0_104] : memref<90x600xf32, #tpu.memory_space<vmem>>, vector<1x600xf32>
    tpu.vector_store %arg10[%c34, %c0_104], %138 {strides = array<i32>} : memref<90x600xf32, #tpu.memory_space<vmem>>, vector<1x600xf32>,
    %140 = arith.index_cast %c0_i32 : i32 to index
    %c1_105 = arith.constant 1 : index
    %c5_106 = arith.constant 5 : index
    %141 = vector.load %arg1[%140, %c1_105, %c5_106] : memref<1x3x700xf32, #tpu.memory_space<vmem>>, vector<1x1x600xf32>
    %142 = vector.shape_cast %141 : vector<1x1x600xf32> to vector<1x600xf32>
    %c35 = arith.constant 35 : index
    %c0_107 = arith.constant 0 : index
    %143 = vector.load %arg10[%c35, %c0_107] : memref<90x600xf32, #tpu.memory_space<vmem>>, vector<1x600xf32>
    tpu.vector_store %arg10[%c35, %c0_107], %142 {strides = array<i32>} : memref<90x600xf32, #tpu.memory_space<vmem>>, vector<1x600xf32>,
    %144 = arith.index_cast %c0_i32 : i32 to index
    %c1_108 = arith.constant 1 : index
    %c6_109 = arith.constant 6 : index
    %145 = vector.load %arg1[%144, %c1_108, %c6_109] : memref<1x3x700xf32, #tpu.memory_space<vmem>>, vector<1x1x600xf32>
    %146 = vector.shape_cast %145 : vector<1x1x600xf32> to vector<1x600xf32>
    %c36 = arith.constant 36 : index
    %c0_110 = arith.constant 0 : index
    %147 = vector.load %arg10[%c36, %c0_110] : memref<90x600xf32, #tpu.memory_space<vmem>>, vector<1x600xf32>
    tpu.vector_store %arg10[%c36, %c0_110], %146 {strides = array<i32>} : memref<90x600xf32, #tpu.memory_space<vmem>>, vector<1x600xf32>,
    %148 = arith.index_cast %c0_i32 : i32 to index
    %c1_111 = arith.constant 1 : index
    %c7_112 = arith.constant 7 : index
    %149 = vector.load %arg1[%148, %c1_111, %c7_112] : memref<1x3x700xf32, #tpu.memory_space<vmem>>, vector<1x1x600xf32>
    %150 = vector.shape_cast %149 : vector<1x1x600xf32> to vector<1x600xf32>
    %c37 = arith.constant 37 : index
    %c0_113 = arith.constant 0 : index
    %151 = vector.load %arg10[%c37, %c0_113] : memref<90x600xf32, #tpu.memory_space<vmem>>, vector<1x600xf32>
    tpu.vector_store %arg10[%c37, %c0_113], %150 {strides = array<i32>} : memref<90x600xf32, #tpu.memory_space<vmem>>, vector<1x600xf32>,
    %152 = arith.index_cast %c0_i32 : i32 to index
    %c1_114 = arith.constant 1 : index
    %c8_115 = arith.constant 8 : index
    %153 = vector.load %arg1[%152, %c1_114, %c8_115] : memref<1x3x700xf32, #tpu.memory_space<vmem>>, vector<1x1x600xf32>
    %154 = vector.shape_cast %153 : vector<1x1x600xf32> to vector<1x600xf32>
    %c38 = arith.constant 38 : index
    %c0_116 = arith.constant 0 : index
    %155 = vector.load %arg10[%c38, %c0_116] : memref<90x600xf32, #tpu.memory_space<vmem>>, vector<1x600xf32>
    tpu.vector_store %arg10[%c38, %c0_116], %154 {strides = array<i32>} : memref<90x600xf32, #tpu.memory_space<vmem>>, vector<1x600xf32>,
    %156 = arith.index_cast %c0_i32 : i32 to index
    %c1_117 = arith.constant 1 : index
    %c9_118 = arith.constant 9 : index
    %157 = vector.load %arg1[%156, %c1_117, %c9_118] : memref<1x3x700xf32, #tpu.memory_space<vmem>>, vector<1x1x600xf32>
    %158 = vector.shape_cast %157 : vector<1x1x600xf32> to vector<1x600xf32>
    %c39 = arith.constant 39 : index
    %c0_119 = arith.constant 0 : index
    %159 = vector.load %arg10[%c39, %c0_119] : memref<90x600xf32, #tpu.memory_space<vmem>>, vector<1x600xf32>
    tpu.vector_store %arg10[%c39, %c0_119], %158 {strides = array<i32>} : memref<90x600xf32, #tpu.memory_space<vmem>>, vector<1x600xf32>,
    %160 = arith.index_cast %c0_i32 : i32 to index
    %c1_120 = arith.constant 1 : index
    %c10_121 = arith.constant 10 : index
    %161 = vector.load %arg1[%160, %c1_120, %c10_121] : memref<1x3x700xf32, #tpu.memory_space<vmem>>, vector<1x1x600xf32>
    %162 = vector.shape_cast %161 : vector<1x1x600xf32> to vector<1x600xf32>
    %c40 = arith.constant 40 : index
    %c0_122 = arith.constant 0 : index
    %163 = vector.load %arg10[%c40, %c0_122] : memref<90x600xf32, #tpu.memory_space<vmem>>, vector<1x600xf32>
    tpu.vector_store %arg10[%c40, %c0_122], %162 {strides = array<i32>} : memref<90x600xf32, #tpu.memory_space<vmem>>, vector<1x600xf32>,
    %164 = arith.index_cast %c0_i32 : i32 to index
    %c1_123 = arith.constant 1 : index
    %c11_124 = arith.constant 11 : index
    %165 = vector.load %arg1[%164, %c1_123, %c11_124] : memref<1x3x700xf32, #tpu.memory_space<vmem>>, vector<1x1x600xf32>
    %166 = vector.shape_cast %165 : vector<1x1x600xf32> to vector<1x600xf32>
    %c41 = arith.constant 41 : index
    %c0_125 = arith.constant 0 : index
    %167 = vector.load %arg10[%c41, %c0_125] : memref<90x600xf32, #tpu.memory_space<vmem>>, vector<1x600xf32>
    tpu.vector_store %arg10[%c41, %c0_125], %166 {strides = array<i32>} : memref<90x600xf32, #tpu.memory_space<vmem>>, vector<1x600xf32>,
    %168 = arith.index_cast %c0_i32 : i32 to index
    %c1_126 = arith.constant 1 : index
    %c12_127 = arith.constant 12 : index
    %169 = vector.load %arg1[%168, %c1_126, %c12_127] : memref<1x3x700xf32, #tpu.memory_space<vmem>>, vector<1x1x600xf32>
    %170 = vector.shape_cast %169 : vector<1x1x600xf32> to vector<1x600xf32>
    %c42 = arith.constant 42 : index
    %c0_128 = arith.constant 0 : index
    %171 = vector.load %arg10[%c42, %c0_128] : memref<90x600xf32, #tpu.memory_space<vmem>>, vector<1x600xf32>
    tpu.vector_store %arg10[%c42, %c0_128], %170 {strides = array<i32>} : memref<90x600xf32, #tpu.memory_space<vmem>>, vector<1x600xf32>,
    %172 = arith.index_cast %c0_i32 : i32 to index
    %c1_129 = arith.constant 1 : index
    %c13_130 = arith.constant 13 : index
    %173 = vector.load %arg1[%172, %c1_129, %c13_130] : memref<1x3x700xf32, #tpu.memory_space<vmem>>, vector<1x1x600xf32>
    %174 = vector.shape_cast %173 : vector<1x1x600xf32> to vector<1x600xf32>
    %c43 = arith.constant 43 : index
    %c0_131 = arith.constant 0 : index
    %175 = vector.load %arg10[%c43, %c0_131] : memref<90x600xf32, #tpu.memory_space<vmem>>, vector<1x600xf32>
    tpu.vector_store %arg10[%c43, %c0_131], %174 {strides = array<i32>} : memref<90x600xf32, #tpu.memory_space<vmem>>, vector<1x600xf32>,
    %176 = arith.index_cast %c0_i32 : i32 to index
    %c1_132 = arith.constant 1 : index
    %c14_133 = arith.constant 14 : index
    %177 = vector.load %arg1[%176, %c1_132, %c14_133] : memref<1x3x700xf32, #tpu.memory_space<vmem>>, vector<1x1x600xf32>
    %178 = vector.shape_cast %177 : vector<1x1x600xf32> to vector<1x600xf32>
    %c44 = arith.constant 44 : index
    %c0_134 = arith.constant 0 : index
    %179 = vector.load %arg10[%c44, %c0_134] : memref<90x600xf32, #tpu.memory_space<vmem>>, vector<1x600xf32>
    tpu.vector_store %arg10[%c44, %c0_134], %178 {strides = array<i32>} : memref<90x600xf32, #tpu.memory_space<vmem>>, vector<1x600xf32>,
    %180 = arith.index_cast %c0_i32 : i32 to index
    %c1_135 = arith.constant 1 : index
    %c15_136 = arith.constant 15 : index
    %181 = vector.load %arg1[%180, %c1_135, %c15_136] : memref<1x3x700xf32, #tpu.memory_space<vmem>>, vector<1x1x600xf32>
    %182 = vector.shape_cast %181 : vector<1x1x600xf32> to vector<1x600xf32>
    %c45 = arith.constant 45 : index
    %c0_137 = arith.constant 0 : index
    %183 = vector.load %arg10[%c45, %c0_137] : memref<90x600xf32, #tpu.memory_space<vmem>>, vector<1x600xf32>
    tpu.vector_store %arg10[%c45, %c0_137], %182 {strides = array<i32>} : memref<90x600xf32, #tpu.memory_space<vmem>>, vector<1x600xf32>,
    %184 = arith.index_cast %c0_i32 : i32 to index
    %c1_138 = arith.constant 1 : index
    %c16_139 = arith.constant 16 : index
    %185 = vector.load %arg1[%184, %c1_138, %c16_139] : memref<1x3x700xf32, #tpu.memory_space<vmem>>, vector<1x1x600xf32>
    %186 = vector.shape_cast %185 : vector<1x1x600xf32> to vector<1x600xf32>
    %c46 = arith.constant 46 : index
    %c0_140 = arith.constant 0 : index
    %187 = vector.load %arg10[%c46, %c0_140] : memref<90x600xf32, #tpu.memory_space<vmem>>, vector<1x600xf32>
    tpu.vector_store %arg10[%c46, %c0_140], %186 {strides = array<i32>} : memref<90x600xf32, #tpu.memory_space<vmem>>, vector<1x600xf32>,
    %188 = arith.index_cast %c0_i32 : i32 to index
    %c1_141 = arith.constant 1 : index
    %c17_142 = arith.constant 17 : index
    %189 = vector.load %arg1[%188, %c1_141, %c17_142] : memref<1x3x700xf32, #tpu.memory_space<vmem>>, vector<1x1x600xf32>
    %190 = vector.shape_cast %189 : vector<1x1x600xf32> to vector<1x600xf32>
    %c47 = arith.constant 47 : index
    %c0_143 = arith.constant 0 : index
    %191 = vector.load %arg10[%c47, %c0_143] : memref<90x600xf32, #tpu.memory_space<vmem>>, vector<1x600xf32>
    tpu.vector_store %arg10[%c47, %c0_143], %190 {strides = array<i32>} : memref<90x600xf32, #tpu.memory_space<vmem>>, vector<1x600xf32>,
    %192 = arith.index_cast %c0_i32 : i32 to index
    %c1_144 = arith.constant 1 : index
    %c18_145 = arith.constant 18 : index
    %193 = vector.load %arg1[%192, %c1_144, %c18_145] : memref<1x3x700xf32, #tpu.memory_space<vmem>>, vector<1x1x600xf32>
    %194 = vector.shape_cast %193 : vector<1x1x600xf32> to vector<1x600xf32>
    %c48 = arith.constant 48 : index
    %c0_146 = arith.constant 0 : index
    %195 = vector.load %arg10[%c48, %c0_146] : memref<90x600xf32, #tpu.memory_space<vmem>>, vector<1x600xf32>
    tpu.vector_store %arg10[%c48, %c0_146], %194 {strides = array<i32>} : memref<90x600xf32, #tpu.memory_space<vmem>>, vector<1x600xf32>,
    %196 = arith.index_cast %c0_i32 : i32 to index
    %c1_147 = arith.constant 1 : index
    %c19_148 = arith.constant 19 : index
    %197 = vector.load %arg1[%196, %c1_147, %c19_148] : memref<1x3x700xf32, #tpu.memory_space<vmem>>, vector<1x1x600xf32>
    %198 = vector.shape_cast %197 : vector<1x1x600xf32> to vector<1x600xf32>
    %c49 = arith.constant 49 : index
    %c0_149 = arith.constant 0 : index
    %199 = vector.load %arg10[%c49, %c0_149] : memref<90x600xf32, #tpu.memory_space<vmem>>, vector<1x600xf32>
    tpu.vector_store %arg10[%c49, %c0_149], %198 {strides = array<i32>} : memref<90x600xf32, #tpu.memory_space<vmem>>, vector<1x600xf32>,
    %200 = arith.index_cast %c0_i32 : i32 to index
    %c1_150 = arith.constant 1 : index
    %c20_151 = arith.constant 20 : index
    %201 = vector.load %arg1[%200, %c1_150, %c20_151] : memref<1x3x700xf32, #tpu.memory_space<vmem>>, vector<1x1x600xf32>
    %202 = vector.shape_cast %201 : vector<1x1x600xf32> to vector<1x600xf32>
    %c50 = arith.constant 50 : index
    %c0_152 = arith.constant 0 : index
    %203 = vector.load %arg10[%c50, %c0_152] : memref<90x600xf32, #tpu.memory_space<vmem>>, vector<1x600xf32>
    tpu.vector_store %arg10[%c50, %c0_152], %202 {strides = array<i32>} : memref<90x600xf32, #tpu.memory_space<vmem>>, vector<1x600xf32>,
    %204 = arith.index_cast %c0_i32 : i32 to index
    %c1_153 = arith.constant 1 : index
    %c21_154 = arith.constant 21 : index
    %205 = vector.load %arg1[%204, %c1_153, %c21_154] : memref<1x3x700xf32, #tpu.memory_space<vmem>>, vector<1x1x600xf32>
    %206 = vector.shape_cast %205 : vector<1x1x600xf32> to vector<1x600xf32>
    %c51 = arith.constant 51 : index
    %c0_155 = arith.constant 0 : index
    %207 = vector.load %arg10[%c51, %c0_155] : memref<90x600xf32, #tpu.memory_space<vmem>>, vector<1x600xf32>
    tpu.vector_store %arg10[%c51, %c0_155], %206 {strides = array<i32>} : memref<90x600xf32, #tpu.memory_space<vmem>>, vector<1x600xf32>,
    %208 = arith.index_cast %c0_i32 : i32 to index
    %c1_156 = arith.constant 1 : index
    %c22_157 = arith.constant 22 : index
    %209 = vector.load %arg1[%208, %c1_156, %c22_157] : memref<1x3x700xf32, #tpu.memory_space<vmem>>, vector<1x1x600xf32>
    %210 = vector.shape_cast %209 : vector<1x1x600xf32> to vector<1x600xf32>
    %c52 = arith.constant 52 : index
    %c0_158 = arith.constant 0 : index
    %211 = vector.load %arg10[%c52, %c0_158] : memref<90x600xf32, #tpu.memory_space<vmem>>, vector<1x600xf32>
    tpu.vector_store %arg10[%c52, %c0_158], %210 {strides = array<i32>} : memref<90x600xf32, #tpu.memory_space<vmem>>, vector<1x600xf32>,
    %212 = arith.index_cast %c0_i32 : i32 to index
    %c1_159 = arith.constant 1 : index
    %c23_160 = arith.constant 23 : index
    %213 = vector.load %arg1[%212, %c1_159, %c23_160] : memref<1x3x700xf32, #tpu.memory_space<vmem>>, vector<1x1x600xf32>
    %214 = vector.shape_cast %213 : vector<1x1x600xf32> to vector<1x600xf32>
    %c53 = arith.constant 53 : index
    %c0_161 = arith.constant 0 : index
    %215 = vector.load %arg10[%c53, %c0_161] : memref<90x600xf32, #tpu.memory_space<vmem>>, vector<1x600xf32>
    tpu.vector_store %arg10[%c53, %c0_161], %214 {strides = array<i32>} : memref<90x600xf32, #tpu.memory_space<vmem>>, vector<1x600xf32>,
    %216 = arith.index_cast %c0_i32 : i32 to index
    %c1_162 = arith.constant 1 : index
    %c24_163 = arith.constant 24 : index
    %217 = vector.load %arg1[%216, %c1_162, %c24_163] : memref<1x3x700xf32, #tpu.memory_space<vmem>>, vector<1x1x600xf32>
    %218 = vector.shape_cast %217 : vector<1x1x600xf32> to vector<1x600xf32>
    %c54 = arith.constant 54 : index
    %c0_164 = arith.constant 0 : index
    %219 = vector.load %arg10[%c54, %c0_164] : memref<90x600xf32, #tpu.memory_space<vmem>>, vector<1x600xf32>
    tpu.vector_store %arg10[%c54, %c0_164], %218 {strides = array<i32>} : memref<90x600xf32, #tpu.memory_space<vmem>>, vector<1x600xf32>,
    %220 = arith.index_cast %c0_i32 : i32 to index
    %c1_165 = arith.constant 1 : index
    %c25_166 = arith.constant 25 : index
    %221 = vector.load %arg1[%220, %c1_165, %c25_166] : memref<1x3x700xf32, #tpu.memory_space<vmem>>, vector<1x1x600xf32>
    %222 = vector.shape_cast %221 : vector<1x1x600xf32> to vector<1x600xf32>
    %c55 = arith.constant 55 : index
    %c0_167 = arith.constant 0 : index
    %223 = vector.load %arg10[%c55, %c0_167] : memref<90x600xf32, #tpu.memory_space<vmem>>, vector<1x600xf32>
    tpu.vector_store %arg10[%c55, %c0_167], %222 {strides = array<i32>} : memref<90x600xf32, #tpu.memory_space<vmem>>, vector<1x600xf32>,
    %224 = arith.index_cast %c0_i32 : i32 to index
    %c1_168 = arith.constant 1 : index
    %c26_169 = arith.constant 26 : index
    %225 = vector.load %arg1[%224, %c1_168, %c26_169] : memref<1x3x700xf32, #tpu.memory_space<vmem>>, vector<1x1x600xf32>
    %226 = vector.shape_cast %225 : vector<1x1x600xf32> to vector<1x600xf32>
    %c56 = arith.constant 56 : index
    %c0_170 = arith.constant 0 : index
    %227 = vector.load %arg10[%c56, %c0_170] : memref<90x600xf32, #tpu.memory_space<vmem>>, vector<1x600xf32>
    tpu.vector_store %arg10[%c56, %c0_170], %226 {strides = array<i32>} : memref<90x600xf32, #tpu.memory_space<vmem>>, vector<1x600xf32>,
    %228 = arith.index_cast %c0_i32 : i32 to index
    %c1_171 = arith.constant 1 : index
    %c27_172 = arith.constant 27 : index
    %229 = vector.load %arg1[%228, %c1_171, %c27_172] : memref<1x3x700xf32, #tpu.memory_space<vmem>>, vector<1x1x600xf32>
    %230 = vector.shape_cast %229 : vector<1x1x600xf32> to vector<1x600xf32>
    %c57 = arith.constant 57 : index
    %c0_173 = arith.constant 0 : index
    %231 = vector.load %arg10[%c57, %c0_173] : memref<90x600xf32, #tpu.memory_space<vmem>>, vector<1x600xf32>
    tpu.vector_store %arg10[%c57, %c0_173], %230 {strides = array<i32>} : memref<90x600xf32, #tpu.memory_space<vmem>>, vector<1x600xf32>,
    %232 = arith.index_cast %c0_i32 : i32 to index
    %c1_174 = arith.constant 1 : index
    %c28_175 = arith.constant 28 : index
    %233 = vector.load %arg1[%232, %c1_174, %c28_175] : memref<1x3x700xf32, #tpu.memory_space<vmem>>, vector<1x1x600xf32>
    %234 = vector.shape_cast %233 : vector<1x1x600xf32> to vector<1x600xf32>
    %c58 = arith.constant 58 : index
    %c0_176 = arith.constant 0 : index
    %235 = vector.load %arg10[%c58, %c0_176] : memref<90x600xf32, #tpu.memory_space<vmem>>, vector<1x600xf32>
    tpu.vector_store %arg10[%c58, %c0_176], %234 {strides = array<i32>} : memref<90x600xf32, #tpu.memory_space<vmem>>, vector<1x600xf32>,
    %236 = arith.index_cast %c0_i32 : i32 to index
    %c1_177 = arith.constant 1 : index
    %c29_178 = arith.constant 29 : index
    %237 = vector.load %arg1[%236, %c1_177, %c29_178] : memref<1x3x700xf32, #tpu.memory_space<vmem>>, vector<1x1x600xf32>
    %238 = vector.shape_cast %237 : vector<1x1x600xf32> to vector<1x600xf32>
    %c59 = arith.constant 59 : index
    %c0_179 = arith.constant 0 : index
    %239 = vector.load %arg10[%c59, %c0_179] : memref<90x600xf32, #tpu.memory_space<vmem>>, vector<1x600xf32>
    tpu.vector_store %arg10[%c59, %c0_179], %238 {strides = array<i32>} : memref<90x600xf32, #tpu.memory_space<vmem>>, vector<1x600xf32>,
    %240 = arith.index_cast %c0_i32 : i32 to index
    %c2_180 = arith.constant 2 : index
    %c0_181 = arith.constant 0 : index
    %241 = vector.load %arg1[%240, %c2_180, %c0_181] : memref<1x3x700xf32, #tpu.memory_space<vmem>>, vector<1x1x600xf32>
    %242 = vector.shape_cast %241 : vector<1x1x600xf32> to vector<1x600xf32>
    %c60 = arith.constant 60 : index
    %c0_182 = arith.constant 0 : index
    %243 = vector.load %arg10[%c60, %c0_182] : memref<90x600xf32, #tpu.memory_space<vmem>>, vector<1x600xf32>
    tpu.vector_store %arg10[%c60, %c0_182], %242 {strides = array<i32>} : memref<90x600xf32, #tpu.memory_space<vmem>>, vector<1x600xf32>,
    %244 = arith.index_cast %c0_i32 : i32 to index
    %c2_183 = arith.constant 2 : index
    %c1_184 = arith.constant 1 : index
    %245 = vector.load %arg1[%244, %c2_183, %c1_184] : memref<1x3x700xf32, #tpu.memory_space<vmem>>, vector<1x1x600xf32>
    %246 = vector.shape_cast %245 : vector<1x1x600xf32> to vector<1x600xf32>
    %c61 = arith.constant 61 : index
    %c0_185 = arith.constant 0 : index
    %247 = vector.load %arg10[%c61, %c0_185] : memref<90x600xf32, #tpu.memory_space<vmem>>, vector<1x600xf32>
    tpu.vector_store %arg10[%c61, %c0_185], %246 {strides = array<i32>} : memref<90x600xf32, #tpu.memory_space<vmem>>, vector<1x600xf32>,
    %248 = arith.index_cast %c0_i32 : i32 to index
    %c2_186 = arith.constant 2 : index
    %c2_187 = arith.constant 2 : index
    %249 = vector.load %arg1[%248, %c2_186, %c2_187] : memref<1x3x700xf32, #tpu.memory_space<vmem>>, vector<1x1x600xf32>
    %250 = vector.shape_cast %249 : vector<1x1x600xf32> to vector<1x600xf32>
    %c62 = arith.constant 62 : index
    %c0_188 = arith.constant 0 : index
    %251 = vector.load %arg10[%c62, %c0_188] : memref<90x600xf32, #tpu.memory_space<vmem>>, vector<1x600xf32>
    tpu.vector_store %arg10[%c62, %c0_188], %250 {strides = array<i32>} : memref<90x600xf32, #tpu.memory_space<vmem>>, vector<1x600xf32>,
    %252 = arith.index_cast %c0_i32 : i32 to index
    %c2_189 = arith.constant 2 : index
    %c3_190 = arith.constant 3 : index
    %253 = vector.load %arg1[%252, %c2_189, %c3_190] : memref<1x3x700xf32, #tpu.memory_space<vmem>>, vector<1x1x600xf32>
    %254 = vector.shape_cast %253 : vector<1x1x600xf32> to vector<1x600xf32>
    %c63 = arith.constant 63 : index
    %c0_191 = arith.constant 0 : index
    %255 = vector.load %arg10[%c63, %c0_191] : memref<90x600xf32, #tpu.memory_space<vmem>>, vector<1x600xf32>
    tpu.vector_store %arg10[%c63, %c0_191], %254 {strides = array<i32>} : memref<90x600xf32, #tpu.memory_space<vmem>>, vector<1x600xf32>,
    %256 = arith.index_cast %c0_i32 : i32 to index
    %c2_192 = arith.constant 2 : index
    %c4_193 = arith.constant 4 : index
    %257 = vector.load %arg1[%256, %c2_192, %c4_193] : memref<1x3x700xf32, #tpu.memory_space<vmem>>, vector<1x1x600xf32>
    %258 = vector.shape_cast %257 : vector<1x1x600xf32> to vector<1x600xf32>
    %c64 = arith.constant 64 : index
    %c0_194 = arith.constant 0 : index
    %259 = vector.load %arg10[%c64, %c0_194] : memref<90x600xf32, #tpu.memory_space<vmem>>, vector<1x600xf32>
    tpu.vector_store %arg10[%c64, %c0_194], %258 {strides = array<i32>} : memref<90x600xf32, #tpu.memory_space<vmem>>, vector<1x600xf32>,
    %260 = arith.index_cast %c0_i32 : i32 to index
    %c2_195 = arith.constant 2 : index
    %c5_196 = arith.constant 5 : index
    %261 = vector.load %arg1[%260, %c2_195, %c5_196] : memref<1x3x700xf32, #tpu.memory_space<vmem>>, vector<1x1x600xf32>
    %262 = vector.shape_cast %261 : vector<1x1x600xf32> to vector<1x600xf32>
    %c65 = arith.constant 65 : index
    %c0_197 = arith.constant 0 : index
    %263 = vector.load %arg10[%c65, %c0_197] : memref<90x600xf32, #tpu.memory_space<vmem>>, vector<1x600xf32>
    tpu.vector_store %arg10[%c65, %c0_197], %262 {strides = array<i32>} : memref<90x600xf32, #tpu.memory_space<vmem>>, vector<1x600xf32>,
    %264 = arith.index_cast %c0_i32 : i32 to index
    %c2_198 = arith.constant 2 : index
    %c6_199 = arith.constant 6 : index
    %265 = vector.load %arg1[%264, %c2_198, %c6_199] : memref<1x3x700xf32, #tpu.memory_space<vmem>>, vector<1x1x600xf32>
    %266 = vector.shape_cast %265 : vector<1x1x600xf32> to vector<1x600xf32>
    %c66 = arith.constant 66 : index
    %c0_200 = arith.constant 0 : index
    %267 = vector.load %arg10[%c66, %c0_200] : memref<90x600xf32, #tpu.memory_space<vmem>>, vector<1x600xf32>
    tpu.vector_store %arg10[%c66, %c0_200], %266 {strides = array<i32>} : memref<90x600xf32, #tpu.memory_space<vmem>>, vector<1x600xf32>,
    %268 = arith.index_cast %c0_i32 : i32 to index
    %c2_201 = arith.constant 2 : index
    %c7_202 = arith.constant 7 : index
    %269 = vector.load %arg1[%268, %c2_201, %c7_202] : memref<1x3x700xf32, #tpu.memory_space<vmem>>, vector<1x1x600xf32>
    %270 = vector.shape_cast %269 : vector<1x1x600xf32> to vector<1x600xf32>
    %c67 = arith.constant 67 : index
    %c0_203 = arith.constant 0 : index
    %271 = vector.load %arg10[%c67, %c0_203] : memref<90x600xf32, #tpu.memory_space<vmem>>, vector<1x600xf32>
    tpu.vector_store %arg10[%c67, %c0_203], %270 {strides = array<i32>} : memref<90x600xf32, #tpu.memory_space<vmem>>, vector<1x600xf32>,
    %272 = arith.index_cast %c0_i32 : i32 to index
    %c2_204 = arith.constant 2 : index
    %c8_205 = arith.constant 8 : index
    %273 = vector.load %arg1[%272, %c2_204, %c8_205] : memref<1x3x700xf32, #tpu.memory_space<vmem>>, vector<1x1x600xf32>
    %274 = vector.shape_cast %273 : vector<1x1x600xf32> to vector<1x600xf32>
    %c68 = arith.constant 68 : index
    %c0_206 = arith.constant 0 : index
    %275 = vector.load %arg10[%c68, %c0_206] : memref<90x600xf32, #tpu.memory_space<vmem>>, vector<1x600xf32>
    tpu.vector_store %arg10[%c68, %c0_206], %274 {strides = array<i32>} : memref<90x600xf32, #tpu.memory_space<vmem>>, vector<1x600xf32>,
    %276 = arith.index_cast %c0_i32 : i32 to index
    %c2_207 = arith.constant 2 : index
    %c9_208 = arith.constant 9 : index
    %277 = vector.load %arg1[%276, %c2_207, %c9_208] : memref<1x3x700xf32, #tpu.memory_space<vmem>>, vector<1x1x600xf32>
    %278 = vector.shape_cast %277 : vector<1x1x600xf32> to vector<1x600xf32>
    %c69 = arith.constant 69 : index
    %c0_209 = arith.constant 0 : index
    %279 = vector.load %arg10[%c69, %c0_209] : memref<90x600xf32, #tpu.memory_space<vmem>>, vector<1x600xf32>
    tpu.vector_store %arg10[%c69, %c0_209], %278 {strides = array<i32>} : memref<90x600xf32, #tpu.memory_space<vmem>>, vector<1x600xf32>,
    %280 = arith.index_cast %c0_i32 : i32 to index
    %c2_210 = arith.constant 2 : index
    %c10_211 = arith.constant 10 : index
    %281 = vector.load %arg1[%280, %c2_210, %c10_211] : memref<1x3x700xf32, #tpu.memory_space<vmem>>, vector<1x1x600xf32>
    %282 = vector.shape_cast %281 : vector<1x1x600xf32> to vector<1x600xf32>
    %c70 = arith.constant 70 : index
    %c0_212 = arith.constant 0 : index
    %283 = vector.load %arg10[%c70, %c0_212] : memref<90x600xf32, #tpu.memory_space<vmem>>, vector<1x600xf32>
    tpu.vector_store %arg10[%c70, %c0_212], %282 {strides = array<i32>} : memref<90x600xf32, #tpu.memory_space<vmem>>, vector<1x600xf32>,
    %284 = arith.index_cast %c0_i32 : i32 to index
    %c2_213 = arith.constant 2 : index
    %c11_214 = arith.constant 11 : index
    %285 = vector.load %arg1[%284, %c2_213, %c11_214] : memref<1x3x700xf32, #tpu.memory_space<vmem>>, vector<1x1x600xf32>
    %286 = vector.shape_cast %285 : vector<1x1x600xf32> to vector<1x600xf32>
    %c71 = arith.constant 71 : index
    %c0_215 = arith.constant 0 : index
    %287 = vector.load %arg10[%c71, %c0_215] : memref<90x600xf32, #tpu.memory_space<vmem>>, vector<1x600xf32>
    tpu.vector_store %arg10[%c71, %c0_215], %286 {strides = array<i32>} : memref<90x600xf32, #tpu.memory_space<vmem>>, vector<1x600xf32>,
    %288 = arith.index_cast %c0_i32 : i32 to index
    %c2_216 = arith.constant 2 : index
    %c12_217 = arith.constant 12 : index
    %289 = vector.load %arg1[%288, %c2_216, %c12_217] : memref<1x3x700xf32, #tpu.memory_space<vmem>>, vector<1x1x600xf32>
    %290 = vector.shape_cast %289 : vector<1x1x600xf32> to vector<1x600xf32>
    %c72 = arith.constant 72 : index
    %c0_218 = arith.constant 0 : index
    %291 = vector.load %arg10[%c72, %c0_218] : memref<90x600xf32, #tpu.memory_space<vmem>>, vector<1x600xf32>
    tpu.vector_store %arg10[%c72, %c0_218], %290 {strides = array<i32>} : memref<90x600xf32, #tpu.memory_space<vmem>>, vector<1x600xf32>,
    %292 = arith.index_cast %c0_i32 : i32 to index
    %c2_219 = arith.constant 2 : index
    %c13_220 = arith.constant 13 : index
    %293 = vector.load %arg1[%292, %c2_219, %c13_220] : memref<1x3x700xf32, #tpu.memory_space<vmem>>, vector<1x1x600xf32>
    %294 = vector.shape_cast %293 : vector<1x1x600xf32> to vector<1x600xf32>
    %c73 = arith.constant 73 : index
    %c0_221 = arith.constant 0 : index
    %295 = vector.load %arg10[%c73, %c0_221] : memref<90x600xf32, #tpu.memory_space<vmem>>, vector<1x600xf32>
    tpu.vector_store %arg10[%c73, %c0_221], %294 {strides = array<i32>} : memref<90x600xf32, #tpu.memory_space<vmem>>, vector<1x600xf32>,
    %296 = arith.index_cast %c0_i32 : i32 to index
    %c2_222 = arith.constant 2 : index
    %c14_223 = arith.constant 14 : index
    %297 = vector.load %arg1[%296, %c2_222, %c14_223] : memref<1x3x700xf32, #tpu.memory_space<vmem>>, vector<1x1x600xf32>
    %298 = vector.shape_cast %297 : vector<1x1x600xf32> to vector<1x600xf32>
    %c74 = arith.constant 74 : index
    %c0_224 = arith.constant 0 : index
    %299 = vector.load %arg10[%c74, %c0_224] : memref<90x600xf32, #tpu.memory_space<vmem>>, vector<1x600xf32>
    tpu.vector_store %arg10[%c74, %c0_224], %298 {strides = array<i32>} : memref<90x600xf32, #tpu.memory_space<vmem>>, vector<1x600xf32>,
    %300 = arith.index_cast %c0_i32 : i32 to index
    %c2_225 = arith.constant 2 : index
    %c15_226 = arith.constant 15 : index
    %301 = vector.load %arg1[%300, %c2_225, %c15_226] : memref<1x3x700xf32, #tpu.memory_space<vmem>>, vector<1x1x600xf32>
    %302 = vector.shape_cast %301 : vector<1x1x600xf32> to vector<1x600xf32>
    %c75 = arith.constant 75 : index
    %c0_227 = arith.constant 0 : index
    %303 = vector.load %arg10[%c75, %c0_227] : memref<90x600xf32, #tpu.memory_space<vmem>>, vector<1x600xf32>
    tpu.vector_store %arg10[%c75, %c0_227], %302 {strides = array<i32>} : memref<90x600xf32, #tpu.memory_space<vmem>>, vector<1x600xf32>,
    %304 = arith.index_cast %c0_i32 : i32 to index
    %c2_228 = arith.constant 2 : index
    %c16_229 = arith.constant 16 : index
    %305 = vector.load %arg1[%304, %c2_228, %c16_229] : memref<1x3x700xf32, #tpu.memory_space<vmem>>, vector<1x1x600xf32>
    %306 = vector.shape_cast %305 : vector<1x1x600xf32> to vector<1x600xf32>
    %c76 = arith.constant 76 : index
    %c0_230 = arith.constant 0 : index
    %307 = vector.load %arg10[%c76, %c0_230] : memref<90x600xf32, #tpu.memory_space<vmem>>, vector<1x600xf32>
    tpu.vector_store %arg10[%c76, %c0_230], %306 {strides = array<i32>} : memref<90x600xf32, #tpu.memory_space<vmem>>, vector<1x600xf32>,
    %308 = arith.index_cast %c0_i32 : i32 to index
    %c2_231 = arith.constant 2 : index
    %c17_232 = arith.constant 17 : index
    %309 = vector.load %arg1[%308, %c2_231, %c17_232] : memref<1x3x700xf32, #tpu.memory_space<vmem>>, vector<1x1x600xf32>
    %310 = vector.shape_cast %309 : vector<1x1x600xf32> to vector<1x600xf32>
    %c77 = arith.constant 77 : index
    %c0_233 = arith.constant 0 : index
    %311 = vector.load %arg10[%c77, %c0_233] : memref<90x600xf32, #tpu.memory_space<vmem>>, vector<1x600xf32>
    tpu.vector_store %arg10[%c77, %c0_233], %310 {strides = array<i32>} : memref<90x600xf32, #tpu.memory_space<vmem>>, vector<1x600xf32>,
    %312 = arith.index_cast %c0_i32 : i32 to index
    %c2_234 = arith.constant 2 : index
    %c18_235 = arith.constant 18 : index
    %313 = vector.load %arg1[%312, %c2_234, %c18_235] : memref<1x3x700xf32, #tpu.memory_space<vmem>>, vector<1x1x600xf32>
    %314 = vector.shape_cast %313 : vector<1x1x600xf32> to vector<1x600xf32>
    %c78 = arith.constant 78 : index
    %c0_236 = arith.constant 0 : index
    %315 = vector.load %arg10[%c78, %c0_236] : memref<90x600xf32, #tpu.memory_space<vmem>>, vector<1x600xf32>
    tpu.vector_store %arg10[%c78, %c0_236], %314 {strides = array<i32>} : memref<90x600xf32, #tpu.memory_space<vmem>>, vector<1x600xf32>,
    %316 = arith.index_cast %c0_i32 : i32 to index
    %c2_237 = arith.constant 2 : index
    %c19_238 = arith.constant 19 : index
    %317 = vector.load %arg1[%316, %c2_237, %c19_238] : memref<1x3x700xf32, #tpu.memory_space<vmem>>, vector<1x1x600xf32>
    %318 = vector.shape_cast %317 : vector<1x1x600xf32> to vector<1x600xf32>
    %c79 = arith.constant 79 : index
    %c0_239 = arith.constant 0 : index
    %319 = vector.load %arg10[%c79, %c0_239] : memref<90x600xf32, #tpu.memory_space<vmem>>, vector<1x600xf32>
    tpu.vector_store %arg10[%c79, %c0_239], %318 {strides = array<i32>} : memref<90x600xf32, #tpu.memory_space<vmem>>, vector<1x600xf32>,
    %320 = arith.index_cast %c0_i32 : i32 to index
    %c2_240 = arith.constant 2 : index
    %c20_241 = arith.constant 20 : index
    %321 = vector.load %arg1[%320, %c2_240, %c20_241] : memref<1x3x700xf32, #tpu.memory_space<vmem>>, vector<1x1x600xf32>
    %322 = vector.shape_cast %321 : vector<1x1x600xf32> to vector<1x600xf32>
    %c80 = arith.constant 80 : index
    %c0_242 = arith.constant 0 : index
    %323 = vector.load %arg10[%c80, %c0_242] : memref<90x600xf32, #tpu.memory_space<vmem>>, vector<1x600xf32>
    tpu.vector_store %arg10[%c80, %c0_242], %322 {strides = array<i32>} : memref<90x600xf32, #tpu.memory_space<vmem>>, vector<1x600xf32>,
    %324 = arith.index_cast %c0_i32 : i32 to index
    %c2_243 = arith.constant 2 : index
    %c21_244 = arith.constant 21 : index
    %325 = vector.load %arg1[%324, %c2_243, %c21_244] : memref<1x3x700xf32, #tpu.memory_space<vmem>>, vector<1x1x600xf32>
    %326 = vector.shape_cast %325 : vector<1x1x600xf32> to vector<1x600xf32>
    %c81 = arith.constant 81 : index
    %c0_245 = arith.constant 0 : index
    %327 = vector.load %arg10[%c81, %c0_245] : memref<90x600xf32, #tpu.memory_space<vmem>>, vector<1x600xf32>
    tpu.vector_store %arg10[%c81, %c0_245], %326 {strides = array<i32>} : memref<90x600xf32, #tpu.memory_space<vmem>>, vector<1x600xf32>,
    %328 = arith.index_cast %c0_i32 : i32 to index
    %c2_246 = arith.constant 2 : index
    %c22_247 = arith.constant 22 : index
    %329 = vector.load %arg1[%328, %c2_246, %c22_247] : memref<1x3x700xf32, #tpu.memory_space<vmem>>, vector<1x1x600xf32>
    %330 = vector.shape_cast %329 : vector<1x1x600xf32> to vector<1x600xf32>
    %c82 = arith.constant 82 : index
    %c0_248 = arith.constant 0 : index
    %331 = vector.load %arg10[%c82, %c0_248] : memref<90x600xf32, #tpu.memory_space<vmem>>, vector<1x600xf32>
    tpu.vector_store %arg10[%c82, %c0_248], %330 {strides = array<i32>} : memref<90x600xf32, #tpu.memory_space<vmem>>, vector<1x600xf32>,
    %332 = arith.index_cast %c0_i32 : i32 to index
    %c2_249 = arith.constant 2 : index
    %c23_250 = arith.constant 23 : index
    %333 = vector.load %arg1[%332, %c2_249, %c23_250] : memref<1x3x700xf32, #tpu.memory_space<vmem>>, vector<1x1x600xf32>
    %334 = vector.shape_cast %333 : vector<1x1x600xf32> to vector<1x600xf32>
    %c83 = arith.constant 83 : index
    %c0_251 = arith.constant 0 : index
    %335 = vector.load %arg10[%c83, %c0_251] : memref<90x600xf32, #tpu.memory_space<vmem>>, vector<1x600xf32>
    tpu.vector_store %arg10[%c83, %c0_251], %334 {strides = array<i32>} : memref<90x600xf32, #tpu.memory_space<vmem>>, vector<1x600xf32>,
    %336 = arith.index_cast %c0_i32 : i32 to index
    %c2_252 = arith.constant 2 : index
    %c24_253 = arith.constant 24 : index
    %337 = vector.load %arg1[%336, %c2_252, %c24_253] : memref<1x3x700xf32, #tpu.memory_space<vmem>>, vector<1x1x600xf32>
    %338 = vector.shape_cast %337 : vector<1x1x600xf32> to vector<1x600xf32>
    %c84 = arith.constant 84 : index
    %c0_254 = arith.constant 0 : index
    %339 = vector.load %arg10[%c84, %c0_254] : memref<90x600xf32, #tpu.memory_space<vmem>>, vector<1x600xf32>
    tpu.vector_store %arg10[%c84, %c0_254], %338 {strides = array<i32>} : memref<90x600xf32, #tpu.memory_space<vmem>>, vector<1x600xf32>,
    %340 = arith.index_cast %c0_i32 : i32 to index
    %c2_255 = arith.constant 2 : index
    %c25_256 = arith.constant 25 : index
    %341 = vector.load %arg1[%340, %c2_255, %c25_256] : memref<1x3x700xf32, #tpu.memory_space<vmem>>, vector<1x1x600xf32>
    %342 = vector.shape_cast %341 : vector<1x1x600xf32> to vector<1x600xf32>
    %c85 = arith.constant 85 : index
    %c0_257 = arith.constant 0 : index
    %343 = vector.load %arg10[%c85, %c0_257] : memref<90x600xf32, #tpu.memory_space<vmem>>, vector<1x600xf32>
    tpu.vector_store %arg10[%c85, %c0_257], %342 {strides = array<i32>} : memref<90x600xf32, #tpu.memory_space<vmem>>, vector<1x600xf32>,
    %344 = arith.index_cast %c0_i32 : i32 to index
    %c2_258 = arith.constant 2 : index
    %c26_259 = arith.constant 26 : index
    %345 = vector.load %arg1[%344, %c2_258, %c26_259] : memref<1x3x700xf32, #tpu.memory_space<vmem>>, vector<1x1x600xf32>
    %346 = vector.shape_cast %345 : vector<1x1x600xf32> to vector<1x600xf32>
    %c86 = arith.constant 86 : index
    %c0_260 = arith.constant 0 : index
    %347 = vector.load %arg10[%c86, %c0_260] : memref<90x600xf32, #tpu.memory_space<vmem>>, vector<1x600xf32>
    tpu.vector_store %arg10[%c86, %c0_260], %346 {strides = array<i32>} : memref<90x600xf32, #tpu.memory_space<vmem>>, vector<1x600xf32>,
    %348 = arith.index_cast %c0_i32 : i32 to index
    %c2_261 = arith.constant 2 : index
    %c27_262 = arith.constant 27 : index
    %349 = vector.load %arg1[%348, %c2_261, %c27_262] : memref<1x3x700xf32, #tpu.memory_space<vmem>>, vector<1x1x600xf32>
    %350 = vector.shape_cast %349 : vector<1x1x600xf32> to vector<1x600xf32>
    %c87 = arith.constant 87 : index
    %c0_263 = arith.constant 0 : index
    %351 = vector.load %arg10[%c87, %c0_263] : memref<90x600xf32, #tpu.memory_space<vmem>>, vector<1x600xf32>
    tpu.vector_store %arg10[%c87, %c0_263], %350 {strides = array<i32>} : memref<90x600xf32, #tpu.memory_space<vmem>>, vector<1x600xf32>,
    %352 = arith.index_cast %c0_i32 : i32 to index
    %c2_264 = arith.constant 2 : index
    %c28_265 = arith.constant 28 : index
    %353 = vector.load %arg1[%352, %c2_264, %c28_265] : memref<1x3x700xf32, #tpu.memory_space<vmem>>, vector<1x1x600xf32>
    %354 = vector.shape_cast %353 : vector<1x1x600xf32> to vector<1x600xf32>
    %c88 = arith.constant 88 : index
    %c0_266 = arith.constant 0 : index
    %355 = vector.load %arg10[%c88, %c0_266] : memref<90x600xf32, #tpu.memory_space<vmem>>, vector<1x600xf32>
    tpu.vector_store %arg10[%c88, %c0_266], %354 {strides = array<i32>} : memref<90x600xf32, #tpu.memory_space<vmem>>, vector<1x600xf32>,
    %356 = arith.index_cast %c0_i32 : i32 to index
    %c2_267 = arith.constant 2 : index
    %c29_268 = arith.constant 29 : index
    %357 = vector.load %arg1[%356, %c2_267, %c29_268] : memref<1x3x700xf32, #tpu.memory_space<vmem>>, vector<1x1x600xf32>
    %358 = vector.shape_cast %357 : vector<1x1x600xf32> to vector<1x600xf32>
    %c89 = arith.constant 89 : index
    %c0_269 = arith.constant 0 : index
    %359 = vector.load %arg10[%c89, %c0_269] : memref<90x600xf32, #tpu.memory_space<vmem>>, vector<1x600xf32>
    tpu.vector_store %arg10[%c89, %c0_269], %358 {strides = array<i32>} : memref<90x600xf32, #tpu.memory_space<vmem>>, vector<1x600xf32>,
    %c0_270 = arith.constant 0 : index
    %c0_271 = arith.constant 0 : index
    %360 = vector.load %arg3[%c0_270, %c0_271] : memref<64x90xf32, #tpu.memory_space<vmem>>, vector<64x90xf32>
    %c0_272 = arith.constant 0 : index
    %c0_273 = arith.constant 0 : index
    %361 = vector.load %arg10[%c0_272, %c0_273] : memref<90x600xf32, #tpu.memory_space<vmem>>, vector<90x600xf32>
    %cst = arith.constant dense<0.000000e+00> : vector<64x600xf32>
    %362 = tpu.matmul %360, %361, %cst {dimension_numbers = #tpu.dot_dimension_numbers<[1], [0], [0], [1], [0, 0, 1, 1], [], []>} : vector<64x90xf32>, vector<90x600xf32>, vector<64x600xf32> -> vector<64x600xf32>
    %c0_274 = arith.constant 0 : index
    %c0_275 = arith.constant 0 : index
    %363 = vector.load %arg4[%c0_274, %c0_275] : memref<64x1xf32, #tpu.memory_space<vmem>>, vector<64x1xf32>
    %364 = vector.broadcast %363 : vector<64x1xf32> to vector<64x600xf32>
    %365 = arith.addf %362, %364 : vector<64x600xf32>
    %cst_276 = arith.constant 0.000000e+00 : f32
    %366 = vector.broadcast %cst_276 : f32 to vector<64x600xf32>
    %367 = arith.maximumf %365, %366 : vector<64x600xf32>
    %368 = tpu.transpose %367, [1, 0] : vector<64x600xf32> -> vector<600x64xf32>
    %369 = vector.extract_strided_slice %368 {offsets = [0, 0], sizes = [100, 64], strides = [1, 1]} : vector<600x64xf32> to vector<100x64xf32>
    %cst_277 = arith.constant dense<0xFF800000> : vector<64xf32>
    %370 = vector.multi_reduction <maximumf>, %369, %cst_277 [0] : vector<100x64xf32> to vector<64xf32>
    %371 = vector.shape_cast %370 : vector<64xf32> to vector<1x64xf32>
    %372 = vector.extract_strided_slice %368 {offsets = [100, 0], sizes = [100, 64], strides = [1, 1]} : vector<600x64xf32> to vector<100x64xf32>
    %cst_278 = arith.constant dense<0xFF800000> : vector<64xf32>
    %373 = vector.multi_reduction <maximumf>, %372, %cst_278 [0] : vector<100x64xf32> to vector<64xf32>
    %374 = vector.shape_cast %373 : vector<64xf32> to vector<1x64xf32>
    %375 = vector.extract_strided_slice %368 {offsets = [200, 0], sizes = [100, 64], strides = [1, 1]} : vector<600x64xf32> to vector<100x64xf32>
    %cst_279 = arith.constant dense<0xFF800000> : vector<64xf32>
    %376 = vector.multi_reduction <maximumf>, %375, %cst_279 [0] : vector<100x64xf32> to vector<64xf32>
    %377 = vector.shape_cast %376 : vector<64xf32> to vector<1x64xf32>
    %378 = vector.extract_strided_slice %368 {offsets = [300, 0], sizes = [100, 64], strides = [1, 1]} : vector<600x64xf32> to vector<100x64xf32>
    %cst_280 = arith.constant dense<0xFF800000> : vector<64xf32>
    %379 = vector.multi_reduction <maximumf>, %378, %cst_280 [0] : vector<100x64xf32> to vector<64xf32>
    %380 = vector.shape_cast %379 : vector<64xf32> to vector<1x64xf32>
    %381 = vector.extract_strided_slice %368 {offsets = [400, 0], sizes = [100, 64], strides = [1, 1]} : vector<600x64xf32> to vector<100x64xf32>
    %cst_281 = arith.constant dense<0xFF800000> : vector<64xf32>
    %382 = vector.multi_reduction <maximumf>, %381, %cst_281 [0] : vector<100x64xf32> to vector<64xf32>
    %383 = vector.shape_cast %382 : vector<64xf32> to vector<1x64xf32>
    %384 = vector.extract_strided_slice %368 {offsets = [500, 0], sizes = [100, 64], strides = [1, 1]} : vector<600x64xf32> to vector<100x64xf32>
    %cst_282 = arith.constant dense<0xFF800000> : vector<64xf32>
    %385 = vector.multi_reduction <maximumf>, %384, %cst_282 [0] : vector<100x64xf32> to vector<64xf32>
    %386 = vector.shape_cast %385 : vector<64xf32> to vector<1x64xf32>
    %387 = tpu.concatenate %371, %374, %377, %380, %383, %386 in 1 : vector<1x64xf32>, vector<1x64xf32>, vector<1x64xf32>, vector<1x64xf32>, vector<1x64xf32>, vector<1x64xf32> -> vector<1x384xf32>
    %388 = arith.index_cast %c0_i32 : i32 to index
    %c0_283 = arith.constant 0 : index
    %389 = vector.load %arg11[%388, %c0_283] : memref<1x384xf32, #tpu.memory_space<vmem>>, vector<1x384xf32>
    tpu.vector_store %arg11[%388, %c0_283], %387 {strides = array<i32>} : memref<1x384xf32, #tpu.memory_space<vmem>>, vector<1x384xf32>,
    %c1_i32 = arith.constant 1 : i32
    %c0_284 = arith.constant 0 : index
    %c0_285 = arith.constant 0 : index
    %390 = vector.load %arg11[%c0_284, %c0_285] : memref<1x384xf32, #tpu.memory_space<vmem>>, vector<1x384xf32>
    %c0_286 = arith.constant 0 : index
    %c0_287 = arith.constant 0 : index
    %391 = vector.load %arg5[%c0_286, %c0_287] : memref<384x60xf32, #tpu.memory_space<vmem>>, vector<384x60xf32>
    %cst_288 = arith.constant dense<0.000000e+00> : vector<1x60xf32>
    %392 = tpu.matmul %390, %391, %cst_288 {dimension_numbers = #tpu.dot_dimension_numbers<[1], [0], [0], [1], [0, 0, 1, 1], [], []>} : vector<1x384xf32>, vector<384x60xf32>, vector<1x60xf32> -> vector<1x60xf32>
    %c0_289 = arith.constant 0 : index
    %c0_290 = arith.constant 0 : index
    %393 = vector.load %arg6[%c0_289, %c0_290] : memref<1x60xf32, #tpu.memory_space<vmem>>, vector<1x60xf32>
    %394 = arith.addf %392, %393 : vector<1x60xf32>
    %c0_291 = arith.constant 0 : index
    %c0_292 = arith.constant 0 : index
    %c0_293 = arith.constant 0 : index
    %395 = vector.load %arg2[%c0_291, %c0_292, %c0_293] : memref<1x1x45xf32, #tpu.memory_space<vmem>>, vector<1x1x45xf32>
    %396 = vector.shape_cast %395 : vector<1x1x45xf32> to vector<1x45xf32>
    %c0_294 = arith.constant 0 : index
    %c0_295 = arith.constant 0 : index
    %397 = vector.load %arg7[%c0_294, %c0_295] : memref<45x8xf32, #tpu.memory_space<vmem>>, vector<45x8xf32>
    %cst_296 = arith.constant dense<0.000000e+00> : vector<1x8xf32>
    %398 = tpu.matmul %396, %397, %cst_296 {dimension_numbers = #tpu.dot_dimension_numbers<[1], [0], [0], [1], [0, 0, 1, 1], [], []>} : vector<1x45xf32>, vector<45x8xf32>, vector<1x8xf32> -> vector<1x8xf32>
    %c0_297 = arith.constant 0 : index
    %c0_298 = arith.constant 0 : index
    %399 = vector.load %arg8[%c0_297, %c0_298] : memref<1x8xf32, #tpu.memory_space<vmem>>, vector<1x8xf32>
    %400 = arith.addf %398, %399 : vector<1x8xf32>
    %cst_299 = arith.constant 0.000000e+00 : f32
    %401 = vector.broadcast %cst_299 : f32 to vector<1x60xf32>
    %402 = tpu.concatenate %394, %400, %401 in 1 : vector<1x60xf32>, vector<1x8xf32>, vector<1x60xf32> -> vector<1x128xf32>
    %c0_300 = arith.constant 0 : index
    %c0_301 = arith.constant 0 : index
    %c0_302 = arith.constant 0 : index
    %403 = vector.load %arg9[%c0_300, %c0_301, %c0_302] : memref<1x1x128xf32, #tpu.memory_space<vmem>>, vector<1x1x128xf32>
    %404 = vector.shape_cast %403 : vector<1x1x128xf32> to vector<1x128xf32>
    %405 = vector.shape_cast %402 : vector<1x128xf32> to vector<1x1x128xf32>
    tpu.vector_store %arg9[%c0_300, %c0_301, %c0_302], %405 {strides = array<i32>} : memref<1x1x128xf32, #tpu.memory_space<vmem>>, vector<1x1x128xf32>,
    return
  }
  func.func @transform_0(%arg0: i32) -> (i32, i32, i32) {
    %c0_i32 = arith.constant 0 : i32
    %c0_i32_0 = arith.constant 0 : i32
    %c0_i32_1 = arith.constant 0 : i32
    return %arg0, %c0_i32, %c0_i32_0 : i32, i32, i32
  }
  func.func @transform_1(%arg0: i32) -> (i32, i32, i32) {
    %c0_i32 = arith.constant 0 : i32
    %c0_i32_0 = arith.constant 0 : i32
    %c0_i32_1 = arith.constant 0 : i32
    return %arg0, %c0_i32, %c0_i32_0 : i32, i32, i32
  }
  func.func @transform_2(%arg0: i32) -> (i32, i32) {
    %c0_i32 = arith.constant 0 : i32
    %c0_i32_0 = arith.constant 0 : i32
    %c0_i32_1 = arith.constant 0 : i32
    return %c0_i32, %c0_i32_0 : i32, i32
  }
  func.func @transform_3(%arg0: i32) -> (i32, i32) {
    %c0_i32 = arith.constant 0 : i32
    %c0_i32_0 = arith.constant 0 : i32
    %c0_i32_1 = arith.constant 0 : i32
    return %c0_i32, %c0_i32_0 : i32, i32
  }
  func.func @transform_4(%arg0: i32) -> (i32, i32) {
    %c0_i32 = arith.constant 0 : i32
    %c0_i32_0 = arith.constant 0 : i32
    %c0_i32_1 = arith.constant 0 : i32
    return %c0_i32, %c0_i32_0 : i32, i32
  }
  func.func @transform_5(%arg0: i32) -> (i32, i32) {
    %c0_i32 = arith.constant 0 : i32
    %c0_i32_0 = arith.constant 0 : i32
    %c0_i32_1 = arith.constant 0 : i32
    return %c0_i32, %c0_i32_0 : i32, i32
  }
  func.func @transform_6(%arg0: i32) -> (i32, i32) {
    %c0_i32 = arith.constant 0 : i32
    %c0_i32_0 = arith.constant 0 : i32
    %c0_i32_1 = arith.constant 0 : i32
    return %c0_i32, %c0_i32_0 : i32, i32
  }
  func.func @transform_7(%arg0: i32) -> (i32, i32) {
    %c0_i32 = arith.constant 0 : i32
    %c0_i32_0 = arith.constant 0 : i32
    %c0_i32_1 = arith.constant 0 : i32
    return %c0_i32, %c0_i32_0 : i32, i32
  }
  func.func @transform_8(%arg0: i32) -> (i32, i32, i32) {
    %c0_i32 = arith.constant 0 : i32
    %c0_i32_0 = arith.constant 0 : i32
    %c0_i32_1 = arith.constant 0 : i32
    return %arg0, %c0_i32, %c0_i32_0 : i32, i32, i32
  }
}

</mosaic_0001>

<bundles_post_ra>
// kernel: tpu_custom_call.1
= control target key start
LH: loop header
LB: loop body
LE: loop exit
PB: predicated region body
PF: predicated region fallthrough
CT: control target
= control target key end

     0   :  { %s4432_s0 = inlined_call_operand.vmem [shape: f32[2,3,700], index: 0, kind: input, shape index: {}]   ;;  %s4433_s1 = inlined_call_operand.vmem [shape: f32[2,1,45], index: 1, kind: input, shape index: {}]   ;;  %s4434_s2 = inlined_call_operand.vmem [shape: f32[64,90], index: 2, kind: input, shape index: {}]   ;;  %s4435_s3 = inlined_call_operand.vmem [shape: f32[64,1], index: 3, kind: input, shape index: {}]   ;;  %s4436_s4 = inlined_call_operand.vmem [shape: f32[384,60], index: 4, kind: input, shape index: {}]   ;;  %s4437_s5 = inlined_call_operand.vmem [shape: f32[1,60], index: 5, kind: input, shape index: {}]   ;;  %s4438_s6 = inlined_call_operand.vmem [shape: f32[45,8], index: 6, kind: input, shape index: {}]   ;;  %s4439_s7 = inlined_call_operand.vmem [shape: f32[1,8], index: 7, kind: input, shape index: {}]   ;;  %s4440_s8 = inlined_call_operand.hbm [shape: f32[2,1,128], index: 8, kind: output, shape index: {}]  }
   0x1   :  { %4520 = sst [smem:[#allocation16_spill]] %s4432_s0 }
   0x2   :  { %4521 = sst [smem:[#allocation17_spill]] %s4437_s5 }
   0x3   :  { %4522 = sst [smem:[#allocation18_spill]] %s4439_s7 }
   0x4   :  { %4523 = sst [smem:[#allocation19_spill]] %s4440_s8 }
   0x5   :  { %13 = vsyncpa [#allocation5], 0 }
   0x6   :  { %15 = vsyncpa [#allocation5 + $0x1], 0  ;;  %s3167_s27 = smov 0   ;;  %s3169_s28 = smov 0  }
   0x7   :  { %s3171_s29 = smov 0   ;;  %s3173_s30 = smov 0  }
   0x8 LB: > { %4524 = sst [smem:[#allocation7_spill]] %s3070_s27  ;;  %s3188_s9 = sadd.s32 4294967295, %s3082_s30   ;;  %s3082_s30 = sphi %s3173_s30, %s4609_s30   ;;  %s3078_s29 = sphi %s3171_s29, %s4612_s29   ;;  %s3074_s28 = sphi %s3169_s28, %s4611_s28   ;;  %s3070_s27 = sphi %s3167_s27, %s4610_s27  }
   0x9   : > { %4525 = sst [smem:[#allocation8_spill]] %s3074_s28  ;;  %s2533_s10 = sadd.s32 4294967294, %s3082_s30  }
   0xa   : > { %4526 = sst [smem:[#allocation9_spill]] %s3078_s29  ;;  %s3192_s11 = sadd.s32 1, %s3082_s30  }
   0xb   : > { %4527 = sst [smem:[#allocation10_spill]] %s3082_s30  ;;  %s206_s12 = sadd.s32 1, %s3078_s29 }
   0xc   : > { %4528 = sst [smem:[#allocation11_spill]] %s3188_s9  ;;  %s203_s13 = ssub.s32 %s3082_s30, %s3192_s11 }
   0xd   : > { %4529 = sst [smem:[#allocation12_spill]] %s3192_s11  ;;  %p216_p0 = scmp.ne.s32.totalorder %s3078_s29, %s3074_s28 }
   0xe   : > { %p204_p1 = scmp.eq.s32.totalorder %s203_s13, 0  ;;  %p217_p2 = scmp.eq.s32.totalorder %s3188_s9, 1 }
   0xf   : > { %p222_p3 = scmp.ne.s32.totalorder %s3074_s28, %s3070_s27  ;;  %p223_p4 = scmp.eq.s32.totalorder %s2533_s10, 1 }
  0x10   : > { %s3203_s14 = scalar_select %p204_p1, %s3078_s29, %s206_s12  }
  0x11   : > { %p3205_p5 = por %p217_p2, %p216_p0  ;;  %p3209_p6 = por %p223_p4, %p222_p3 }
  0x12   : > { %4530 = sst [smem:[#allocation13_spill]] %s3203_s14  ;;  %p2536_p7 = scmp.ge.s32.totalorder %s3082_s30, 1 }
  0x13   : > { %s4531_s15 = scalar_select %p3205_p5, 1, 0 }
  0x14   : > { %s4533_s16 = scalar_select %p3209_p6, 1, 0 }
  0x15   : > { %4532 = sst [smem:[#allocation14_spill]] %s4531_s15  ;;  %p273_p8 = scmp.lt.s32.totalorder %s3082_s30, 3 }
  0x16   : > { %4534 = sst [smem:[#allocation15_spill]] %s4533_s16 }
  0x17   : > { %p274_p9 = pnand %p2536_p7, %p273_p8 }
  0x18   : > { %p309_p10 = scmp.lt.s32.totalorder (!%p274_p9), %s3188_s9, 1  ;;  %s4535_s0 = sld [smem:[#allocation16_spill]] (!%p274_p9)  ;;  %v318_v22 = vlaneseq (!%p274_p9)  ;;  %vm351_vm1 = vcmask (!%p274_p9), 1022976   ;;  %vm329_vm2 = vcmask (!%p274_p9), 1039360   ;;  %vm362_vm3 = vcmask (!%p274_p9), 1014784  }
  0x19   : > { %277 = sbr.rel (%p274_p9) target bundleno = 1361 (0x551), region = 52  ;;  %s4478_s22 = smov (!%p274_p9), 125   ;;  %vm340_vm4 = vcmask (!%p274_p9), 1031168   ;;  %vm384_vm5 = vcmask (!%p274_p9), 998400   ;;  %vm373_vm6 = vcmask (!%p274_p9), 1006592   ;;  %vm406_vm7 = vcmask (!%p274_p9), 982016  }
  0x1a   : > { %s4477_s23 = smov (!%p274_p9), 127   ;;  %s4481_s24 = smov (!%p274_p9), 124   ;;  %vm3272_vm0 = vcmp.lt.s32.totalorder (!%p274_p9), %v318_v22, 600  ;;  %vm395_vm8 = vcmask (!%p274_p9), 990208   ;;  %vm4519_vm9 = vcmask (!%p274_p9), 965632   ;;  %vm4517_vm10 = vcmask (!%p274_p9), 973824  }
  0x1b   : > { %s4479_s25 = smov (!%p274_p9), 126   ;;  %s4443_s26 = smov (!%p274_p9), 122   ;;  %vm4504_vm11 = vcmask (!%p274_p9), 949248   ;;  %vm4518_vm12 = vcmask (!%p274_p9), 957440   ;;  %vm4503_vm13 = vcmask (!%p274_p9), 932864   ;;  %vm4507_vm14 = vcmask (!%p274_p9), 941056  }
  0x1c   : > { %s4480_s10 = smov (!%p274_p9), 123   ;;  %s4441_s12 = smov (!%p274_p9), 120   ;;  %vm4505_vm15 = vcmask (!%p274_p9), 916480  }
  0x1d   : > { %s4482_s13 = smov (!%p274_p9), 121   ;;  %s4447_s19 = smov (!%p274_p9), 119  }
  0x1e   : > { %s4449_s20 = smov (!%p274_p9), 116   ;;  %s4549_s14 = smov (!%p274_p9), 110  }
  0x1f   : > { %s4550_s29 = smov (!%p274_p9), 107   ;;  %s4551_s11 = smov (!%p274_p9), 108  }
  0x20   : > { %s3217_s17 = scalar_select %p309_p10, %s3188_s9, 1 }
  0x21   : > { %s4553_s16 = smov 106   ;;  %s4554_s27 = smov 103  }
  0x22   : > { %s2941_s18 = smul.u32 24, %s3217_s17  ;;  %s4555_s30 = smov 104  }
  0x23   : > { %s4556_s8 = smov 102   ;;  %s4557_s15 = smov 101  }
  0x24   : > { %s3223_s21 = scalar_lea.vmem %s4535_s0, %s2941_s18  ;;  %s4445_s18 = smov 118  }
  0x25   : > { %v346_v0 = vld [vmem:[%s3223_s21] ss:$4 sm:$0x1f]  ;;  %v2538_v31 = vld [vmem:[%s3223_s21 + $0x1] ss:$4 sm:$0x1f] }
  0x26   : > { %v324_v1 = vld [vmem:[%s3223_s21] ss:$4 sm:$0x1f]  ;;  %348 = vrot.lane.b32.xlu1 %v346_v0, %s4478_s22  ;;  %646 = vst.msk [vmem:[#allocation2 + $0x7e] ss:$8 sm:$0xf] %vm3272_vm0, %v2538_v31 }
  0x27   : > { %326 = vrot.lane.b32.xlu0 %v324_v1, %s4477_s23  ;;  %v357_v2 = vld [vmem:[%s3223_s21] ss:$4 sm:$0x1f]  ;;  %647 = vst.msk [vmem:[#allocation2 + $0x7e] ss:$8 sm:$0x10] %vm3272_vm0, %v2538_v31 }
  0x28   : > { %v335_v3 = vld [vmem:[%s3223_s21] ss:$4 sm:$0x1f]  ;;  %v2539_v32 = vld [vmem:[%s3223_s21 + $0x1] ss:$4 sm:$0x1f] }
  0x29   : > { %v379_v4 = vld [vmem:[%s3223_s21] ss:$4 sm:$0x1f]  ;;  %v2541_v34 = vld [vmem:[%s3223_s21 + $0x1] ss:$4 sm:$0x1f] }
  0x2a   : > { %359 = vrot.lane.b32.xlu1 %v357_v2, %s4481_s24  ;;  %v368_v5 = vld [vmem:[%s3223_s21] ss:$4 sm:$0x1f]  ;;  %v2540_v35 = vld [vmem:[%s3223_s21 + $0x1] ss:$4 sm:$0x1f] }
  0x2b   : > { %337 = vrot.lane.b32.xlu0 %v335_v3, %s4479_s25  ;;  %v401_v6 = vld [vmem:[%s3223_s21] ss:$4 sm:$0x1f]  ;;  %v2543_v36 = vld [vmem:[%s3223_s21 + $0x1] ss:$4 sm:$0x1f] }
  0x2c   : > { %v390_v7 = vld [vmem:[%s3223_s21] ss:$4 sm:$0x1f]  ;;  %v2542_v37 = vld [vmem:[%s3223_s21 + $0x1] ss:$4 sm:$0x1f] }
  0x2d   : > { %v423_v8 = vld [vmem:[%s3223_s21] ss:$4 sm:$0x1f]  ;;  %v2545_v38 = vld [vmem:[%s3223_s21 + $0x1] ss:$4 sm:$0x1f] }
  0x2e   : > { %381 = vrot.lane.b32.xlu1 %v379_v4, %s4443_s26  ;;  %v412_v9 = vld [vmem:[%s3223_s21] ss:$4 sm:$0x1f]  ;;  %s4453_s26 = smov 114   ;;  %s4548_s0 = smov 109  }
  0x2f   : > { %370 = vrot.lane.b32.xlu0 %v368_v5, %s4480_s10  ;;  %v445_v10 = vld [vmem:[%s3223_s21] ss:$4 sm:$0x1f]  ;;  %v2544_v39 = vld [vmem:[%s3223_s21 + $0x1] ss:$4 sm:$0x1f] }
  0x30   : > { %v434_v11 = vld [vmem:[%s3223_s21] ss:$4 sm:$0x1f]  ;;  %v2547_v40 = vld [vmem:[%s3223_s21 + $0x1] ss:$4 sm:$0x1f] }
  0x31   : > { %v467_v12 = vld [vmem:[%s3223_s21] ss:$4 sm:$0x1f]  ;;  %v2546_v41 = vld [vmem:[%s3223_s21 + $0x1] ss:$4 sm:$0x1f] }
  0x32   : > { %403 = vrot.lane.b32.xlu1 %v401_v6, %s4441_s12  ;;  %s4451_s12 = smov 117   ;;  %v456_v13 = vld [vmem:[%s3223_s21] ss:$4 sm:$0x1f]  ;;  %s4558_s7 = smov 100  }
  0x33   : > { %392 = vrot.lane.b32.xlu0 %v390_v7, %s4482_s13  ;;  %v489_v14 = vld [vmem:[%s3223_s21] ss:$4 sm:$0x1f]  ;;  %v2549_v42 = vld [vmem:[%s3223_s21 + $0x1] ss:$4 sm:$0x1f] }
  0x34   : > { %v478_v15 = vld [vmem:[%s3223_s21] ss:$4 sm:$0x1f]  ;;  %v2548_v43 = vld [vmem:[%s3223_s21 + $0x1] ss:$4 sm:$0x1f] }
  0x35   : > { %v511_v16 = vld [vmem:[%s3223_s21] ss:$4 sm:$0x1f]  ;;  %v2551_v44 = vld [vmem:[%s3223_s21 + $0x1] ss:$4 sm:$0x1f] }
  0x36   : > { %425 = vrot.lane.b32.xlu1 %v423_v8, %s4445_s18  ;;  %s4455_s18 = smov 115   ;;  %v500_v17 = vld [vmem:[%s3223_s21] ss:$4 sm:$0x1f]  ;;  %s4559_s5 = smov 99  }
  0x37   : > { %414 = vrot.lane.b32.xlu0 %v412_v9, %s4447_s19  ;;  %s4457_s19 = smov 112   ;;  %v533_v18 = vld [vmem:[%s3223_s21] ss:$4 sm:$0x1f]  ;;  %s4560_s9 = smov 127  }
  0x38   : > { %v522_v19 = vld [vmem:[%s3223_s21] ss:$4 sm:$0x1f]  ;;  %v2550_v45 = vld [vmem:[%s3223_s21 + $0x1] ss:$4 sm:$0x1f] }
  0x39   : > { %v555_v20 = vld [vmem:[%s3223_s21] ss:$4 sm:$0x1f]  ;;  %v2553_v46 = vld [vmem:[%s3223_s21 + $0x1] ss:$4 sm:$0x1f] }
  0x3a   : > { %447 = vrot.lane.b32.xlu1 %v445_v10, %s4449_s20  ;;  %s4461_s20 = smov 113   ;;  %v544_v21 = vld [vmem:[%s3223_s21] ss:$4 sm:$0x1f]  ;;  %s4561_s28 = smov 126  }
  0x3b   : > { %436 = vrot.lane.b32.xlu0 %v434_v11, %s4451_s12  ;;  %s4459_s12 = smov 110   ;;  %v577_v23 = vld [vmem:[%s3223_s21] ss:$4 sm:$0x1f] }
  0x3c   : > { %v566_v24 = vld [vmem:[%s3223_s21] ss:$4 sm:$0x1f]  ;;  %v2552_v47 = vld [vmem:[%s3223_s21 + $0x1] ss:$4 sm:$0x1f] }
  0x3d   : > { %v599_v26 = vld [vmem:[%s3223_s21] ss:$4 sm:$0x1f]  ;;  %v2555_v48 = vld [vmem:[%s3223_s21 + $0x1] ss:$4 sm:$0x1f] }
  0x3e   : > { %469 = vrot.lane.b32.xlu1 %v467_v12, %s4453_s26  ;;  %s4494_s26 = smov 111   ;;  %v317_v27 = vld [vmem:[%s3223_s21] ss:$4 sm:$0x1f] }
  0x3f   : > { %458 = vrot.lane.b32.xlu0 %v456_v13, %s4455_s18  ;;  %s4463_s18 = smov 108   ;;  %v588_v28 = vld [vmem:[%s3223_s21] ss:$4 sm:$0x1f] }
  0x40   : > { %322 = vst.msk [vmem:[#allocation2] ss:$8 sm:$0xf] %vm3272_vm0, %v317_v27  ;;  %323 = vst.msk [vmem:[#allocation2] ss:$8 sm:$0x10] %vm3272_vm0, %v317_v27 }
  0x41   : > { %v621_v29 = vld [vmem:[%s3223_s21] ss:$4 sm:$0x1f]  ;;  %v2554_v49 = vld [vmem:[%s3223_s21 + $0x1] ss:$4 sm:$0x1f] }
  0x42   : > { %491 = vrot.lane.b32.xlu1 %v489_v14, %s4457_s19  ;;  %s4465_s19 = smov 109   ;;  %v610_v30 = vld [vmem:[%s3223_s21] ss:$4 sm:$0x1f] }
  0x43   : > { %480 = vrot.lane.b32.xlu0 %v478_v15, %s4461_s20  ;;  %s4469_s20 = smov 107   ;;  %v632_v33 = vld [vmem:[%s3223_s21] ss:$4 sm:$0x1f] }
  0x44   : > { %v2557_v50 = vld [vmem:[%s3223_s21 + $0x1] ss:$4 sm:$0x1f]  ;;  %v2568_v62 = vld [vmem:[%s3223_s21 + $0x2] ss:$4 sm:$0x1f] }
  0x45   : > { %v2556_v51 = vld [vmem:[%s3223_s21 + $0x1] ss:$4 sm:$0x1f]  ;;  %941 = vst.msk [vmem:[#allocation2 + $0x11c] ss:$8 sm:$0xf] %vm3272_vm0, %v2568_v62 }
  0x46   : > { %513 = vrot.lane.b32.xlu1 %v511_v16, %s4459_s12  ;;  %s4467_s12 = smov 106   ;;  %v2559_v52 = vld [vmem:[%s3223_s21 + $0x1] ss:$4 sm:$0x1f] }
  0x47   : > { %502 = vrot.lane.b32.xlu0 %v500_v17, %s4494_s26  ;;  %v2558_v53 = vld [vmem:[%s3223_s21 + $0x1] ss:$4 sm:$0x1f]  ;;  %942 = vst.msk [vmem:[#allocation2 + $0x11c] ss:$8 sm:$0x10] %vm3272_vm0, %v2568_v62 }
  0x48   : > { %v2561_v54 = vld [vmem:[%s3223_s21 + $0x1] ss:$4 sm:$0x1f]  ;;  %v2569_v63 = vld [vmem:[%s3223_s21 + $0x2] ss:$4 sm:$0x1f] }
  0x49   : > { %v2560_v55 = vld [vmem:[%s3223_s21 + $0x1] ss:$4 sm:$0x1f]  ;;  %v2570_v0 = vld [vmem:[%s3223_s21 + $0x2] ss:$4 sm:$0x1f] }
  0x4a   : > { %535 = vrot.lane.b32.xlu1 %v533_v18, %s4463_s18  ;;  %s4471_s18 = smov 104   ;;  %v2563_v56 = vld [vmem:[%s3223_s21 + $0x1] ss:$4 sm:$0x1f] }
  0x4b   : > { %524 = vrot.lane.b32.xlu0 %v522_v19, %s4465_s19  ;;  %s4489_s19 = smov 105   ;;  %v2562_v57 = vld [vmem:[%s3223_s21 + $0x1] ss:$4 sm:$0x1f] }
  0x4c   : > { %v2564_v58 = vld [vmem:[%s3223_s21 + $0x1] ss:$4 sm:$0x1f]  ;;  %v2571_v7 = vld [vmem:[%s3223_s21 + $0x2] ss:$4 sm:$0x1f] }
  0x4d   : > { %v2565_v59 = vld [vmem:[%s3223_s21 + $0x1] ss:$4 sm:$0x1f]  ;;  %v2572_v8 = vld [vmem:[%s3223_s21 + $0x2] ss:$4 sm:$0x1f] }
  0x4e   : > { %557 = vrot.lane.b32.xlu1 %v555_v20, %s4467_s12  ;;  %s4473_s12 = smov 102   ;;  %v2566_v60 = vld [vmem:[%s3223_s21 + $0x1] ss:$4 sm:$0x1f] }
  0x4f   : > { %546 = vrot.lane.b32.xlu0 %v544_v21, %s4469_s20  ;;  %s4475_s20 = smov 103   ;;  %v2567_v61 = vld [vmem:[%s3223_s21 + $0x1] ss:$4 sm:$0x1f] }
  0x50   : > { %v2573_v15 = vld [vmem:[%s3223_s21 + $0x2] ss:$4 sm:$0x1f] }
  0x51   : > { %v2574_v16 = vld [vmem:[%s3223_s21 + $0x2] ss:$4 sm:$0x1f] }
  0x52   : > { %579 = vrot.lane.b32.xlu1 %v577_v23, %s4471_s18  ;;  %s4485_s18 = smov 100  }
  0x53   : > { %568 = vrot.lane.b32.xlu0 %v566_v24, %s4489_s19  ;;  %s4547_s19 = smov 112   ;;  %v2575_v24 = vld [vmem:[%s3223_s21 + $0x2] ss:$4 sm:$0x1f] }
  0x56   : > { %601 = vrot.lane.b32.xlu1 %v599_v26, %s4473_s12  ;;  %s4487_s12 = smov 101   ;;  %v2576_v26 = vld [vmem:[%s3223_s21 + $0x2] ss:$4 sm:$0x1f] }
  0x57   : > { %590 = vrot.lane.b32.xlu0 %v588_v28, %s4475_s20  ;;  %s4483_s20 = smov 99  }
  0x5a   : > { %623 = vrot.lane.b32.xlu1 %v621_v29, %s4485_s18  ;;  %s4545_s18 = smov 113  }
  0x5b   : > { %612 = vrot.lane.b32.xlu0 %v610_v30, %s4487_s12  ;;  %s4546_s12 = smov 114  }
  0x5e   : > { %650 = vrot.lane.b32.xlu1 %v2539_v32, %s4477_s23  ;;  %s4538_s23 = smov 122  }
  0x5f   : > { %634 = vrot.lane.b32.xlu0 %v632_v33, %s4483_s20  ;;  %s4544_s20 = smov 116   ;;  %v2577_v33 = vld [vmem:[%s3223_s21 + $0x2] ss:$4 sm:$0x1f] }
  0x62   : > { %670 = vrot.lane.b32.xlu1 %v2541_v34, %s4478_s22  ;;  %s4539_s22 = smov 119   ;;  %v2578_v34 = vld [vmem:[%s3223_s21 + $0x2] ss:$4 sm:$0x1f] }
  0x63   : > { %660 = vrot.lane.b32.xlu0 %v2540_v35, %s4479_s25  ;;  %s4540_s25 = smov 120  }
  0x66   : > { %690 = vrot.lane.b32.xlu1 %v2543_v36, %s4480_s10  ;;  %s4541_s10 = smov 117  }
  0x67   : > { %680 = vrot.lane.b32.xlu0 %v2542_v37, %s4481_s24  ;;  %s4542_s24 = smov 118  }
  0x6a   : > { %710 = vrot.lane.b32.xlu1 %v2545_v38, %s4482_s13  ;;  %s4543_s13 = smov 115  }
  0x6b   : > { %700 = vrot.lane.b32.xlu0 %v2544_v39, %s4538_s23 }
  0x6e   : > { %730 = vrot.lane.b32.xlu1 %v2547_v40, %s4539_s22 }
  0x6f   : > { %720 = vrot.lane.b32.xlu0 %v2546_v41, %s4540_s25  ;;  %v2579_v41 = vld [vmem:[%s3223_s21 + $0x2] ss:$4 sm:$0x1f] }
  0x72   : > { %750 = vrot.lane.b32.xlu1 %v2549_v42, %s4541_s10  ;;  %v2580_v42 = vld [vmem:[%s3223_s21 + $0x2] ss:$4 sm:$0x1f] }
  0x73   : > { %740 = vrot.lane.b32.xlu0 %v2548_v43, %s4542_s24 }
  0x76   : > { %770 = vrot.lane.b32.xlu1 %v2551_v44, %s4543_s13 }
  0x77   : > { %760 = vrot.lane.b32.xlu0 %v2550_v45, %s4544_s20 }
  0x7a   : > { %790 = vrot.lane.b32.xlu1 %v2553_v46, %s4545_s18 }
  0x7b   : > { %780 = vrot.lane.b32.xlu0 %v2552_v47, %s4546_s12 }
  0x7e   : > { %810 = vrot.lane.b32.xlu1 %v2555_v48, %s4494_s26  ;;  %s4552_s26 = smov 105  }
  0x7f   : > { %800 = vrot.lane.b32.xlu0 %v2554_v49, %s4547_s19  ;;  %v2581_v49 = vld [vmem:[%s3223_s21 + $0x2] ss:$4 sm:$0x1f] }
  0x82   : > { %830 = vrot.lane.b32.xlu1 %v2557_v50, %s4548_s0  ;;  %v2582_v50 = vld [vmem:[%s3223_s21 + $0x2] ss:$4 sm:$0x1f] }
  0x83   : > { %820 = vrot.lane.b32.xlu0 %v2556_v51, %s4549_s14 }
  0x86   : > { %850 = vrot.lane.b32.xlu1 %v2559_v52, %s4550_s29 }
  0x87   : > { %840 = vrot.lane.b32.xlu0 %v2558_v53, %s4551_s11 }
  0x8a   : > { %870 = vrot.lane.b32.xlu1 %v2561_v54, %s4552_s26 }
  0x8b   : > { %860 = vrot.lane.b32.xlu0 %v2560_v55, %s4553_s16 }
  0x8e   : > { %890 = vrot.lane.b32.xlu1 %v2563_v56, %s4554_s27 }
  0x8f   : > { %880 = vrot.lane.b32.xlu0 %v2562_v57, %s4555_s30  ;;  %v2583_v57 = vld [vmem:[%s3223_s21 + $0x2] ss:$4 sm:$0x1f] }
  0x92   : > { %910 = vrot.lane.b32.xlu1 %v2565_v59, %s4557_s15 }
  0x93   : > { %900 = vrot.lane.b32.xlu0 %v2564_v58, %s4556_s8  ;;  %v2584_v58 = vld [vmem:[%s3223_s21 + $0x2] ss:$4 sm:$0x1f] }
  0x96   : > { %930 = vrot.lane.b32.xlu1 %v2567_v61, %s4559_s5 }
  0x97   : > { %920 = vrot.lane.b32.xlu0 %v2566_v60, %s4558_s7 }
  0x98   : > { %v349_v1 = vpop.permute.xlu1 %348 }
  0x99   : > { %v327_v2 = vpop.permute.xlu0 %326  ;;  %v350_v3 = vrot.slane %v349_v1, 1 }
  0x9a   : > { %v328_v4 = vrot.slane %v327_v2, 1  ;;  %955 = vrot.lane.b32.xlu1 %v2570_v0, %s4561_s28  ;;  %s4562_s28 = smov 125  }
  0x9b   : > { %945 = vrot.lane.b32.xlu0 %v2569_v63, %s4560_s9  ;;  %v352_v5 = vsel %vm351_vm1, %v349_v1, %v350_v3  ;;  %s4563_s9 = smov 124   ;;  %v2585_v1 = vld [vmem:[%s3223_s21 + $0x2] ss:$4 sm:$0x1f] }
  0x9c   : > { %v330_v6 = vsel %vm329_vm2, %v327_v2, %v328_v4  ;;  %355 = vst.msk [vmem:[#allocation2 + $0x3] ss:$8 sm:$0xf] %vm3272_vm0, %v352_v5  ;;  %356 = vst.msk [vmem:[#allocation2 + $0x3] ss:$8 sm:$0x10] %vm3272_vm0, %v352_v5  ;;  %v360_v9 = vpop.permute.xlu1 %359 }
  0x9d   : > { %333 = vst.msk [vmem:[#allocation2 + $0x1] ss:$8 sm:$0xf] %vm3272_vm0, %v330_v6  ;;  %334 = vst.msk [vmem:[#allocation2 + $0x1] ss:$8 sm:$0x10] %vm3272_vm0, %v330_v6  ;;  %v338_v10 = vpop.permute.xlu0 %337 }
  0x9e   : > { %v361_v11 = vrot.slane %v360_v9, 1  ;;  %v339_v12 = vrot.slane %v338_v10, 1  ;;  %975 = vrot.lane.b32.xlu1 %v2572_v8, %s4563_s9  ;;  %v2586_v2 = vld [vmem:[%s3223_s21 + $0x2] ss:$4 sm:$0x1f]  ;;  %s4600_s9 = sld [smem:[#allocation8_spill]] }
  0x9f   : > { %965 = vrot.lane.b32.xlu0 %v2571_v7, %s4562_s28  ;;  %s4564_s28 = smov 123  }
  0xa0   : > { %v363_v13 = vsel %vm362_vm3, %v360_v9, %v361_v11  ;;  %v341_v14 = vsel %vm340_vm4, %v338_v10, %v339_v12  ;;  %v382_v17 = vpop.permute.xlu1 %381  ;;  %v2587_v9 = vld [vmem:[%s3223_s21 + $0x2] ss:$4 sm:$0x1f] }
  0xa1   : > { %366 = vst.msk [vmem:[#allocation2 + $0x4] ss:$8 sm:$0xf] %vm3272_vm0, %v363_v13  ;;  %367 = vst.msk [vmem:[#allocation2 + $0x4] ss:$8 sm:$0x10] %vm3272_vm0, %v363_v13  ;;  %v371_v18 = vpop.permute.xlu0 %370 }
  0xa2   : > { %344 = vst.msk [vmem:[#allocation2 + $0x2] ss:$8 sm:$0xf] %vm3272_vm0, %v341_v14  ;;  %345 = vst.msk [vmem:[#allocation2 + $0x2] ss:$8 sm:$0x10] %vm3272_vm0, %v341_v14  ;;  %995 = vrot.lane.b32.xlu1 %v2574_v16, %s4538_s23 }
  0xa3   : > { %v383_v19 = vrot.slane %v382_v17, 1  ;;  %v372_v20 = vrot.slane %v371_v18, 1  ;;  %985 = vrot.lane.b32.xlu0 %v2573_v15, %s4564_s28  ;;  %s4565_s23 = smov 121   ;;  %v2588_v10 = vld [vmem:[%s3223_s21 + $0x2] ss:$4 sm:$0x1f] }
  0xa4   : > { %v404_v27 = vpop.permute.xlu1 %403  ;;  %v2589_v15 = vld [vmem:[%s3223_s21 + $0x2] ss:$4 sm:$0x1f]  ;;  %s4601_s28 = sld [smem:[#allocation11_spill]] }
  0xa5   : > { %v385_v21 = vsel %vm384_vm5, %v382_v17, %v383_v19  ;;  %v374_v23 = vsel %vm373_vm6, %v371_v18, %v372_v20  ;;  %v393_v28 = vpop.permute.xlu0 %392  ;;  %v405_v29 = vrot.slane %v404_v27, 1 }
  0xa6   : > { %388 = vst.msk [vmem:[#allocation2 + $0x6] ss:$8 sm:$0xf] %vm3272_vm0, %v385_v21  ;;  %389 = vst.msk [vmem:[#allocation2 + $0x6] ss:$8 sm:$0x10] %vm3272_vm0, %v385_v21  ;;  %1015 = vrot.lane.b32.xlu1 %v2576_v26, %s4540_s25 }
  0xa7   : > { %377 = vst.msk [vmem:[#allocation2 + $0x5] ss:$8 sm:$0xf] %vm3272_vm0, %v374_v23  ;;  %378 = vst.msk [vmem:[#allocation2 + $0x5] ss:$8 sm:$0x10] %vm3272_vm0, %v374_v23  ;;  %1005 = vrot.lane.b32.xlu0 %v2575_v24, %s4565_s23  ;;  %v407_v31 = vsel %vm406_vm7, %v404_v27, %v405_v29 }
  0xa8   : > { %v394_v30 = vrot.slane %v393_v28, 1  ;;  %410 = vst.msk [vmem:[#allocation2 + $0x28] ss:$8 sm:$0xf] %vm3272_vm0, %v407_v31  ;;  %v426_v35 = vpop.permute.xlu1 %425 }
  0xa9   : > { %411 = vst.msk [vmem:[#allocation2 + $0x28] ss:$8 sm:$0x10] %vm3272_vm0, %v407_v31  ;;  %v415_v36 = vpop.permute.xlu0 %414  ;;  %v427_v37 = vrot.slane %v426_v35, 1 }
  0xaa   : > { %v396_v32 = vsel %vm395_vm8, %v393_v28, %v394_v30  ;;  %v416_v38 = vrot.slane %v415_v36, 1  ;;  %1035 = vrot.lane.b32.xlu1 %v2578_v34, %s4542_s24 }
  0xab   : > { %399 = vst.msk [vmem:[#allocation2 + $0x7] ss:$8 sm:$0xf] %vm3272_vm0, %v396_v32  ;;  %400 = vst.msk [vmem:[#allocation2 + $0x7] ss:$8 sm:$0x10] %vm3272_vm0, %v396_v32  ;;  %1025 = vrot.lane.b32.xlu0 %v2577_v33, %s4539_s22  ;;  %v429_v39 = vsel %vm4519_vm9, %v426_v35, %v427_v37 }
  0xac   : > { %v418_v40 = vsel %vm4517_vm10, %v415_v36, %v416_v38  ;;  %432 = vst.msk [vmem:[#allocation2 + $0x2a] ss:$8 sm:$0xf] %vm3272_vm0, %v429_v39  ;;  %433 = vst.msk [vmem:[#allocation2 + $0x2a] ss:$8 sm:$0x10] %vm3272_vm0, %v429_v39  ;;  %v448_v43 = vpop.permute.xlu1 %447 }
  0xad   : > { %421 = vst.msk [vmem:[#allocation2 + $0x29] ss:$8 sm:$0xf] %vm3272_vm0, %v418_v40  ;;  %422 = vst.msk [vmem:[#allocation2 + $0x29] ss:$8 sm:$0x10] %vm3272_vm0, %v418_v40  ;;  %v437_v44 = vpop.permute.xlu0 %436 }
  0xae   : > { %v449_v45 = vrot.slane %v448_v43, 1  ;;  %v438_v46 = vrot.slane %v437_v44, 1  ;;  %1055 = vrot.lane.b32.xlu1 %v2580_v42, %s4544_s20  ;;  %s4566_s22 = smov 111   ;;  %v2590_v36 = vld [vmem:[%s3223_s21 + $0x2] ss:$4 sm:$0x1f]  ;;  %s316_s20 = scalar_lea.vmem %s4433_s1, %s3217_s17 }
  0xaf   : > { %1045 = vrot.lane.b32.xlu0 %v2579_v41, %s4541_s10  ;;  %v2591_v39 = vld [vmem:[%s3223_s21 + $0x2] ss:$4 sm:$0x1f]  ;;  %s4603_s17 = sld [smem:[#allocation18_spill]] }
  0xb0   : > { %v451_v47 = vsel %vm4504_vm11, %v448_v43, %v449_v45  ;;  %v440_v48 = vsel %vm4518_vm12, %v437_v44, %v438_v46  ;;  %v470_v51 = vpop.permute.xlu1 %469  ;;  %vm4508_vm11 = vcmask 900096   ;;  %v2592_v44 = vld [vmem:[%s3223_s21 + $0x2] ss:$4 sm:$0x1f] }
  0xb1   : > { %454 = vst.msk [vmem:[#allocation2 + $0x2c] ss:$8 sm:$0xf] %vm3272_vm0, %v451_v47  ;;  %455 = vst.msk [vmem:[#allocation2 + $0x2c] ss:$8 sm:$0x10] %vm3272_vm0, %v451_v47  ;;  %v459_v52 = vpop.permute.xlu0 %458 }
  0xb2   : > { %443 = vst.msk [vmem:[#allocation2 + $0x2b] ss:$8 sm:$0xf] %vm3272_vm0, %v440_v48  ;;  %444 = vst.msk [vmem:[#allocation2 + $0x2b] ss:$8 sm:$0x10] %vm3272_vm0, %v440_v48  ;;  %1075 = vrot.lane.b32.xlu1 %v2582_v50, %s4546_s12 }
  0xb3   : > { %v471_v53 = vrot.slane %v470_v51, 1  ;;  %v460_v54 = vrot.slane %v459_v52, 1  ;;  %1065 = vrot.lane.b32.xlu0 %v2581_v49, %s4543_s13  ;;  %v1242_v16 = vld [vmem:[#allocation2 + $0x8] sm:$0xff]  ;;  %v1244_v17 = vld [vmem:[#allocation2 + $0x18] sm:$0xff]  ;;  %v1241_v18 = vld [vmem:[#allocation2] sm:$0xff] }
  0xb4   : > { %v492_v59 = vpop.permute.xlu1 %491  ;;  %v1243_v31 = vld [vmem:[#allocation2 + $0x10] sm:$0xff] }
  0xb5   : > { %v473_v55 = vsel %vm4503_vm13, %v470_v51, %v471_v53  ;;  %v462_v56 = vsel %vm4507_vm14, %v459_v52, %v460_v54  ;;  %vm4506_vm13 = vcmask 924672   ;;  %v481_v60 = vpop.permute.xlu0 %480  ;;  %v493_v61 = vrot.slane %v492_v59, 1  ;;  %v2593_v47 = vld [vmem:[%s3223_s21 + $0x2] ss:$4 sm:$0x1f] }
  0xb6   : > { %476 = vst.msk [vmem:[#allocation2 + $0x2e] ss:$8 sm:$0xf] %vm3272_vm0, %v473_v55  ;;  %477 = vst.msk [vmem:[#allocation2 + $0x2e] ss:$8 sm:$0x10] %vm3272_vm0, %v473_v55  ;;  %1095 = vrot.lane.b32.xlu1 %v2584_v58, %s4547_s19 }
  0xb7   : > { %465 = vst.msk [vmem:[#allocation2 + $0x2d] ss:$8 sm:$0xf] %vm3272_vm0, %v462_v56  ;;  %466 = vst.msk [vmem:[#allocation2 + $0x2d] ss:$8 sm:$0x10] %vm3272_vm0, %v462_v56  ;;  %1085 = vrot.lane.b32.xlu0 %v2583_v57, %s4545_s18  ;;  %v495_v63 = vsel %vm4505_vm15, %v492_v59, %v493_v61 }
  0xb8   : > { %v482_v62 = vrot.slane %v481_v60, 1  ;;  %498 = vst.msk [vmem:[#allocation2 + $0x50] ss:$8 sm:$0xf] %vm3272_vm0, %v495_v63  ;;  %v514_v3 = vpop.permute.xlu1 %513  ;;  %vm505_vm15 = vcmask 908288   ;;  %vm4512_vm14 = vcmask 891904  }
  0xb9   : > { %499 = vst.msk [vmem:[#allocation2 + $0x50] ss:$8 sm:$0x10] %vm3272_vm0, %v495_v63  ;;  %v503_v4 = vpop.permute.xlu0 %502  ;;  %v515_v5 = vrot.slane %v514_v3, 1  ;;  %s3117_s18 = smov 64  }
  0xba   : > { %v484_v0 = vsel %vm4506_vm13, %v481_v60, %v482_v62  ;;  %v504_v6 = vrot.slane %v503_v4, 1  ;;  %1115 = vrot.lane.b32.xlu1 %v2586_v2, %s4549_s14  ;;  %vm4509_vm13 = vcmask 883712   ;;  %v2594_v52 = vld [vmem:[%s3223_s21 + $0x2] ss:$4 sm:$0x1f] }
  0xbb   : > { %487 = vst.msk [vmem:[#allocation2 + $0x2f] ss:$8 sm:$0xf] %vm3272_vm0, %v484_v0  ;;  %488 = vst.msk [vmem:[#allocation2 + $0x2f] ss:$8 sm:$0x10] %vm3272_vm0, %v484_v0  ;;  %1105 = vrot.lane.b32.xlu0 %v2585_v1, %s4566_s22  ;;  %v517_v7 = vsel %vm4508_vm11, %v514_v3, %v515_v5 }
  0xbc   : > { %v506_v8 = vsel %vm505_vm15, %v503_v4, %v504_v6  ;;  %520 = vst.msk [vmem:[#allocation2 + $0x52] ss:$8 sm:$0xf] %vm3272_vm0, %v517_v7  ;;  %521 = vst.msk [vmem:[#allocation2 + $0x52] ss:$8 sm:$0x10] %vm3272_vm0, %v517_v7  ;;  %v536_v11 = vpop.permute.xlu1 %535 }
  0xbd   : > { %509 = vst.msk [vmem:[#allocation2 + $0x51] ss:$8 sm:$0xf] %vm3272_vm0, %v506_v8  ;;  %510 = vst.msk [vmem:[#allocation2 + $0x51] ss:$8 sm:$0x10] %vm3272_vm0, %v506_v8  ;;  %v525_v12 = vpop.permute.xlu0 %524 }
  0xbe   : > { %v537_v13 = vrot.slane %v536_v11, 1  ;;  %v526_v14 = vrot.slane %v525_v12, 1  ;;  %1135 = vrot.lane.b32.xlu1 %v2588_v10, %s4551_s11  ;;  %vm4510_vm11 = vcmask 867328   ;;  %v2595_v55 = vld [vmem:[%s3223_s21 + $0x2] ss:$4 sm:$0x1f] }
  0xbf   : > { %1125 = vrot.lane.b32.xlu0 %v2587_v9, %s4548_s0  ;;  %v2596_v60 = vld [vmem:[%s3223_s21 + $0x2] ss:$4 sm:$0x1f]  ;;  %v3113_v10 = vmov 0.0   ;;  %s4602_s0 = sld [smem:[#allocation17_spill]] }
  0xc0   : > { %v539_v19 = vsel %vm4509_vm13, %v536_v11, %v537_v13  ;;  %v528_v20 = vsel %vm4512_vm14, %v525_v12, %v526_v14  ;;  %v558_v26 = vpop.permute.xlu1 %557  ;;  %vm4511_vm13 = vcmask 875520   ;;  %vm4515_vm14 = vcmask 834560   ;;  %v2597_v63 = vld [vmem:[%s3223_s21 + $0x2] ss:$4 sm:$0x1f]  ;;  %1454 = vmatprep.mubr.f32.mxu0 %v3113_v10  ;;  %1567 = vmatprep.mubr.f32.mxu1 %v3113_v10 }
  0xc1   : > { %542 = vst.msk [vmem:[#allocation2 + $0x54] ss:$8 sm:$0xf] %vm3272_vm0, %v539_v19  ;;  %543 = vst.msk [vmem:[#allocation2 + $0x54] ss:$8 sm:$0x10] %vm3272_vm0, %v539_v19  ;;  %v547_v27 = vpop.permute.xlu0 %546 }
  0xc2   : > { %v1247_v21 = vld [vmem:[#allocation2 + $0x30] sm:$0xff]  ;;  %v1249_v23 = vld [vmem:[#allocation2 + $0x40] sm:$0xff]  ;;  %v1246_v24 = vld [vmem:[#allocation2 + $0x28] sm:$0xff]  ;;  %531 = vst.msk [vmem:[#allocation2 + $0x53] ss:$8 sm:$0xf] %vm3272_vm0, %v528_v20  ;;  %1155 = vrot.lane.b32.xlu1 %v2590_v36, %s4553_s16 }
  0xc3   : > { %532 = vst.msk [vmem:[#allocation2 + $0x53] ss:$8 sm:$0x10] %vm3272_vm0, %v528_v20  ;;  %v2797_v28 = vpack.c.bf16 %v1247_v21, %v1242_v16  ;;  %v2823_v29 = vpack.c.bf16 %v1249_v23, %v1244_v17  ;;  %v2799_v30 = vpack.c.bf16 %v1246_v24, %v1241_v18  ;;  %v1248_v32 = vld [vmem:[#allocation2 + $0x38] sm:$0xff]  ;;  %v559_v33 = vrot.slane %v558_v26, 1  ;;  %1145 = vrot.lane.b32.xlu0 %v2589_v15, %s4550_s29  ;;  %s307_s29 = sand.u32 1, %s4600_s9  }
  0xc4   : > { %v548_v34 = vrot.slane %v547_v27, 1  ;;  %v2825_v35 = vpack.c.bf16 %v1248_v32, %v1243_v31  ;;  %v580_v40 = vpop.permute.xlu1 %579  ;;  %s4605_s16 = sld [smem:[#allocation19_spill]]  ;;  %s2457_s24 = scalar_lea.sflag [#allocation5], %s307_s29 }
  0xc5   : > { %2798 = vmatprep.subr.bf16.mxu0 %v2797_v28  ;;  %v561_v37 = vsel %vm4510_vm11, %v558_v26, %v559_v33  ;;  %2824 = vmatprep.subr.bf16.mxu1 %v2823_v29  ;;  %vm4513_vm11 = vcmask 850944   ;;  %v569_v41 = vpop.permute.xlu0 %568  ;;  %v581_v42 = vrot.slane %v580_v40, 1 }
  0xc6   : > { %v550_v38 = vsel %vm4511_vm13, %v547_v27, %v548_v34  ;;  %2800 = vmatpush1.bf16.msra.mxu0 %v2799_v30  ;;  %564 = vst.msk [vmem:[#allocation2 + $0x56] ss:$8 sm:$0xf] %vm3272_vm0, %v561_v37  ;;  %565 = vst.msk [vmem:[#allocation2 + $0x56] ss:$8 sm:$0x10] %vm3272_vm0, %v561_v37  ;;  %2826 = vmatpush1.bf16.msra.mxu1 %v2825_v35 }
  0xc7   : > { %553 = vst.msk [vmem:[#allocation2 + $0x55] ss:$8 sm:$0xf] %vm3272_vm0, %v550_v38  ;;  %554 = vst.msk [vmem:[#allocation2 + $0x55] ss:$8 sm:$0x10] %vm3272_vm0, %v550_v38  ;;  %1165 = vrot.lane.b32.xlu0 %v2591_v39, %s4552_s26  ;;  %v583_v45 = vsel %vm4513_vm11, %v580_v40, %v581_v42  ;;  %1175 = vrot.lane.b32.xlu1 %v2592_v44, %s4555_s30 }
  0xc8   : > { %vm4514_vm13 = vcmask 859136   ;;  %v570_v43 = vrot.slane %v569_v41, 1  ;;  %586 = vst.msk [vmem:[#allocation2 + $0x78] ss:$8 sm:$0xf] %vm3272_vm0, %v583_v45  ;;  %v602_v48 = vpop.permute.xlu1 %601  ;;  %vm4516_vm11 = vcmask 842752  }
  0xc9   : > { %587 = vst.msk [vmem:[#allocation2 + $0x78] ss:$8 sm:$0x10] %vm3272_vm0, %v583_v45  ;;  %v591_v49 = vpop.permute.xlu0 %590  ;;  %v603_v50 = vrot.slane %v602_v48, 1  ;;  %s308_s30 = scalar_lea.vmem [#allocation4], %s307_s29  ;;  %s3121_s26 = smov [#allocation4]  }
  0xca   : > { %v572_v46 = vsel %vm4514_vm13, %v569_v41, %v570_v43  ;;  %v592_v51 = vrot.slane %v591_v49, 1  ;;  %vm626_vm13 = vcmask 818176   ;;  %s2469_s11 = sshll.u32 %s308_s30, 4  ;;  %s3024_s10 = sshll.u32 %s3121_s26, 4  ;;  %s4392_s11 = int_to_ptr.vmem [resolvable:$true] %s2469_s11  ;;  %s3025_s10 = int_to_ptr.vmem [resolvable:$false] %s3024_s10 }
  0xcb   : > { %575 = vst.msk [vmem:[#allocation2 + $0x57] ss:$8 sm:$0xf] %vm3272_vm0, %v572_v46  ;;  %576 = vst.msk [vmem:[#allocation2 + $0x57] ss:$8 sm:$0x10] %vm3272_vm0, %v572_v46  ;;  %1185 = vrot.lane.b32.xlu0 %v2593_v47, %s4554_s27  ;;  %v605_v53 = vsel %vm4515_vm14, %v602_v48, %v603_v50  ;;  %1195 = vrot.lane.b32.xlu1 %v2594_v52, %s4556_s8  ;;  %p3027_p0 = scmp.lt.s32.totalorder %s4392_s11, %s3025_s10 }
  0xcc   : > { %v594_v54 = vsel %vm4516_vm11, %v591_v49, %v592_v51  ;;  %608 = vst.msk [vmem:[#allocation2 + $0x7a] ss:$8 sm:$0xf] %vm3272_vm0, %v605_v53  ;;  %609 = vst.msk [vmem:[#allocation2 + $0x7a] ss:$8 sm:$0x10] %vm3272_vm0, %v605_v53  ;;  %v624_v56 = vpop.permute.xlu1 %623 }
  0xcd   : > { %597 = vst.msk [vmem:[#allocation2 + $0x79] ss:$8 sm:$0xf] %vm3272_vm0, %v594_v54  ;;  %598 = vst.msk [vmem:[#allocation2 + $0x79] ss:$8 sm:$0x10] %vm3272_vm0, %v594_v54  ;;  %v613_v57 = vpop.permute.xlu0 %612 }
  0xce   : > { %vm615_vm14 = vcmask 826368   ;;  %v625_v58 = vrot.slane %v624_v56, 1  ;;  %v614_v59 = vrot.slane %v613_v57, 1  ;;  %vm637_vm11 = vcmask 809984   ;;  %s3120_s8 = smov 60   ;;  %s3020_s25 = scalar_lea.vmem %s4392_s11, 16 }
  0xcf   : > { %1205 = vrot.lane.b32.xlu0 %v2595_v55, %s4557_s15  ;;  %1215 = vrot.lane.b32.xlu1 %v2596_v60, %s4558_s7  ;;  %p3021_p11 = scmp.ne.s32.totalorder %s4392_s11, %s3020_s25  ;;  %s3026_s12 = scalar_lea.vmem %s3025_s10, 32 }
  0xd0   : > { %v627_v61 = vsel %vm626_vm13, %v624_v56, %v625_v58  ;;  %v616_v62 = vsel %vm615_vm14, %v613_v57, %v614_v59  ;;  %v651_v0 = vpop.permute.xlu1 %650  ;;  %p3028_p1 = scmp.lt.s32.totalorder %s3026_s12, %s3020_s25 }
  0xd1   : > { %630 = vst.msk [vmem:[#allocation2 + $0x7c] ss:$8 sm:$0xf] %vm3272_vm0, %v627_v61  ;;  %631 = vst.msk [vmem:[#allocation2 + $0x7c] ss:$8 sm:$0x10] %vm3272_vm0, %v627_v61  ;;  %v635_v1 = vpop.permute.xlu0 %634  ;;  %p3022_p12 = pnand %p3021_p11, %p3205_p5 }
  0xd2   : > { %619 = vst.msk [vmem:[#allocation2 + $0x7b] ss:$8 sm:$0xf] %vm3272_vm0, %v616_v62  ;;  %620 = vst.msk [vmem:[#allocation2 + $0x7b] ss:$8 sm:$0x10] %vm3272_vm0, %v616_v62  ;;  %p3029_p2 = por %p3028_p1, %p3027_p0 }
  0xd3   : > { %v652_v2 = vrot.slane %v651_v0, 1  ;;  %v636_v3 = vrot.slane %v635_v1, 1  ;;  %1225 = vrot.lane.b32.xlu0 %v2597_v63, %s4559_s5  ;;  %v1252_v17 = vld [vmem:[#allocation2 + $0x58] sm:$0xff]  ;;  %v1254_v18 = vld [vmem:[#allocation2 + $0x68] sm:$0xff]  ;;  %v1251_v19 = vld [vmem:[#allocation2 + $0x50] sm:$0xff]  ;;  %p3023_p13 = pneg %p3022_p12 }
  0xd4   : > { %v671_v6 = vpop.permute.xlu1 %670  ;;  %v1253_v32 = vld [vmem:[#allocation2 + $0x60] sm:$0xff] }
  0xd5   : > { %v653_v4 = vsel %vm329_vm2, %v651_v0, %v652_v2  ;;  %v638_v5 = vsel %vm637_vm11, %v635_v1, %v636_v3  ;;  %v661_v7 = vpop.permute.xlu0 %660  ;;  %v672_v8 = vrot.slane %v671_v6, 1  ;;  %p3030_p3 = pnand %p3029_p2, %p3023_p13 }
  0xd6   : > { %656 = vst.msk [vmem:[#allocation2 + $0x7f] ss:$8 sm:$0xf] %vm3272_vm0, %v653_v4  ;;  %657 = vst.msk [vmem:[#allocation2 + $0x7f] ss:$8 sm:$0x10] %vm3272_vm0, %v653_v4 }
  0xd7   : > { %641 = vst.msk [vmem:[#allocation2 + $0x7d] ss:$8 sm:$0xf] %vm3272_vm0, %v638_v5  ;;  %642 = vst.msk [vmem:[#allocation2 + $0x7d] ss:$8 sm:$0x10] %vm3272_vm0, %v638_v5  ;;  %v673_v11 = vsel %vm351_vm1, %v671_v6, %v672_v8 }
  0xd8   : > { %v662_v9 = vrot.slane %v661_v7, 1  ;;  %676 = vst.msk [vmem:[#allocation2 + $0xa1] ss:$8 sm:$0xf] %vm3272_vm0, %v673_v11  ;;  %v691_v13 = vpop.permute.xlu1 %690 }
  0xd9   : > { %677 = vst.msk [vmem:[#allocation2 + $0xa1] ss:$8 sm:$0x10] %vm3272_vm0, %v673_v11  ;;  %v681_v14 = vpop.permute.xlu0 %680  ;;  %v692_v15 = vrot.slane %v691_v13, 1 }
  0xda   : > { %v663_v12 = vsel %vm340_vm4, %v661_v7, %v662_v9  ;;  %v682_v16 = vrot.slane %v681_v14, 1 }
  0xdb   : > { %666 = vst.msk [vmem:[#allocation2 + $0xa0] ss:$8 sm:$0xf] %vm3272_vm0, %v663_v12  ;;  %667 = vst.msk [vmem:[#allocation2 + $0xa0] ss:$8 sm:$0x10] %vm3272_vm0, %v663_v12  ;;  %v693_v20 = vsel %vm373_vm6, %v691_v13, %v692_v15 }
  0xdc   : > { %v683_v21 = vsel %vm362_vm3, %v681_v14, %v682_v16  ;;  %696 = vst.msk [vmem:[#allocation2 + $0xa3] ss:$8 sm:$0xf] %vm3272_vm0, %v693_v20  ;;  %697 = vst.msk [vmem:[#allocation2 + $0xa3] ss:$8 sm:$0x10] %vm3272_vm0, %v693_v20  ;;  %v711_v27 = vpop.permute.xlu1 %710 }
  0xdd   : > { %686 = vst.msk [vmem:[#allocation2 + $0xa2] ss:$8 sm:$0xf] %vm3272_vm0, %v683_v21  ;;  %687 = vst.msk [vmem:[#allocation2 + $0xa2] ss:$8 sm:$0x10] %vm3272_vm0, %v683_v21  ;;  %v701_v28 = vpop.permute.xlu0 %700 }
  0xde   : > { %v1257_v23 = vld [vmem:[#allocation2 + $0x80] sm:$0xff]  ;;  %v1259_v24 = vld [vmem:[#allocation2 + $0x90] sm:$0xff]  ;;  %v1256_v26 = vld [vmem:[#allocation2 + $0x78] sm:$0xff]  ;;  %v712_v34 = vrot.slane %v711_v27, 1  ;;  %v702_v35 = vrot.slane %v701_v28, 1 }
  0xdf   : > { %v2801_v29 = vpack.c.bf16 %v1257_v23, %v1252_v17  ;;  %v2827_v30 = vpack.c.bf16 %v1259_v24, %v1254_v18  ;;  %v2803_v31 = vpack.c.bf16 %v1256_v26, %v1251_v19  ;;  %v1258_v33 = vld [vmem:[#allocation2 + $0x88] sm:$0xff] }
  0xe0   : > { %v2829_v36 = vpack.c.bf16 %v1258_v33, %v1253_v32  ;;  %v713_v37 = vsel %vm395_vm8, %v711_v27, %v712_v34  ;;  %v703_v38 = vsel %vm384_vm5, %v701_v28, %v702_v35  ;;  %v731_v39 = vpop.permute.xlu1 %730 }
  0xe1   : > { %2802 = vmatprep.subr.bf16.mxu0 %v2801_v29  ;;  %2828 = vmatprep.subr.bf16.mxu1 %v2827_v30  ;;  %716 = vst.msk [vmem:[#allocation2 + $0xa5] ss:$8 sm:$0xf] %vm3272_vm0, %v713_v37  ;;  %717 = vst.msk [vmem:[#allocation2 + $0xa5] ss:$8 sm:$0x10] %vm3272_vm0, %v713_v37  ;;  %v721_v40 = vpop.permute.xlu0 %720 }
  0xe2   : > { %2804 = vmatpush1.bf16.msra.mxu0 %v2803_v31  ;;  %2830 = vmatpush1.bf16.msra.mxu1 %v2829_v36  ;;  %706 = vst.msk [vmem:[#allocation2 + $0xa4] ss:$8 sm:$0xf] %vm3272_vm0, %v703_v38  ;;  %707 = vst.msk [vmem:[#allocation2 + $0xa4] ss:$8 sm:$0x10] %vm3272_vm0, %v703_v38 }
  0xe3   : > { %v732_v41 = vrot.slane %v731_v39, 1  ;;  %v722_v42 = vrot.slane %v721_v40, 1 }
  0xe4   : > { %v751_v45 = vpop.permute.xlu1 %750 }
  0xe5   : > { %v733_v43 = vsel %vm4517_vm10, %v731_v39, %v732_v41  ;;  %v723_v44 = vsel %vm406_vm7, %v721_v40, %v722_v42  ;;  %v741_v46 = vpop.permute.xlu0 %740  ;;  %v752_v47 = vrot.slane %v751_v45, 1  ;;  %vm4567_vm10 = vcmask 941056   ;;  %v1301_v42 = vld [vmem:[%s4435_s3] sm:$0xff] }
  0xe6   : > { %736 = vst.msk [vmem:[#allocation2 + $0xa7] ss:$8 sm:$0xf] %vm3272_vm0, %v733_v43  ;;  %737 = vst.msk [vmem:[#allocation2 + $0xa7] ss:$8 sm:$0x10] %vm3272_vm0, %v733_v43 }
  0xe7   : > { %726 = vst.msk [vmem:[#allocation2 + $0xa6] ss:$8 sm:$0xf] %vm3272_vm0, %v723_v44  ;;  %727 = vst.msk [vmem:[#allocation2 + $0xa6] ss:$8 sm:$0x10] %vm3272_vm0, %v723_v44  ;;  %v753_v49 = vsel %vm4518_vm12, %v751_v45, %v752_v47 }
  0xe8   : > { %v742_v48 = vrot.slane %v741_v46, 1  ;;  %756 = vst.msk [vmem:[#allocation2 + $0xc9] ss:$8 sm:$0xf] %vm3272_vm0, %v753_v49  ;;  %v771_v51 = vpop.permute.xlu1 %770  ;;  %vm4568_vm12 = vcmask 949248   ;;  %v3114_v45 = vmov 0  }
  0xe9   : > { %757 = vst.msk [vmem:[#allocation2 + $0xc9] ss:$8 sm:$0x10] %vm3272_vm0, %v753_v49  ;;  %v761_v52 = vpop.permute.xlu0 %760  ;;  %v772_v53 = vrot.slane %v771_v51, 1  ;;  %3018 = vset.pattern.permute.xlu1 %v3114_v45  ;;  %3019 = vset.pattern.permute.xlu0 %v3114_v45 }
  0xea   : > { %v743_v50 = vsel %vm4519_vm9, %v741_v46, %v742_v48  ;;  %v762_v54 = vrot.slane %v761_v52, 1  ;;  %vm4569_vm9 = vcmask 924672   ;;  %v1302_v46 = vld [vmem:[%s4435_s3 + $0x8] sm:$0xff]  ;;  %1311 = vperm.xlu1 %3018, %v1301_v42  }
  0xeb   : > { %746 = vst.msk [vmem:[#allocation2 + $0xc8] ss:$8 sm:$0xf] %vm3272_vm0, %v743_v50  ;;  %747 = vst.msk [vmem:[#allocation2 + $0xc8] ss:$8 sm:$0x10] %vm3272_vm0, %v743_v50  ;;  %v773_v55 = vsel %vm4567_vm10, %v771_v51, %v772_v53  ;;  %1316 = vperm.xlu0 %3019, %v1302_v46  }
  0xec   : > { %v763_v56 = vsel %vm4568_vm12, %v761_v52, %v762_v54  ;;  %776 = vst.msk [vmem:[#allocation2 + $0xcb] ss:$8 sm:$0xf] %vm3272_vm0, %v773_v55  ;;  %777 = vst.msk [vmem:[#allocation2 + $0xcb] ss:$8 sm:$0x10] %vm3272_vm0, %v773_v55  ;;  %v791_v57 = vpop.permute.xlu1 %790 }
  0xed   : > { %766 = vst.msk [vmem:[#allocation2 + $0xca] ss:$8 sm:$0xf] %vm3272_vm0, %v763_v56  ;;  %767 = vst.msk [vmem:[#allocation2 + $0xca] ss:$8 sm:$0x10] %vm3272_vm0, %v763_v56  ;;  %v781_v58 = vpop.permute.xlu0 %780 }
  0xee   : > { %v792_v59 = vrot.slane %v791_v57, 1  ;;  %v782_v60 = vrot.slane %v781_v58, 1  ;;  %vm4570_vm10 = vcmask 932864   ;;  %vm4572_vm12 = vcmask 891904   ;;  %v1262_v16 = vld [vmem:[#allocation2 + $0xa8] sm:$0xff]  ;;  %v1264_v17 = vld [vmem:[#allocation2 + $0xb8] sm:$0xff] }
  0xef   : > { %v1261_v18 = vld [vmem:[#allocation2 + $0xa0] sm:$0xff]  ;;  %v1263_v31 = vld [vmem:[#allocation2 + $0xb0] sm:$0xff] }
  0xf0   : > { %v793_v61 = vsel %vm4569_vm9, %v791_v57, %v792_v59  ;;  %v783_v62 = vsel %vm4570_vm10, %v781_v58, %v782_v60  ;;  %v811_v63 = vpop.permute.xlu1 %810  ;;  %vm4571_vm9 = vcmask 916480   ;;  %vm4573_vm10 = vcmask 900096   ;;  %v1303_v51 = vld [vmem:[%s4435_s3 + $0x10] sm:$0xff]  ;;  %v1305_v52 = vld [vmem:[%s4435_s3 + $0x20] sm:$0xff]  ;;  %v1304_v59 = vld [vmem:[%s4435_s3 + $0x18] sm:$0xff] }
  0xf1   : > { %796 = vst.msk [vmem:[#allocation2 + $0xcd] ss:$8 sm:$0xf] %vm3272_vm0, %v793_v61  ;;  %797 = vst.msk [vmem:[#allocation2 + $0xcd] ss:$8 sm:$0x10] %vm3272_vm0, %v793_v61  ;;  %v801_v0 = vpop.permute.xlu0 %800  ;;  %1321 = vperm.xlu1 %3018, %v1303_v51   ;;  %1331 = vperm.xlu0 %3019, %v1305_v52  }
  0xf2   : > { %786 = vst.msk [vmem:[#allocation2 + $0xcc] ss:$8 sm:$0xf] %vm3272_vm0, %v783_v62  ;;  %787 = vst.msk [vmem:[#allocation2 + $0xcc] ss:$8 sm:$0x10] %vm3272_vm0, %v783_v62 }
  0xf3   : > { %v812_v1 = vrot.slane %v811_v63, 1  ;;  %v802_v2 = vrot.slane %v801_v0, 1  ;;  %v1307_v60 = vld [vmem:[%s4435_s3 + $0x30] sm:$0xff] }
  0xf4   : > { %v831_v5 = vpop.permute.xlu1 %830 }
  0xf5   : > { %v813_v3 = vsel %vm505_vm15, %v811_v63, %v812_v1  ;;  %v803_v4 = vsel %vm4571_vm9, %v801_v0, %v802_v2  ;;  %v821_v6 = vpop.permute.xlu0 %820  ;;  %v832_v7 = vrot.slane %v831_v5, 1  ;;  %vm4574_vm9 = vcmask 875520   ;;  %1326 = vperm.xlu1 %3018, %v1304_v59   ;;  %1341 = vperm.xlu0 %3019, %v1307_v60  }
  0xf6   : > { %816 = vst.msk [vmem:[#allocation2 + $0xcf] ss:$8 sm:$0xf] %vm3272_vm0, %v813_v3  ;;  %817 = vst.msk [vmem:[#allocation2 + $0xcf] ss:$8 sm:$0x10] %vm3272_vm0, %v813_v3 }
  0xf7   : > { %806 = vst.msk [vmem:[#allocation2 + $0xce] ss:$8 sm:$0xf] %vm3272_vm0, %v803_v4  ;;  %807 = vst.msk [vmem:[#allocation2 + $0xce] ss:$8 sm:$0x10] %vm3272_vm0, %v803_v4  ;;  %v833_v9 = vsel %vm4572_vm12, %v831_v5, %v832_v7 }
  0xf8   : > { %v822_v8 = vrot.slane %v821_v6, 1  ;;  %836 = vst.msk [vmem:[#allocation2 + $0xf1] ss:$8 sm:$0xf] %vm3272_vm0, %v833_v9  ;;  %v851_v12 = vpop.permute.xlu1 %850  ;;  %vm4575_vm12 = vcmask 883712   ;;  %v1306_v3 = vld [vmem:[%s4435_s3 + $0x28] sm:$0xff] }
  0xf9   : > { %837 = vst.msk [vmem:[#allocation2 + $0xf1] ss:$8 sm:$0x10] %vm3272_vm0, %v833_v9  ;;  %v841_v13 = vpop.permute.xlu0 %840  ;;  %v852_v14 = vrot.slane %v851_v12, 1  ;;  %1336 = vperm.xlu1 %3018, %v1306_v3  }
  0xfa   : > { %v823_v11 = vsel %vm4573_vm10, %v821_v6, %v822_v8  ;;  %v842_v15 = vrot.slane %v841_v13, 1  ;;  %vm4576_vm10 = vcmask 859136  }
  0xfb   : > { %826 = vst.msk [vmem:[#allocation2 + $0xf0] ss:$8 sm:$0xf] %vm3272_vm0, %v823_v11  ;;  %827 = vst.msk [vmem:[#allocation2 + $0xf0] ss:$8 sm:$0x10] %vm3272_vm0, %v823_v11  ;;  %v853_v19 = vsel %vm4574_vm9, %v851_v12, %v852_v14 }
  0xfc   : > { %v843_v20 = vsel %vm4575_vm12, %v841_v13, %v842_v15  ;;  %856 = vst.msk [vmem:[#allocation2 + $0xf3] ss:$8 sm:$0xf] %vm3272_vm0, %v853_v19  ;;  %857 = vst.msk [vmem:[#allocation2 + $0xf3] ss:$8 sm:$0x10] %vm3272_vm0, %v853_v19  ;;  %v871_v26 = vpop.permute.xlu1 %870 }
  0xfd   : > { %846 = vst.msk [vmem:[#allocation2 + $0xf2] ss:$8 sm:$0xf] %vm3272_vm0, %v843_v20  ;;  %847 = vst.msk [vmem:[#allocation2 + $0xf2] ss:$8 sm:$0x10] %vm3272_vm0, %v843_v20  ;;  %v861_v27 = vpop.permute.xlu0 %860 }
  0xfe   : > { %v1267_v21 = vld [vmem:[#allocation2 + $0xd0] sm:$0xff]  ;;  %v1269_v23 = vld [vmem:[#allocation2 + $0xe0] sm:$0xff]  ;;  %v1266_v24 = vld [vmem:[#allocation2 + $0xc8] sm:$0xff]  ;;  %v872_v33 = vrot.slane %v871_v26, 1  ;;  %v862_v34 = vrot.slane %v861_v27, 1  ;;  %vm4577_vm9 = vcmask 867328  }
  0xff   : > { %v2805_v28 = vpack.c.bf16 %v1267_v21, %v1262_v16  ;;  %v2831_v29 = vpack.c.bf16 %v1269_v23, %v1264_v17  ;;  %v2807_v30 = vpack.c.bf16 %v1266_v24, %v1261_v18  ;;  %v1268_v32 = vld [vmem:[#allocation2 + $0xd8] sm:$0xff]  ;;  %vm4578_vm12 = vcmask 842752  }
 0x100   : > { %v2833_v35 = vpack.c.bf16 %v1268_v32, %v1263_v31  ;;  %v873_v36 = vsel %vm4576_vm10, %v871_v26, %v872_v33  ;;  %v863_v37 = vsel %vm4577_vm9, %v861_v27, %v862_v34  ;;  %v891_v38 = vpop.permute.xlu1 %890  ;;  %vm4579_vm10 = vcmask 850944   ;;  %v1308_v11 = vld [vmem:[%s4435_s3 + $0x38] sm:$0xff] }
 0x101   : > { %2806 = vmatprep.subr.bf16.mxu0 %v2805_v28  ;;  %2832 = vmatprep.subr.bf16.mxu1 %v2831_v29  ;;  %876 = vst.msk [vmem:[#allocation2 + $0xf5] ss:$8 sm:$0xf] %vm3272_vm0, %v873_v36  ;;  %877 = vst.msk [vmem:[#allocation2 + $0xf5] ss:$8 sm:$0x10] %vm3272_vm0, %v873_v36  ;;  %v881_v39 = vpop.permute.xlu0 %880 }
 0x102   : > { %2808 = vmatpush1.bf16.msra.mxu0 %v2807_v30  ;;  %2834 = vmatpush1.bf16.msra.mxu1 %v2833_v35  ;;  %866 = vst.msk [vmem:[#allocation2 + $0xf4] ss:$8 sm:$0xf] %vm3272_vm0, %v863_v37  ;;  %867 = vst.msk [vmem:[#allocation2 + $0xf4] ss:$8 sm:$0x10] %vm3272_vm0, %v863_v37 }
 0x103   : > { %v892_v40 = vrot.slane %v891_v38, 1  ;;  %v882_v41 = vrot.slane %v881_v39, 1  ;;  %vm4580_vm9 = vcmask 834560   ;;  %1346 = vperm.xlu1 %3018, %v1308_v11  }
 0x104   : > { %v911_v48 = vpop.permute.xlu1 %910 }
 0x105   : > { %v893_v43 = vsel %vm4578_vm12, %v891_v38, %v892_v40  ;;  %v883_v44 = vsel %vm4579_vm10, %v881_v39, %v882_v41  ;;  %v901_v47 = vpop.permute.xlu0 %900  ;;  %v912_v50 = vrot.slane %v911_v48, 1  ;;  %vm4589_vm12 = vcmask 900096  }
 0x106   : > { %896 = vst.msk [vmem:[#allocation2 + $0xf7] ss:$8 sm:$0xf] %vm3272_vm0, %v893_v43  ;;  %897 = vst.msk [vmem:[#allocation2 + $0xf7] ss:$8 sm:$0x10] %vm3272_vm0, %v893_v43 }
 0x107   : > { %886 = vst.msk [vmem:[#allocation2 + $0xf6] ss:$8 sm:$0xf] %vm3272_vm0, %v883_v44  ;;  %887 = vst.msk [vmem:[#allocation2 + $0xf6] ss:$8 sm:$0x10] %vm3272_vm0, %v883_v44  ;;  %v913_v54 = vsel %vm615_vm14, %v911_v48, %v912_v50 }
 0x108   : > { %v902_v49 = vrot.slane %v901_v47, 1  ;;  %916 = vst.msk [vmem:[#allocation2 + $0x119] ss:$8 sm:$0xf] %vm3272_vm0, %v913_v54  ;;  %v931_v56 = vpop.permute.xlu1 %930  ;;  %vm4590_vm10 = vcmask 891904  }
 0x109   : > { %917 = vst.msk [vmem:[#allocation2 + $0x119] ss:$8 sm:$0x10] %vm3272_vm0, %v913_v54  ;;  %v921_v55 = vpop.permute.xlu0 %920  ;;  %v932_v58 = vrot.slane %v931_v56, 1 }
 0x10a   : > { %v903_v53 = vsel %vm4580_vm9, %v901_v47, %v902_v49  ;;  %v922_v57 = vrot.slane %v921_v55, 1  ;;  %vm4592_vm9 = vcmask 875520  }
 0x10b   : > { %906 = vst.msk [vmem:[#allocation2 + $0x118] ss:$8 sm:$0xf] %vm3272_vm0, %v903_v53  ;;  %907 = vst.msk [vmem:[#allocation2 + $0x118] ss:$8 sm:$0x10] %vm3272_vm0, %v903_v53  ;;  %v933_v62 = vsel %vm637_vm11, %v931_v56, %v932_v58 }
 0x10c   : > { %v923_v61 = vsel %vm626_vm13, %v921_v55, %v922_v57  ;;  %936 = vst.msk [vmem:[#allocation2 + $0x11b] ss:$8 sm:$0xf] %vm3272_vm0, %v933_v62  ;;  %937 = vst.msk [vmem:[#allocation2 + $0x11b] ss:$8 sm:$0x10] %vm3272_vm0, %v933_v62  ;;  %v956_v0 = vpop.permute.xlu1 %955 }
 0x10d   : > { %926 = vst.msk [vmem:[#allocation2 + $0x11a] ss:$8 sm:$0xf] %vm3272_vm0, %v923_v61  ;;  %927 = vst.msk [vmem:[#allocation2 + $0x11a] ss:$8 sm:$0x10] %vm3272_vm0, %v923_v61  ;;  %v946_v63 = vpop.permute.xlu0 %945 }
 0x10e   : > { %v947_v1 = vrot.slane %v946_v63, 1  ;;  %v957_v2 = vrot.slane %v956_v0, 1  ;;  %v1272_v26 = vld [vmem:[#allocation2 + $0xf8] sm:$0xff]  ;;  %v1274_v27 = vld [vmem:[#allocation2 + $0x108] sm:$0xff]  ;;  %v1271_v28 = vld [vmem:[#allocation2 + $0xf0] sm:$0xff] }
 0x10f   : > { %v1273_v39 = vld [vmem:[#allocation2 + $0x100] sm:$0xff] }
 0x110   : > { %v948_v4 = vsel %vm329_vm2, %v946_v63, %v947_v1  ;;  %v958_v5 = vsel %vm340_vm4, %v956_v0, %v957_v2  ;;  %v976_v7 = vpop.permute.xlu1 %975  ;;  %vm4582_vm2 = vcmask 965632   ;;  %vm4584_vm4 = vcmask 949248  }
 0x111   : > { %951 = vst.msk [vmem:[#allocation2 + $0x11d] ss:$8 sm:$0xf] %vm3272_vm0, %v948_v4  ;;  %952 = vst.msk [vmem:[#allocation2 + $0x11d] ss:$8 sm:$0x10] %vm3272_vm0, %v948_v4  ;;  %v966_v6 = vpop.permute.xlu0 %965 }
 0x112   : > { %961 = vst.msk [vmem:[#allocation2 + $0x11e] ss:$8 sm:$0xf] %vm3272_vm0, %v958_v5  ;;  %962 = vst.msk [vmem:[#allocation2 + $0x11e] ss:$8 sm:$0x10] %vm3272_vm0, %v958_v5 }
 0x113   : > { %v967_v8 = vrot.slane %v966_v6, 1  ;;  %v977_v9 = vrot.slane %v976_v7, 1 }
 0x114   : > { %v996_v15 = vpop.permute.xlu1 %995 }
 0x115   : > { %v968_v12 = vsel %vm351_vm1, %v966_v6, %v967_v8  ;;  %v978_v13 = vsel %vm362_vm3, %v976_v7, %v977_v9  ;;  %v986_v14 = vpop.permute.xlu0 %985  ;;  %v997_v17 = vrot.slane %v996_v15, 1  ;;  %vm4581_vm1 = vcmask 973824  }
 0x116   : > { %971 = vst.msk [vmem:[#allocation2 + $0x11f] ss:$8 sm:$0xf] %vm3272_vm0, %v968_v12  ;;  %972 = vst.msk [vmem:[#allocation2 + $0x11f] ss:$8 sm:$0x10] %vm3272_vm0, %v968_v12 }
 0x117   : > { %981 = vst.msk [vmem:[#allocation2 + $0x140] ss:$8 sm:$0xf] %vm3272_vm0, %v978_v13  ;;  %982 = vst.msk [vmem:[#allocation2 + $0x140] ss:$8 sm:$0x10] %vm3272_vm0, %v978_v13  ;;  %v998_v19 = vsel %vm384_vm5, %v996_v15, %v997_v17 }
 0x118   : > { %v987_v16 = vrot.slane %v986_v14, 1  ;;  %1001 = vst.msk [vmem:[#allocation2 + $0x142] ss:$8 sm:$0xf] %vm3272_vm0, %v998_v19  ;;  %v1016_v21 = vpop.permute.xlu1 %1015  ;;  %vm4583_vm3 = vcmask 957440   ;;  %vm4585_vm5 = vcmask 941056  }
 0x119   : > { %1002 = vst.msk [vmem:[#allocation2 + $0x142] ss:$8 sm:$0x10] %vm3272_vm0, %v998_v19  ;;  %v1006_v20 = vpop.permute.xlu0 %1005  ;;  %v1017_v24 = vrot.slane %v1016_v21, 1 }
 0x11a   : > { %v988_v18 = vsel %vm373_vm6, %v986_v14, %v987_v16  ;;  %v1007_v23 = vrot.slane %v1006_v20, 1  ;;  %vm4586_vm6 = vcmask 932864  }
 0x11b   : > { %991 = vst.msk [vmem:[#allocation2 + $0x141] ss:$8 sm:$0xf] %vm3272_vm0, %v988_v18  ;;  %992 = vst.msk [vmem:[#allocation2 + $0x141] ss:$8 sm:$0x10] %vm3272_vm0, %v988_v18  ;;  %v1018_v30 = vsel %vm406_vm7, %v1016_v21, %v1017_v24 }
 0x11c   : > { %v1008_v29 = vsel %vm395_vm8, %v1006_v20, %v1007_v23  ;;  %1021 = vst.msk [vmem:[#allocation2 + $0x144] ss:$8 sm:$0xf] %vm3272_vm0, %v1018_v30  ;;  %1022 = vst.msk [vmem:[#allocation2 + $0x144] ss:$8 sm:$0x10] %vm3272_vm0, %v1018_v30  ;;  %v1036_v35 = vpop.permute.xlu1 %1035 }
 0x11d   : > { %v1277_v31 = vld [vmem:[#allocation2 + $0x120] sm:$0xff]  ;;  %v1279_v32 = vld [vmem:[#allocation2 + $0x130] sm:$0xff]  ;;  %v1276_v33 = vld [vmem:[#allocation2 + $0x118] sm:$0xff]  ;;  %1011 = vst.msk [vmem:[#allocation2 + $0x143] ss:$8 sm:$0xf] %vm3272_vm0, %v1008_v29  ;;  %v1026_v34 = vpop.permute.xlu0 %1025 }
 0x11e   : > { %1012 = vst.msk [vmem:[#allocation2 + $0x143] ss:$8 sm:$0x10] %vm3272_vm0, %v1008_v29  ;;  %v2809_v36 = vpack.c.bf16 %v1277_v31, %v1272_v26  ;;  %v2835_v37 = vpack.c.bf16 %v1279_v32, %v1274_v27  ;;  %v2811_v38 = vpack.c.bf16 %v1276_v33, %v1271_v28  ;;  %v1278_v40 = vld [vmem:[#allocation2 + $0x128] sm:$0xff]  ;;  %v1027_v41 = vrot.slane %v1026_v34, 1 }
 0x11f   : > { %v1037_v42 = vrot.slane %v1036_v35, 1  ;;  %v2837_v43 = vpack.c.bf16 %v1278_v40, %v1273_v39  ;;  %vm4587_vm7 = vcmask 924672   ;;  %vm4588_vm8 = vcmask 916480  }
 0x120   : > { %2810 = vmatprep.subr.bf16.mxu0 %v2809_v36  ;;  %2836 = vmatprep.subr.bf16.mxu1 %v2835_v37  ;;  %v1028_v44 = vsel %vm4581_vm1, %v1026_v34, %v1027_v41  ;;  %v1056_v47 = vpop.permute.xlu1 %1055  ;;  %vm4593_vm1 = vcmask 867328  }
 0x121   : > { %v1038_v45 = vsel %vm4582_vm2, %v1036_v35, %v1037_v42  ;;  %2812 = vmatpush1.bf16.msra.mxu0 %v2811_v38  ;;  %2838 = vmatpush1.bf16.msra.mxu1 %v2837_v43  ;;  %1031 = vst.msk [vmem:[#allocation2 + $0x145] ss:$8 sm:$0xf] %vm3272_vm0, %v1028_v44  ;;  %1032 = vst.msk [vmem:[#allocation2 + $0x145] ss:$8 sm:$0x10] %vm3272_vm0, %v1028_v44  ;;  %v1046_v46 = vpop.permute.xlu0 %1045 }
 0x122   : > { %1041 = vst.msk [vmem:[#allocation2 + $0x146] ss:$8 sm:$0xf] %vm3272_vm0, %v1038_v45  ;;  %1042 = vst.msk [vmem:[#allocation2 + $0x146] ss:$8 sm:$0x10] %vm3272_vm0, %v1038_v45 }
 0x123   : > { %v1047_v48 = vrot.slane %v1046_v46, 1  ;;  %v1057_v49 = vrot.slane %v1056_v47, 1  ;;  %vm4594_vm2 = vcmask 859136  }
 0x124   : > { %v1076_v53 = vpop.permute.xlu1 %1075 }
 0x125   : > { %v1048_v50 = vsel %vm4583_vm3, %v1046_v46, %v1047_v48  ;;  %v1058_v51 = vsel %vm4584_vm4, %v1056_v47, %v1057_v49  ;;  %v1066_v52 = vpop.permute.xlu0 %1065  ;;  %v1077_v55 = vrot.slane %v1076_v53, 1  ;;  %vm4595_vm3 = vcmask 850944  }
 0x126   : > { %1051 = vst.msk [vmem:[#allocation2 + $0x147] ss:$8 sm:$0xf] %vm3272_vm0, %v1048_v50  ;;  %1052 = vst.msk [vmem:[#allocation2 + $0x147] ss:$8 sm:$0x10] %vm3272_vm0, %v1048_v50 }
 0x127   : > { %1061 = vst.msk [vmem:[#allocation2 + $0x168] ss:$8 sm:$0xf] %vm3272_vm0, %v1058_v51  ;;  %1062 = vst.msk [vmem:[#allocation2 + $0x168] ss:$8 sm:$0x10] %vm3272_vm0, %v1058_v51  ;;  %v1078_v57 = vsel %vm4586_vm6, %v1076_v53, %v1077_v55 }
 0x128   : > { %v1067_v54 = vrot.slane %v1066_v52, 1  ;;  %1081 = vst.msk [vmem:[#allocation2 + $0x16a] ss:$8 sm:$0xf] %vm3272_vm0, %v1078_v57  ;;  %v1096_v59 = vpop.permute.xlu1 %1095  ;;  %vm4596_vm4 = vcmask 842752   ;;  %vm3115_vm6 = vmmov 1  }
 0x129   : > { %1082 = vst.msk [vmem:[#allocation2 + $0x16a] ss:$8 sm:$0x10] %vm3272_vm0, %v1078_v57  ;;  %v1086_v58 = vpop.permute.xlu0 %1085  ;;  %v1097_v61 = vrot.slane %v1096_v59, 1  ;;  %v1250_v55 = vld [vmem:[#allocation2 + $0x48] sm:$0xff] }
 0x12a   : > { %v1068_v56 = vsel %vm4585_vm5, %v1066_v52, %v1067_v54  ;;  %v1087_v60 = vrot.slane %v1086_v58, 1  ;;  %vm4597_vm5 = vcmask 834560  }
 0x12b   : > { %1071 = vst.msk [vmem:[#allocation2 + $0x169] ss:$8 sm:$0xf] %vm3272_vm0, %v1068_v56  ;;  %1072 = vst.msk [vmem:[#allocation2 + $0x169] ss:$8 sm:$0x10] %vm3272_vm0, %v1068_v56  ;;  %v1098_v63 = vsel %vm4588_vm8, %v1096_v59, %v1097_v61 }
 0x12c   : > { %v1088_v62 = vsel %vm4587_vm7, %v1086_v58, %v1087_v60  ;;  %1101 = vst.msk [vmem:[#allocation2 + $0x16c] ss:$8 sm:$0xf] %vm3272_vm0, %v1098_v63  ;;  %1102 = vst.msk [vmem:[#allocation2 + $0x16c] ss:$8 sm:$0x10] %vm3272_vm0, %v1098_v63  ;;  %v1116_v1 = vpop.permute.xlu1 %1115 }
 0x12d   : > { %1091 = vst.msk [vmem:[#allocation2 + $0x16b] ss:$8 sm:$0xf] %vm3272_vm0, %v1088_v62  ;;  %1092 = vst.msk [vmem:[#allocation2 + $0x16b] ss:$8 sm:$0x10] %vm3272_vm0, %v1088_v62  ;;  %v1106_v0 = vpop.permute.xlu0 %1105 }
 0x12e   : > { %v1107_v2 = vrot.slane %v1106_v0, 1  ;;  %v1117_v3 = vrot.slane %v1116_v1, 1  ;;  %v1282_v23 = vld [vmem:[#allocation2 + $0x148] sm:$0xff]  ;;  %v1284_v24 = vld [vmem:[#allocation2 + $0x158] sm:$0xff]  ;;  %v1281_v26 = vld [vmem:[#allocation2 + $0x140] sm:$0xff]  ;;  %vm1954_vm8 = vcmask 523268  }
 0x12f   : > { %v1283_v36 = vld [vmem:[#allocation2 + $0x150] sm:$0xff] }
 0x130   : > { %v1108_v4 = vsel %vm505_vm15, %v1106_v0, %v1107_v2  ;;  %v1118_v5 = vsel %vm4589_vm12, %v1116_v1, %v1117_v3  ;;  %v1136_v7 = vpop.permute.xlu1 %1135  ;;  %vm4591_vm15 = vcmask 883712   ;;  %v1245_v3 = vld [vmem:[#allocation2 + $0x20] sm:$0xff]  ;;  %vm3118_vm12 = vmmov 0  }
 0x131   : > { %1111 = vst.msk [vmem:[#allocation2 + $0x16d] ss:$8 sm:$0xf] %vm3272_vm0, %v1108_v4  ;;  %1112 = vst.msk [vmem:[#allocation2 + $0x16d] ss:$8 sm:$0x10] %vm3272_vm0, %v1108_v4  ;;  %v1126_v6 = vpop.permute.xlu0 %1125  ;;  %v2849_v4 = vpack.c.bf16 %v1250_v55, %v1245_v3 }
 0x132   : > { %1121 = vst.msk [vmem:[#allocation2 + $0x16e] ss:$8 sm:$0xf] %vm3272_vm0, %v1118_v5  ;;  %1122 = vst.msk [vmem:[#allocation2 + $0x16e] ss:$8 sm:$0x10] %vm3272_vm0, %v1118_v5 }
 0x133   : > { %v1127_v8 = vrot.slane %v1126_v6, 1  ;;  %v1137_v9 = vrot.slane %v1136_v7, 1  ;;  %v3896_v5 = vld [vmem:[%s4434_s2] sm:$0xff] }
 0x134   : > { %v1156_v15 = vpop.permute.xlu1 %1155 }
 0x135   : > { %v1128_v11 = vsel %vm4590_vm10, %v1126_v6, %v1127_v8  ;;  %v1138_v12 = vsel %vm4591_vm15, %v1136_v7, %v1137_v9  ;;  %v1146_v13 = vpop.permute.xlu0 %1145  ;;  %v1157_v17 = vrot.slane %v1156_v15, 1  ;;  %v1260_v6 = vld [vmem:[#allocation2 + $0x98] sm:$0xff]  ;;  %v1255_v7 = vld [vmem:[#allocation2 + $0x70] sm:$0xff]  ;;  %v1234_v9 = vld [vmem:[%s4434_s2 + $0x8] sm:$0xff]  ;;  %vm2152_vm10 = vcmp.lt.s32.totalorder %v318_v22, 384 }
 0x136   : > { %1131 = vst.msk [vmem:[#allocation2 + $0x16f] ss:$8 sm:$0xf] %vm3272_vm0, %v1128_v11  ;;  %1132 = vst.msk [vmem:[#allocation2 + $0x16f] ss:$8 sm:$0x10] %vm3272_vm0, %v1128_v11  ;;  %v2853_v8 = vpack.c.bf16 %v1260_v6, %v1255_v7 }
 0x137   : > { %1141 = vst.msk [vmem:[#allocation2 + $0x190] ss:$8 sm:$0xf] %vm3272_vm0, %v1138_v12  ;;  %1142 = vst.msk [vmem:[#allocation2 + $0x190] ss:$8 sm:$0x10] %vm3272_vm0, %v1138_v12  ;;  %v1158_v19 = vsel %vm4593_vm1, %v1156_v15, %v1157_v17 }
 0x138   : > { %v1147_v14 = vrot.slane %v1146_v13, 1  ;;  %1161 = vst.msk [vmem:[#allocation2 + $0x192] ss:$8 sm:$0xf] %vm3272_vm0, %v1158_v19  ;;  %v1270_v11 = vld [vmem:[#allocation2 + $0xe8] sm:$0xff]  ;;  %v1265_v12 = vld [vmem:[#allocation2 + $0xc0] sm:$0xff] }
 0x139   : > { %v1166_v18 = vpop.permute.xlu0 %1165  ;;  %1162 = vst.msk [vmem:[#allocation2 + $0x192] ss:$8 sm:$0x10] %vm3272_vm0, %v1158_v19  ;;  %v1176_v21 = vpop.permute.xlu1 %1175  ;;  %v1280_v15 = vld [vmem:[#allocation2 + $0x138] sm:$0xff]  ;;  %vm2373_vm15 = vcmask 1044480   ;;  %vm2369_vm1 = vcmask 367616  }
 0x13a   : > { %v1148_v16 = vsel %vm4592_vm9, %v1146_v13, %v1147_v14  ;;  %v1167_v20 = vrot.slane %v1166_v18, 1  ;;  %v1177_v28 = vrot.slane %v1176_v21, 1  ;;  %v2857_v13 = vpack.c.bf16 %v1270_v11, %v1265_v12  ;;  %v1235_v14 = vld [vmem:[%s4434_s2 + $0x10] sm:$0xff]  ;;  %vm2939_vm9 = vmpackc.low %vm2373_vm15, %vm3115_vm6 }
 0x13b   : > { %1151 = vst.msk [vmem:[#allocation2 + $0x191] ss:$8 sm:$0xf] %vm3272_vm0, %v1148_v16  ;;  %1152 = vst.msk [vmem:[#allocation2 + $0x191] ss:$8 sm:$0x10] %vm3272_vm0, %v1148_v16 }
 0x13c   : > { %v1168_v27 = vsel %vm4594_vm2, %v1166_v18, %v1167_v20  ;;  %v1178_v38 = vsel %vm4595_vm3, %v1176_v21, %v1177_v28  ;;  %v1275_v16 = vld [vmem:[#allocation2 + $0x110] sm:$0xff]  ;;  %v1236_v18 = vld [vmem:[%s4434_s2 + $0x18] sm:$0xff]  ;;  %v1285_v20 = vld [vmem:[#allocation2 + $0x160] sm:$0xff]  ;;  %vm2451_vm2 = vcmask 490496   ;;  %vm2453_vm3 = vcmask 556032  }
 0x13d   : > { %v1287_v29 = vld [vmem:[#allocation2 + $0x170] sm:$0xff]  ;;  %v1289_v30 = vld [vmem:[#allocation2 + $0x180] sm:$0xff]  ;;  %v1286_v31 = vld [vmem:[#allocation2 + $0x168] sm:$0xff]  ;;  %1171 = vst.msk [vmem:[#allocation2 + $0x193] ss:$8 sm:$0xf] %vm3272_vm0, %v1168_v27  ;;  %v1186_v32 = vpop.permute.xlu0 %1185  ;;  %v1196_v41 = vpop.permute.xlu1 %1195  ;;  %v2861_v17 = vpack.c.bf16 %v1280_v15, %v1275_v16 }
 0x13e   : > { %1172 = vst.msk [vmem:[#allocation2 + $0x193] ss:$8 sm:$0x10] %vm3272_vm0, %v1168_v27  ;;  %v2813_v33 = vpack.c.bf16 %v1287_v29, %v1282_v23  ;;  %v2839_v34 = vpack.c.bf16 %v1289_v30, %v1284_v24  ;;  %v2815_v35 = vpack.c.bf16 %v1286_v31, %v1281_v26  ;;  %v1288_v37 = vld [vmem:[#allocation2 + $0x178] sm:$0xff]  ;;  %v1187_v39 = vrot.slane %v1186_v32, 1  ;;  %v1290_v19 = vld [vmem:[#allocation2 + $0x188] sm:$0xff] }
 0x13f   : > { %v2841_v40 = vpack.c.bf16 %v1288_v37, %v1283_v36  ;;  %1181 = vst.msk [vmem:[#allocation2 + $0x194] ss:$8 sm:$0xf] %vm3272_vm0, %v1178_v38  ;;  %1182 = vst.msk [vmem:[#allocation2 + $0x194] ss:$8 sm:$0x10] %vm3272_vm0, %v1178_v38  ;;  %v2865_v21 = vpack.c.bf16 %v1290_v19, %v1285_v20 }
 0x140   : > { %2814 = vmatprep.subr.bf16.mxu0 %v2813_v33  ;;  %2840 = vmatprep.subr.bf16.mxu1 %v2839_v34  ;;  %v1188_v42 = vsel %vm4596_vm4, %v1186_v32, %v1187_v39  ;;  %v1197_v43 = vrot.slane %v1196_v41, 1  ;;  %v1237_v23 = vld [vmem:[%s4434_s2 + $0x20] sm:$0xff]  ;;  %v1238_v28 = vld [vmem:[%s4434_s2 + $0x28] sm:$0xff]  ;;  %v1239_v29 = vld [vmem:[%s4434_s2 + $0x30] sm:$0xff] }
 0x141   : > { %2816 = vmatpush1.bf16.msra.mxu0 %v2815_v35  ;;  %2842 = vmatpush1.bf16.msra.mxu1 %v2841_v40  ;;  %1191 = vst.msk [vmem:[#allocation2 + $0x195] ss:$8 sm:$0xf] %vm3272_vm0, %v1188_v42  ;;  %1192 = vst.msk [vmem:[#allocation2 + $0x195] ss:$8 sm:$0x10] %vm3272_vm0, %v1188_v42  ;;  %v1206_v44 = vpop.permute.xlu0 %1205  ;;  %v1216_v47 = vpop.permute.xlu1 %1215 }
 0x142   : > { %v1198_v45 = vsel %vm4597_vm5, %v1196_v41, %v1197_v43  ;;  %v1207_v46 = vrot.slane %v1206_v44, 1  ;;  %v1217_v49 = vrot.slane %v1216_v47, 1  ;;  %v1240_v30 = vld [vmem:[%s4434_s2 + $0x38] sm:$0xff] }
 0x143   : > { %1201 = vst.msk [vmem:[#allocation2 + $0x196] ss:$8 sm:$0xf] %vm3272_vm0, %v1198_v45  ;;  %1202 = vst.msk [vmem:[#allocation2 + $0x196] ss:$8 sm:$0x10] %vm3272_vm0, %v1198_v45 }
 0x144   : > { %v1208_v48 = vsel %vm615_vm14, %v1206_v44, %v1207_v46  ;;  %v1218_v51 = vsel %vm626_vm13, %v1216_v47, %v1217_v49  ;;  %vm1374_vm14 = vcmask 1041408   ;;  %vm1942_vm13 = vcmask 519168  }
 0x145   : > { %1211 = vst.msk [vmem:[#allocation2 + $0x197] ss:$8 sm:$0xf] %vm3272_vm0, %v1208_v48  ;;  %1212 = vst.msk [vmem:[#allocation2 + $0x197] ss:$8 sm:$0x10] %vm3272_vm0, %v1208_v48  ;;  %v1226_v50 = vpop.permute.xlu0 %1225 }
 0x146   : > { %v1227_v52 = vrot.slane %v1226_v50, 1  ;;  %1221 = vst.msk [vmem:[#allocation2 + $0x1b8] ss:$8 sm:$0xf] %vm3272_vm0, %v1218_v51  ;;  %vm3881_vm7 = vmpackc.low %vm1374_vm14, %vm3115_vm6 }
 0x147   : > { %1222 = vst.msk [vmem:[#allocation2 + $0x1b8] ss:$8 sm:$0x10] %vm3272_vm0, %v1218_v51 }
 0x148   : > { %v1228_v53 = vsel %vm637_vm11, %v1226_v50, %v1227_v52  ;;  %vm1921_vm11 = vcmask 523264  }
 0x149   : > { %1231 = vst.msk [vmem:[#allocation2 + $0x1b9] ss:$8 sm:$0xf] %vm3272_vm0, %v1228_v53  ;;  %1232 = vst.msk [vmem:[#allocation2 + $0x1b9] ss:$8 sm:$0x10] %vm3272_vm0, %v1228_v53 }
 0x14a   : > { %vm1349_vm0 = vcmask 736256  }
 0x14c   : > { %v1292_v56 = vld [vmem:[#allocation2 + $0x198] sm:$0xff]  ;;  %v1294_v57 = vld [vmem:[#allocation2 + $0x1a8] sm:$0xff]  ;;  %v1291_v58 = vld [vmem:[#allocation2 + $0x190] sm:$0xff] }
 0x14d   : > { %v1293_v1 = vld [vmem:[#allocation2 + $0x1a0] sm:$0xff]  ;;  %v1295_v26 = vld [vmem:[#allocation2 + $0x1b0] sm:$0xff] }
 0x150   : > { %v1297_v59 = vld [vmem:[#allocation2 + $0x1c0] sm:$0x3]  ;;  %v1299_v60 = vld [vmem:[#allocation2 + $0x1d0] sm:$0x3]  ;;  %v1296_v61 = vld [vmem:[#allocation2 + $0x1b8] sm:$0x3] }
 0x151   : > { %v2817_v62 = vpack.c.bf16 %v1297_v59, %v1292_v56  ;;  %v2843_v63 = vpack.c.bf16 %v1299_v60, %v1294_v57  ;;  %v2820_v0 = vpack.c.bf16 %v1296_v61, %v1291_v58  ;;  %v1298_v25 = vld [vmem:[#allocation2 + $0x1c8] sm:$0x3]  ;;  %v1300_v24 = vld [vmem:[#allocation2 + $0x1d8] sm:$0x3] }
 0x152   : > { %v2846_v2 = vpack.c.bf16 %v1298_v25, %v1293_v1  ;;  %v2869_v27 = vpack.c.bf16 %v1300_v24, %v1295_v26 }
 0x153   : > { %2819 = vmatprep.subr.msk.bf16.mxu0 %vm3881_vm7, %v2817_v62  ;;  %2845 = vmatprep.subr.msk.bf16.mxu1 %vm3881_vm7, %v2843_v63 }
 0x154   : > { %2822 = vmatpush1.bf16.msk.msra.mxu0 %vm3881_vm7, %v2820_v0  ;;  %2848 = vmatpush1.bf16.msk.msra.mxu1 %vm3881_vm7, %v2846_v2 }
 0x155   : > { %2850 = vmatprep.subr.bf16.mxu0 %v2849_v4 }
 0x157   : > { %2600 = vmatmul.mubr.msk.f32.vlgmr.msra.gmra.mrb[0].mxu0 %vm1349_vm0, %v3896_v5  ;;  %2610 = vmatmul.mubr.msk.f32.vlgmr.msra.gmra.mrb[0].mxu1 %vm1349_vm0, %v3896_v5 }
 0x158   : > { %2852 = vmatpush3.bf16.msra.mxu0 %v2849_v4  ;;  %1460 = vmatprep.mubr.f32.mxu0 %v3113_v10 }
 0x159   : > { %2854 = vmatprep.subr.bf16.mxu0 %v2853_v8  ;;  %1573 = vmatprep.mubr.f32.mxu1 %v3113_v10 }
 0x15b   : > { %2601 = vmatmul.mubr.msk.f32.gmra.mrb[2].mxu0 %vm1349_vm0, %v1234_v9  ;;  %2611 = vmatmul.mubr.msk.f32.gmra.mrb[2].mxu1 %vm1349_vm0, %v1234_v9 }
 0x15c   : > { %2856 = vmatpush3.bf16.msra.mxu0 %v2853_v8  ;;  %1466 = vmatprep.mubr.f32.mxu0 %v3113_v10 }
 0x15d   : > { %2858 = vmatprep.subr.bf16.mxu0 %v2857_v13  ;;  %1579 = vmatprep.mubr.f32.mxu1 %v3113_v10 }
 0x15f   : > { %2602 = vmatmul.mubr.msk.f32.gmra.mrb[4].mxu0 %vm1349_vm0, %v1235_v14  ;;  %2612 = vmatmul.mubr.msk.f32.gmra.mrb[4].mxu1 %vm1349_vm0, %v1235_v14 }
 0x160   : > { %2860 = vmatpush3.bf16.msra.mxu0 %v2857_v13  ;;  %1472 = vmatprep.mubr.f32.mxu0 %v3113_v10 }
 0x161   : > { %2862 = vmatprep.subr.bf16.mxu0 %v2861_v17  ;;  %1585 = vmatprep.mubr.f32.mxu1 %v3113_v10 }
 0x163   : > { %2603 = vmatmul.mubr.msk.f32.gmra.mrb[6].mxu0 %vm1349_vm0, %v1236_v18  ;;  %2613 = vmatmul.mubr.msk.f32.gmra.mrb[6].mxu1 %vm1349_vm0, %v1236_v18 }
 0x164   : > { %2864 = vmatpush3.bf16.msra.mxu0 %v2861_v17  ;;  %1478 = vmatprep.mubr.f32.mxu0 %v3113_v10 }
 0x165   : > { %2866 = vmatprep.subr.bf16.mxu0 %v2865_v21  ;;  %1591 = vmatprep.mubr.f32.mxu1 %v3113_v10 }
 0x167   : > { %2604 = vmatmul.mubr.msk.f32.gmra.mrb[8].mxu0 %vm1349_vm0, %v1237_v23  ;;  %2614 = vmatmul.mubr.msk.f32.gmra.mrb[8].mxu1 %vm1349_vm0, %v1237_v23 }
 0x168   : > { %2868 = vmatpush3.bf16.msra.mxu0 %v2865_v21  ;;  %1484 = vmatprep.mubr.f32.mxu0 %v3113_v10 }
 0x169   : > { %2871 = vmatprep.subr.msk.bf16.mxu0 %vm3881_vm7, %v2869_v27  ;;  %1597 = vmatprep.mubr.f32.mxu1 %v3113_v10  ;;  %v3964_v31 = vpop.permute.xlu1 %1311 }
 0x16a   : > { %v3974_v39 = vpop.permute.xlu0 %1316 }
 0x16b   : > { %2605 = vmatmul.mubr.msk.f32.gmra.mrb[10].mxu0 %vm1349_vm0, %v1238_v28  ;;  %2615 = vmatmul.mubr.msk.f32.gmra.mrb[10].mxu1 %vm1349_vm0, %v1238_v28 }
 0x16c   : > { %2874 = vmatpush3.bf16.msk.msra.mxu0 %vm3881_vm7, %v2869_v27  ;;  %1490 = vmatprep.mubr.f32.mxu0 %v3113_v10 }
 0x16d   : > { %1603 = vmatprep.mubr.f32.mxu1 %v3113_v10 }
 0x16f   : > { %2606 = vmatmul.mubr.msk.f32.gmra.mrb[12].mxu0 %vm1349_vm0, %v1239_v29  ;;  %2616 = vmatmul.mubr.msk.f32.gmra.mrb[12].mxu1 %vm1349_vm0, %v1239_v29 }
 0x170   : > { %1496 = vmatprep.mubr.f32.mxu0 %v3113_v10  ;;  %1609 = vmatprep.mubr.f32.mxu1 %v3113_v10  ;;  %v3972_v38 = vpop.permute.xlu1 %1321  ;;  %v3996_v1 = vpop.permute.xlu0 %1331 }
 0x173   : > { %2607 = vmatmul.mubr.msk.f32.gmra.mrb[14].mxu0 %vm1349_vm0, %v1240_v30  ;;  %2617 = vmatmul.mubr.msk.f32.gmra.mrb[14].mxu1 %vm1349_vm0, %v1240_v30 }
 0x174   : > { %2735 = vmatprep.mubr.msk.f32.mxu0 %vm1349_vm0, %v3896_v5  ;;  %v3988_v56 = vpop.permute.xlu1 %1326  ;;  %v4012_v19 = vpop.permute.xlu0 %1341 }
 0x177   : > { %2736 = vmatmul.mubr.msk.f32.vlgmr.msra.gmra.mrb[16].mxu0 %vm1349_vm0, %v1234_v9 }
 0x178   : > { %2738 = vmatprep.mubr.msk.f32.mxu0 %vm1349_vm0, %v1235_v14  ;;  %v4004_v9 = vpop.permute.xlu1 %1336 }
 0x17b   : > { %2739 = vmatmul.mubr.msk.f32.gmra.mrb[18].mxu0 %vm1349_vm0, %v1236_v18 }
 0x17c   : > { %2741 = vmatprep.mubr.msk.f32.mxu0 %vm1349_vm0, %v1237_v23 }
 0x17f   : > { %2742 = vmatmul.mubr.msk.f32.gmra.mrb[20].mxu0 %vm1349_vm0, %v1238_v28 }
 0x180   : > { %2744 = vmatprep.mubr.msk.f32.mxu0 %vm1349_vm0, %v1239_v29 }
 0x183   : > { %2745 = vmatmul.mubr.msk.f32.gmra.mrb[22].mxu0 %vm1349_vm0, %v1240_v30  ;;  %v4018_v30 = vpop.permute.xlu1 %1346 }
 0x184   : > { %2779 = vmatprep.mubr.msk.f32.mxu0 %vm3118_vm12, %v3113_v10 }
 0x22a   : > { %v1456_v32 = vpop.f32.mrb[0].mxu0  ;;  %v1569_v33 = vpop.f32.mrb[0].mxu1 }
 0x22b   : > { %v1457_v34 = vadd.f32 %v1456_v32, %v3964_v31  ;;  %v1570_v35 = vadd.f32 %v1569_v33, %v3964_v31  ;;  %v3968_v36 = vpop.f32.mrb[1].mxu0  ;;  %v3970_v37 = vpop.f32.mrb[1].mxu1 }
 0x22d   : > { %v1721_v40 = vmax.f32 %v1457_v34, 0.0  ;;  %v1723_v41 = vmax.f32 %v1570_v35, 0.0 }
 0x22e   : > { %v1462_v42 = vpop.f32.mrb[2].mxu0  ;;  %v1575_v43 = vpop.f32.mrb[2].mxu1 }
 0x22f   : > { %v1463_v44 = vadd.f32 %v1462_v42, %v3974_v39  ;;  %v1576_v45 = vadd.f32 %v1575_v43, %v3974_v39  ;;  %v3978_v46 = vpop.f32.mrb[3].mxu1  ;;  %1825 = vxpose.xlu1.b32.start [1/8] (short) %v1723_v41, 128  ;;  %v3980_v47 = vpop.f32.mrb[3].mxu0  ;;  %1761 = vxpose.xlu0.b32.start [1/8] (short) %v1721_v40, 128 }
 0x231   : > { %v1726_v48 = vmax.f32 %v1463_v44, 0.0  ;;  %v1728_v49 = vmax.f32 %v1576_v45, 0.0 }
 0x232   : > { %v1468_v50 = vpop.f32.mrb[4].mxu0  ;;  %v1581_v51 = vpop.f32.mrb[4].mxu1 }
 0x233   : > { %v1469_v52 = vadd.f32 %v1468_v50, %v3972_v38  ;;  %v1582_v53 = vadd.f32 %v1581_v51, %v3972_v38  ;;  %v3984_v54 = vpop.f32.mrb[5].mxu1  ;;  %1826 = vxpose.xlu1.b32.cont [2/8] (short) %v1728_v49, 128  ;;  %v3986_v55 = vpop.f32.mrb[5].mxu0  ;;  %1762 = vxpose.xlu0.b32.cont [2/8] (short) %v1726_v48, 128 }
 0x235   : > { %v1731_v57 = vmax.f32 %v1469_v52, 0.0  ;;  %v1733_v58 = vmax.f32 %v1582_v53, 0.0 }
 0x236   : > { %v1474_v59 = vpop.f32.mrb[6].mxu0  ;;  %v1587_v60 = vpop.f32.mrb[6].mxu1 }
 0x237   : > { %v1475_v61 = vadd.f32 %v1474_v59, %v3988_v56  ;;  %v1588_v62 = vadd.f32 %v1587_v60, %v3988_v56  ;;  %v3992_v63 = vpop.f32.mrb[7].mxu1  ;;  %1827 = vxpose.xlu1.b32.cont [3/8] (short) %v1733_v58, 128  ;;  %v3994_v0 = vpop.f32.mrb[7].mxu0  ;;  %1763 = vxpose.xlu0.b32.cont [3/8] (short) %v1731_v57, 128  ;;  %v1572_v59 = vadd.f32 %v3970_v37, %v3964_v31 }
 0x239   : > { %v1736_v25 = vmax.f32 %v1475_v61, 0.0  ;;  %v1738_v2 = vmax.f32 %v1588_v62, 0.0  ;;  %v1724_v61 = vmax.f32 %v1572_v59, 0.0  ;;  %v1578_v62 = vadd.f32 %v3978_v46, %v3974_v39 }
 0x23a   : > { %v1480_v3 = vpop.f32.mrb[8].mxu0  ;;  %v1593_v4 = vpop.f32.mrb[8].mxu1 }
 0x23b   : > { %v1481_v5 = vadd.f32 %v1480_v3, %v3996_v1  ;;  %v1594_v6 = vadd.f32 %v1593_v4, %v3996_v1  ;;  %v4000_v7 = vpop.f32.mrb[9].mxu1  ;;  %1828 = vxpose.xlu1.b32.cont [4/8] (short) %v1738_v2, 128  ;;  %v4002_v8 = vpop.f32.mrb[9].mxu0  ;;  %1764 = vxpose.xlu0.b32.cont [4/8] (short) %v1736_v25, 128  ;;  %v1729_v3 = vmax.f32 %v1578_v62, 0.0  ;;  %v1584_v4 = vadd.f32 %v3984_v54, %v3972_v38 }
 0x23d   : > { %v1741_v11 = vmax.f32 %v1481_v5, 0.0  ;;  %v1743_v12 = vmax.f32 %v1594_v6, 0.0  ;;  %v1734_v37 = vmax.f32 %v1584_v4, 0.0 }
 0x23e   : > { %v1486_v13 = vpop.f32.mrb[10].mxu0  ;;  %v1599_v14 = vpop.f32.mrb[10].mxu1 }
 0x23f   : > { %v1487_v15 = vadd.f32 %v1486_v13, %v4004_v9  ;;  %v1600_v16 = vadd.f32 %v1599_v14, %v4004_v9  ;;  %v4008_v17 = vpop.f32.mrb[11].mxu1  ;;  %1829 = vxpose.xlu1.b32.cont [5/8] (short) %v1743_v12, 128  ;;  %v4010_v18 = vpop.f32.mrb[11].mxu0  ;;  %1765 = vxpose.xlu0.b32.cont [5/8] (short) %v1741_v11, 128  ;;  %v1590_v11 = vadd.f32 %v3992_v63, %v3988_v56 }
 0x240   : > { %v1596_v14 = vadd.f32 %v4000_v7, %v3996_v1 }
 0x241   : > { %v1746_v20 = vmax.f32 %v1487_v15, 0.0  ;;  %v1748_v21 = vmax.f32 %v1600_v16, 0.0  ;;  %v1739_v13 = vmax.f32 %v1590_v11, 0.0 }
 0x242   : > { %v1492_v23 = vpop.f32.mrb[12].mxu0  ;;  %v1605_v24 = vpop.f32.mrb[12].mxu1  ;;  %v1744_v16 = vmax.f32 %v1596_v14, 0.0 }
 0x243   : > { %v1493_v26 = vadd.f32 %v1492_v23, %v4012_v19  ;;  %v1606_v27 = vadd.f32 %v1605_v24, %v4012_v19  ;;  %v1607_v28 = vpop.f32.mrb[13].mxu1  ;;  %1830 = vxpose.xlu1.b32.cont [6/8] (short) %v1748_v21, 128  ;;  %v4016_v29 = vpop.f32.mrb[13].mxu0  ;;  %1766 = vxpose.xlu0.b32.cont [6/8] (short) %v1746_v20, 128  ;;  %v1602_v20 = vadd.f32 %v4008_v17, %v4004_v9 }
 0x244   : > { %v1608_v24 = vadd.f32 %v1607_v28, %v4012_v19  ;;  %v1459_v28 = vadd.f32 %v3968_v36, %v3964_v31 }
 0x245   : > { %v1751_v32 = vmax.f32 %v1493_v26, 0.0  ;;  %v1753_v33 = vmax.f32 %v1606_v27, 0.0  ;;  %v1749_v23 = vmax.f32 %v1602_v20, 0.0 }
 0x246   : > { %v1498_v34 = vpop.f32.mrb[14].mxu0  ;;  %v1611_v35 = vpop.f32.mrb[14].mxu1  ;;  %v1754_v27 = vmax.f32 %v1608_v24, 0.0 }
 0x247   : > { %v1499_v40 = vadd.f32 %v1498_v34, %v4018_v30  ;;  %v1612_v41 = vadd.f32 %v1611_v35, %v4018_v30  ;;  %v1613_v42 = vpop.f32.mrb[15].mxu1  ;;  %1831 = vxpose.xlu1.b32.cont [7/8] (short) %v1753_v33, 128  ;;  %v4022_v43 = vpop.f32.mrb[15].mxu0  ;;  %1767 = vxpose.xlu0.b32.cont [7/8] (short) %v1751_v32, 128 }
 0x248   : > { %v1614_v32 = vadd.f32 %v1613_v42, %v4018_v30  ;;  %v1471_v42 = vadd.f32 %v3986_v55, %v3972_v38 }
 0x249   : > { %v1756_v44 = vmax.f32 %v1499_v40, 0.0  ;;  %v1758_v45 = vmax.f32 %v1612_v41, 0.0  ;;  %v1722_v40 = vmax.f32 %v1459_v28, 0.0  ;;  %v1465_v41 = vadd.f32 %v3980_v47, %v3974_v39 }
 0x24a   : > { %v2737_v48 = vpop.f32.mrb[16].mxu0  ;;  %v1759_v17 = vmax.f32 %v1614_v32, 0.0 }
 0x24b   : > { %1832 = vxpose.xlu1.b32.end [8/8] (short) %v1758_v45, 128  ;;  %v1682_v49 = vpop.f32.mrb[17].mxu0  ;;  %1768 = vxpose.xlu0.b32.end [8/8] (short) %v1756_v44, 128  ;;  %v1688_v25 = vadd.f32 %v2737_v48, %v3974_v39  ;;  %v1727_v44 = vmax.f32 %v1465_v41, 0.0  ;;  %v1732_v45 = vmax.f32 %v1471_v42, 0.0  ;;  %v1477_v48 = vadd.f32 %v3994_v0, %v3988_v56 }
 0x24c   : > { %v1683_v60 = vadd.f32 %v1682_v49, %v3964_v31  ;;  %v1483_v31 = vadd.f32 %v4002_v8, %v3996_v1  ;;  %v1495_v0 = vadd.f32 %v4016_v29, %v4012_v19  ;;  %v1501_v8 = vadd.f32 %v4022_v43, %v4018_v30 }
 0x24d   : > { %v1730_v5 = vmax.f32 %v1688_v25, 0.0 }
 0x24e   : > { %v2740_v50 = vpop.f32.mrb[18].mxu0  ;;  %v1725_v2 = vmax.f32 %v1683_v60, 0.0  ;;  %v1742_v47 = vmax.f32 %v1483_v31, 0.0 }
 0x24f   : > { %v1692_v51 = vpop.f32.mrb[19].mxu0  ;;  %v1698_v46 = vadd.f32 %v2740_v50, %v3988_v56 }
 0x250   : > { %v1693_v6 = vadd.f32 %v1692_v51, %v3972_v38  ;;  %v1737_v51 = vmax.f32 %v1477_v48, 0.0  ;;  %v1489_v38 = vadd.f32 %v4010_v18, %v4004_v9 }
 0x251   : > { %v1740_v15 = vmax.f32 %v1698_v46, 0.0 }
 0x252   : > { %v2743_v52 = vpop.f32.mrb[20].mxu0  ;;  %v1735_v12 = vmax.f32 %v1693_v6, 0.0  ;;  %v1747_v56 = vmax.f32 %v1489_v38, 0.0 }
 0x253   : > { %v1702_v53 = vpop.f32.mrb[21].mxu0  ;;  %v1708_v63 = vadd.f32 %v2743_v52, %v4004_v9 }
 0x254   : > { %v1703_v54 = vadd.f32 %v1702_v53, %v3996_v1  ;;  %v1752_v1 = vmax.f32 %v1495_v0, 0.0 }
 0x255   : > { %v1750_v26 = vmax.f32 %v1708_v63, 0.0 }
 0x256   : > { %v2746_v57 = vpop.f32.mrb[22].mxu0  ;;  %v1745_v21 = vmax.f32 %v1703_v54, 0.0 }
 0x257   : > { %v1712_v58 = vpop.f32.mrb[23].mxu0  ;;  %v1718_v33 = vadd.f32 %v2746_v57, %v4018_v30 }
 0x258   : > { %v1713_v7 = vadd.f32 %v1712_v58, %v4012_v19 }
 0x259   : > { %v1760_v35 = vmax.f32 %v1718_v33, 0.0 }
 0x25a   : > { %v1755_v34 = vmax.f32 %v1713_v7, 0.0 }
 0x26c   : > { %1889 = vxpose.xlu1.b32.start [1/8] (short) (narrow) %v1725_v2, 88  ;;  %1857 = vxpose.xlu0.b32.start [1/8] (short) %v1724_v61, 128  ;;  %v1757_v61 = vmax.f32 %v1501_v8, 0.0 }
 0x270   : > { %1890 = vxpose.xlu1.b32.cont [2/8] (short) (narrow) %v1730_v5, 88  ;;  %1858 = vxpose.xlu0.b32.cont [2/8] (short) %v1729_v3, 128 }
 0x274   : > { %1891 = vxpose.xlu1.b32.cont [3/8] (short) (narrow) %v1735_v12, 88  ;;  %1859 = vxpose.xlu0.b32.cont [3/8] (short) %v1734_v37, 128 }
 0x278   : > { %1892 = vxpose.xlu1.b32.cont [4/8] (short) (narrow) %v1740_v15, 88  ;;  %1860 = vxpose.xlu0.b32.cont [4/8] (short) %v1739_v13, 128 }
 0x27c   : > { %1893 = vxpose.xlu1.b32.cont [5/8] (short) (narrow) %v1745_v21, 88  ;;  %1861 = vxpose.xlu0.b32.cont [5/8] (short) %v1744_v16, 128 }
 0x280   : > { %1894 = vxpose.xlu1.b32.cont [6/8] (short) (narrow) %v1750_v26, 88  ;;  %1862 = vxpose.xlu0.b32.cont [6/8] (short) %v1749_v23, 128 }
 0x284   : > { %1895 = vxpose.xlu1.b32.cont [7/8] (short) (narrow) %v1755_v34, 88  ;;  %1863 = vxpose.xlu0.b32.cont [7/8] (short) %v1754_v27, 128 }
 0x288   : > { %1896 = vxpose.xlu1.b32.end [8/8] (short) (narrow) %v1760_v35, 88  ;;  %1864 = vxpose.xlu0.b32.end [8/8] (short) %v1759_v17, 128 }
 0x2a9   : > { %1793 = vxpose.xlu0.b32.start [1/8] (short) %v1722_v40, 128 }
 0x2ad   : > { %1794 = vxpose.xlu0.b32.cont [2/8] (short) %v1727_v44, 128 }
 0x2af   : > { %v1777_v49 = vpop.trf.xlu0  ;;  %v4054_v50 = vpop.trf.xlu1 }
 0x2b0   : > { %v1922_v9 = vsel %vm1921_vm11, %v1777_v49, -inf }
 0x2b1   : > { %1795 = vxpose.xlu0.b32.cont [3/8] (short) %v1732_v45, 128 }
 0x2b3   : > { %v1778_v36 = vpop.trf.xlu0  ;;  %v4058_v39 = vpop.trf.xlu1 }
 0x2b4   : > { %v1923_v62 = vsel %vm1921_vm11, %v1778_v36, -inf }
 0x2b5   : > { %1796 = vxpose.xlu0.b32.cont [4/8] (short) %v1737_v51, 128 }
 0x2b7   : > { %v1779_v55 = vpop.trf.xlu0  ;;  %v4062_v52 = vpop.trf.xlu1 }
 0x2b8   : > { %v1924_v3 = vsel %vm1921_vm11, %v1779_v55, -inf }
 0x2b9   : > { %1797 = vxpose.xlu0.b32.cont [5/8] (short) %v1742_v47, 128 }
 0x2bb   : > { %v1780_v53 = vpop.trf.xlu0  ;;  %v4066_v57 = vpop.trf.xlu1 }
 0x2bc   : > { %v1925_v11 = vsel %vm1921_vm11, %v1780_v53, -inf }
 0x2bd   : > { %1798 = vxpose.xlu0.b32.cont [6/8] (short) %v1747_v56, 128 }
 0x2bf   : > { %v1781_v58 = vpop.trf.xlu0  ;;  %v4070_v59 = vpop.trf.xlu1 }
 0x2c0   : > { %v1926_v18 = vsel %vm1921_vm11, %v1781_v58, -inf }
 0x2c1   : > { %v1927_v60 = vmax.f32 %v1922_v9, %v1926_v18  ;;  %1799 = vxpose.xlu0.b32.cont [7/8] (short) %v1752_v1, 128 }
 0x2c3   : > { %v1782_v19 = vpop.trf.xlu0  ;;  %v4074_v29 = vpop.trf.xlu1 }
 0x2c4   : > { %v1928_v25 = vsel %vm1921_vm11, %v1782_v19, -inf  ;;  %v2017_v31 = vsel %vm1954_vm8, %v4074_v29, -inf }
 0x2c5   : > { %v1929_v2 = vmax.f32 %v1923_v62, %v1928_v25  ;;  %1800 = vxpose.xlu0.b32.end [8/8] (short) %v1757_v61, 128 }
 0x2c7   : > { %v1783_v30 = vpop.trf.xlu0  ;;  %v1847_v43 = vpop.trf.xlu1 }
 0x2c8   : > { %v1930_v4 = vsel %vm1921_vm11, %v1783_v30, -inf  ;;  %v2018_v47 = vsel %vm1921_vm11, %v1847_v43, -inf }
 0x2c9   : > { %v1931_v5 = vmax.f32 %v1924_v3, %v1930_v4 }
 0x2cb   : > { %v1784_v6 = vpop.trf.xlu0  ;;  %v1848_v37 = vpop.trf.xlu1 }
 0x2cc   : > { %v1932_v46 = vsel %vm1921_vm11, %v1784_v6, -inf  ;;  %v2019_v38 = vsel %vm1921_vm11, %v1848_v37, -inf }
 0x2cd   : > { %v1933_v12 = vmax.f32 %v1925_v11, %v1932_v46 }
 0x2cf   : > { %v1785_v13 = vpop.trf.xlu0  ;;  %v1849_v14 = vpop.trf.xlu1 }
 0x2d0   : > { %v1934_v15 = vsel %vm1921_vm11, %v1785_v13, -inf  ;;  %v2020_v56 = vsel %vm1921_vm11, %v1849_v14, -inf }
 0x2d1   : > { %v1935_v54 = vmax.f32 %v1927_v60, %v1934_v15 }
 0x2d3   : > { %v1786_v16 = vpop.trf.xlu0  ;;  %v1850_v20 = vpop.trf.xlu1 }
 0x2d4   : > { %v1936_v63 = vsel %vm1921_vm11, %v1786_v16, -inf  ;;  %v2021_v36 = vsel %vm1921_vm11, %v1850_v20, -inf }
 0x2d5   : > { %v1937_v21 = vmax.f32 %v1929_v2, %v1936_v63  ;;  %v2022_v8 = vmax.f32 %v2017_v31, %v2021_v36  ;;  %v2159_v31 = vld [vmem:[%s4436_s4 + $0x18] sm:$0xff]  ;;  %v2190_v36 = vld [vmem:[%s4436_s4 + $0x110] sm:$0xff] }
 0x2d7   : > { %v1787_v23 = vpop.trf.xlu0  ;;  %v1851_v24 = vpop.trf.xlu1 }
 0x2d8   : > { %v1938_v26 = vsel %vm1921_vm11, %v1787_v23, -inf  ;;  %v2023_v0 = vsel %vm1921_vm11, %v1851_v24, -inf  ;;  %v2173_v23 = vld [vmem:[%s4436_s4 + $0x88] sm:$0xff]  ;;  %v2156_v24 = vld [vmem:[%s4436_s4] sm:$0xff] }
 0x2d9   : > { %v1939_v7 = vmax.f32 %v1931_v5, %v1938_v26  ;;  %v2024_v18 = vmax.f32 %v2018_v47, %v2023_v0  ;;  %v2191_v47 = vld [vmem:[%s4436_s4 + $0x118] sm:$0xff] }
 0x2db   : > { %v1788_v27 = vpop.trf.xlu0  ;;  %v1852_v32 = vpop.trf.xlu1 }
 0x2dc   : > { %v1940_v33 = vsel %vm1921_vm11, %v1788_v27, -inf  ;;  %v2025_v53 = vsel %vm1921_vm11, %v1852_v32, -inf  ;;  %v2157_v27 = vld [vmem:[%s4436_s4 + $0x8] sm:$0xff]  ;;  %v2188_v32 = vld [vmem:[%s4436_s4 + $0x100] sm:$0xff] }
 0x2dd   : > { %v1941_v34 = vmax.f32 %v1933_v12, %v1940_v33  ;;  %v2026_v60 = vmax.f32 %v2019_v38, %v2025_v53  ;;  %v2189_v33 = vld [vmem:[%s4436_s4 + $0x108] sm:$0xff]  ;;  %v2176_v53 = vld [vmem:[%s4436_s4 + $0xa0] sm:$0xff] }
 0x2df   : > { %v1946_v17 = vmax.f32 %v1939_v7, %v1941_v34  ;;  %v4086_v35 = vpop.trf.xlu0  ;;  %v1853_v28 = vpop.trf.xlu1  ;;  %v3116_v7 = vmov 0.0|0.0  }
 0x2e0   : > { %v1943_v40 = vsel %vm1942_vm13, %v4086_v35, -inf  ;;  %v2027_v1 = vsel %vm1921_vm11, %v1853_v28, -inf  ;;  %2907 = vmatprep.subr.bf16.mxu0 %v3116_v7  ;;  %v2877_v28 = vpack.c.bf16 %v2157_v27, %v2156_v24 }
 0x2e1   : > { %v1944_v41 = vmax.f32 %v1935_v54, %v1943_v40  ;;  %v2028_v61 = vmax.f32 %v2020_v56, %v2027_v1  ;;  %v2908_v40 = vpack.c.bf16 %v2189_v33, %v2188_v32  ;;  %v2177_v1 = vld [vmem:[%s4436_s4 + $0xa8] sm:$0xff] }
 0x2e3   : > { %v1945_v44 = vmax.f32 %v1944_v41, %v1937_v21  ;;  %v4090_v42 = vpop.trf.xlu0  ;;  %v1854_v45 = vpop.trf.xlu1  ;;  %v2172_v21 = vld [vmem:[%s4436_s4 + $0x80] sm:$0xff]  ;;  %v2174_v41 = vld [vmem:[%s4436_s4 + $0x90] sm:$0xff]  ;;  %2909 = vmatpush3.bf16.msra.mxu0 %v2908_v40 }
 0x2e4   : > { %v2029_v9 = vsel %vm1921_vm11, %v1854_v45, -inf  ;;  %v2875_v26 = vpack.c.bf16 %v2173_v23, %v2172_v21  ;;  %v2158_v45 = vld [vmem:[%s4436_s4 + $0x10] sm:$0xff]  ;;  %2910 = vmatprep.subr.bf16.mxu0 %v3116_v7 }
 0x2e5   : > { %v4092_v48 = vmax.f32 %v1945_v44, %v1946_v17  ;;  %v2030_v30 = vmax.f32 %v2022_v8, %v2029_v9  ;;  %v2175_v44 = vld [vmem:[%s4436_s4 + $0x98] sm:$0xff]  ;;  %v2881_v0 = vpack.c.bf16 %v2159_v31, %v2158_v45  ;;  %v2160_v8 = vld [vmem:[%s4436_s4 + $0x20] sm:$0xff]  ;;  %v2883_v9 = vpack.c.bf16 %v2177_v1, %v2176_v53 }
 0x2e6   : > { %2876 = vmatprep.subr.bf16.mxu1 %v2875_v26 }
 0x2e7   : > { %v4094_v49 = vpop.trf.xlu0  ;;  %v1855_v51 = vpop.trf.xlu1  ;;  %2878 = vmatpush3.bf16.msra.mxu1 %v2877_v28 }
 0x2e8   : > { %v2031_v62 = vsel %vm1921_vm11, %v1855_v51, -inf  ;;  %v2879_v51 = vpack.c.bf16 %v2175_v44, %v2174_v41 }
 0x2e9   : > { %v2032_v43 = vmax.f32 %v2024_v18, %v2031_v62  ;;  %v2161_v18 = vld [vmem:[%s4436_s4 + $0x28] sm:$0xff] }
 0x2ea   : > { %2880 = vmatprep.subr.bf16.mxu1 %v2879_v51 }
 0x2eb   : > { %v4101_v55 = vpop.trf.xlu0  ;;  %v1856_v58 = vpop.trf.xlu1  ;;  %2882 = vmatpush3.bf16.msra.mxu1 %v2881_v0 }
 0x2ec   : > { %v2033_v25 = vsel %vm1921_vm11, %v1856_v58, -inf  ;;  %v2911_v58 = vpack.c.bf16 %v2191_v47, %v2190_v36  ;;  %2884 = vmatprep.subr.bf16.mxu1 %v2883_v9 }
 0x2ed   : > { %v2034_v3 = vmax.f32 %v2026_v60, %v2033_v25  ;;  %v2192_v60 = vld [vmem:[%s4436_s4 + $0x120] sm:$0xff] }
 0x2ee   : > { %2912 = vmatpush3.bf16.msra.mxu0 %v2911_v58 }
 0x2ef   : > { %v1873_v19 = vpop.trf.xlu0  ;;  %v4149_v38 = vpop.trf.xlu1  ;;  %2913 = vmatprep.subr.bf16.mxu0 %v3116_v7 }
 0x2f0   : > { %v2035_v2 = vsel %vm1921_vm11, %v1873_v19, -inf }
 0x2f1   : > { %v2036_v4 = vmax.f32 %v2028_v61, %v2035_v2  ;;  %v2193_v61 = vld [vmem:[%s4436_s4 + $0x128] sm:$0xff] }
 0x2f3   : > { %v1874_v5 = vpop.trf.xlu0  ;;  %v2040_v11 = vmax.f32 %v2034_v3, %v2036_v4  ;;  %v1906_v3 = vpop.trf.xlu1 }
 0x2f4   : > { %v2037_v6 = vsel %vm1921_vm11, %v1874_v5, -inf }
 0x2f5   : > { %v2038_v37 = vmax.f32 %v2030_v30, %v2037_v6  ;;  %v2885_v30 = vpack.c.bf16 %v2161_v18, %v2160_v8 }
 0x2f7   : > { %v2039_v46 = vmax.f32 %v2038_v37, %v2032_v43  ;;  %v1875_v12 = vpop.trf.xlu0  ;;  %v2914_v43 = vpack.c.bf16 %v2193_v61, %v2192_v60  ;;  %2886 = vmatpush3.bf16.msra.mxu1 %v2885_v30  ;;  %v2082_v30 = vsel %vm1921_vm11, %v1906_v3, -inf }
 0x2f8   : > { %v2048_v62 = vsel %vm1921_vm11, %v1875_v12, -inf }
 0x2f9   : > { %v2041_v13 = vmax.f32 %v2039_v46, %v2040_v11  ;;  %2915 = vmatpush3.bf16.msra.mxu0 %v2914_v43 }
 0x2fa   : > { %2916 = vmatprep.subr.bf16.mxu0 %v3116_v7 }
 0x2fb   : > { %v2042_v14 = vrot.slane %v2041_v13, 4  ;;  %v1876_v15 = vpop.trf.xlu0 }
 0x2fc   : > { %v2049_v5 = vsel %vm1921_vm11, %v1876_v15, -inf }
 0x2fd   : > { %v2043_v54 = vmax.f32 %v2041_v13, %v2042_v14  ;;  %v1907_v13 = vpop.trf.xlu1 }
 0x2ff   : > { %v2044_v16 = vrot.slane %v2043_v54, 2  ;;  %v1877_v20 = vpop.trf.xlu0 }
 0x300   : > { %v2050_v46 = vsel %vm1921_vm11, %v1877_v20, -inf }
 0x301   : > { %v2045_v63 = vmax.f32 %v2043_v54, %v2044_v16  ;;  %v1908_v21 = vpop.trf.xlu1 }
 0x302   : > { %v2085_v43 = vsel %vm1921_vm11, %v1908_v21, -inf }
 0x303   : > { %v1878_v34 = vpop.trf.xlu0  ;;  %v2046_v17 = vrot.slane %v2045_v63, 1 }
 0x304   : > { %v2051_v16 = vsel %vm1921_vm11, %v1878_v34, -inf }
 0x305   : > { %v2047_v56 = vmax.f32 %v2045_v63, %v2046_v17  ;;  %v1909_v33 = vpop.trf.xlu1 }
 0x307   : > { %2115 = vrot.lane.b32.xlu1 %v2047_v56, %s3117_s18  ;;  %v1879_v19 = vpop.trf.xlu0 }
 0x308   : > { %v2052_v25 = vsel %vm1921_vm11, %v1879_v19, -inf }
 0x309   : > { %v2053_v2 = vmax.f32 %v2048_v62, %v2052_v25  ;;  %v1910_v41 = vpop.trf.xlu1  ;;  %v2083_v62 = vsel %vm1921_vm11, %v1907_v13, -inf }
 0x30b   : > { %v1880_v4 = vpop.trf.xlu0 }
 0x30c   : > { %v2054_v6 = vsel %vm1921_vm11, %v1880_v4, -inf  ;;  %v2087_v4 = vsel %vm1921_vm11, %v1909_v33, -inf }
 0x30d   : > { %v2055_v37 = vmax.f32 %v2049_v5, %v2054_v6  ;;  %v1911_v47 = vpop.trf.xlu1  ;;  %v2089_v5 = vsel %vm1921_vm11, %v1910_v41, -inf  ;;  %v1958_v41 = vsel %vm1921_vm11, %v4101_v55, -inf }
 0x30e   : > { %v2090_v13 = vmax.f32 %v2082_v30, %v2089_v5 }
 0x30f   : > { %v1881_v11 = vpop.trf.xlu0 }
 0x310   : > { %v2056_v12 = vsel %vm1921_vm11, %v1881_v11, -inf }
 0x311   : > { %v2057_v14 = vmax.f32 %v2050_v46, %v2056_v12  ;;  %v1912_v8 = vpop.trf.xlu1  ;;  %v2091_v46 = vsel %vm1921_vm11, %v1911_v47, -inf }
 0x313   : > { %v1882_v54 = vpop.trf.xlu0 }
 0x314   : > { %v2058_v63 = vsel %vm1921_vm11, %v1882_v54, -inf }
 0x315   : > { %v2059_v15 = vmax.f32 %v2051_v16, %v2058_v63  ;;  %v1913_v18 = vpop.trf.xlu1 }
 0x316   : > { %v2095_v3 = vsel %vm1921_vm11, %v1913_v18, -inf }
 0x317   : > { %v1883_v23 = vpop.trf.xlu0 }
 0x318   : > { %v2060_v24 = vsel %vm1921_vm11, %v1883_v23, -inf }
 0x319   : > { %v2061_v26 = vmax.f32 %v2053_v2, %v2060_v24  ;;  %v1914_v61 = vpop.trf.xlu1  ;;  %v2081_v2 = vsel %vm1921_vm11, %v4149_v38, -inf  ;;  %v2093_v38 = vsel %vm1921_vm11, %v1912_v8, -inf }
 0x31a   : > { %v2088_v12 = vmax.f32 %v2081_v2, %v2087_v4  ;;  %v2097_v16 = vsel %vm1921_vm11, %v1914_v61, -inf }
 0x31b   : > { %v1884_v27 = vpop.trf.xlu0  ;;  %v2098_v24 = vmax.f32 %v2090_v13, %v2097_v16 }
 0x31c   : > { %v2062_v32 = vsel %vm1921_vm11, %v1884_v27, -inf  ;;  %v2096_v23 = vmax.f32 %v2088_v12, %v2095_v3  ;;  %v2194_v12 = vld [vmem:[%s4436_s4 + $0x130] sm:$0xff] }
 0x31d   : > { %v2063_v20 = vmax.f32 %v2055_v37, %v2062_v32 }
 0x31f   : > { %v1885_v17 = vpop.trf.xlu0 }
 0x320   : > { %v2064_v28 = vsel %vm1921_vm11, %v1885_v17, -inf  ;;  %v2102_v17 = vmax.f32 %v2096_v23, %v2098_v24  ;;  %v2164_v24 = vld [vmem:[%s4436_s4 + $0x40] sm:$0xff] }
 0x321   : > { %v2065_v40 = vmax.f32 %v2057_v14, %v2064_v28  ;;  %v1915_v14 = vpop.trf.xlu1 }
 0x322   : > { %v2099_v21 = vsel %vm1921_vm11, %v1915_v14, -inf }
 0x323   : > { %v1886_v44 = vpop.trf.xlu0 }
 0x324   : > { %v2066_v34 = vsel %vm1921_vm11, %v1886_v44, -inf }
 0x325   : > { %v2067_v45 = vmax.f32 %v2059_v15, %v2066_v34 }
 0x327   : > { %v2071_v51 = vmax.f32 %v2065_v40, %v2067_v45  ;;  %v1887_v31 = vpop.trf.xlu0  ;;  %v1957_v40 = vsel %vm1921_vm11, %v4094_v49, -inf }
 0x328   : > { %v2068_v36 = vsel %vm1942_vm13, %v1887_v31, -inf  ;;  %v2079_v25 = vsel %vm1954_vm8, %v1887_v31, -inf }
 0x329   : > { %v2069_v56 = vmax.f32 %v2061_v26, %v2068_v36  ;;  %v2084_v37 = vmax.f32 %v2079_v25, %v2083_v62  ;;  %v1955_v36 = vsel %vm1954_vm8, %v4086_v35, -inf }
 0x32b   : > { %v2070_v0 = vmax.f32 %v2069_v56, %v2063_v20  ;;  %v1888_v53 = vpop.trf.xlu0  ;;  %v2092_v63 = vmax.f32 %v2084_v37, %v2091_v46  ;;  %v2163_v46 = vld [vmem:[%s4436_s4 + $0x38] sm:$0xff] }
 0x32c   : > { %v2080_v6 = vsel %vm1921_vm11, %v1888_v53, -inf }
 0x32d   : > { %v4186_v1 = vmax.f32 %v2070_v0, %v2071_v51  ;;  %v2086_v54 = vmax.f32 %v2080_v6, %v2085_v43  ;;  %v2100_v27 = vmax.f32 %v2092_v63, %v2099_v21  ;;  %v2178_v6 = vld [vmem:[%s4436_s4 + $0xb0] sm:$0xff]  ;;  %v2181_v21 = vld [vmem:[%s4436_s4 + $0xc8] sm:$0xff] }
 0x32f   : > { %v1809_v58 = vpop.trf.xlu0  ;;  %v2094_v26 = vmax.f32 %v2086_v54, %v2093_v38  ;;  %v2195_v38 = vld [vmem:[%s4436_s4 + $0x138] sm:$0xff] }
 0x330   : > { %v1959_v44 = vsel %vm1921_vm11, %v1809_v58, -inf  ;;  %v1956_v58 = vsel %vm1921_vm11, %v4090_v42, -inf  ;;  %v2179_v42 = vld [vmem:[%s4436_s4 + $0xb8] sm:$0xff]  ;;  %v2917_v3 = vpack.c.bf16 %v2195_v38, %v2194_v12 }
 0x331   : > { %v2101_v28 = vmax.f32 %v2100_v27, %v2094_v26  ;;  %v1960_v53 = vmax.f32 %v1955_v36, %v1959_v44  ;;  %v2887_v37 = vpack.c.bf16 %v2179_v42, %v2178_v6  ;;  %v2165_v26 = vld [vmem:[%s4436_s4 + $0x48] sm:$0xff]  ;;  %v2196_v27 = vld [vmem:[%s4436_s4 + $0x140] sm:$0xff]  ;;  %v2182_v44 = vld [vmem:[%s4436_s4 + $0xd0] sm:$0xff] }
 0x332   : > { %2918 = vmatpush3.bf16.msra.mxu0 %v2917_v3  ;;  %v2198_v36 = vld [vmem:[%s4436_s4 + $0x150] sm:$0xff]  ;;  %v2187_v42 = vld [vmem:[%s4436_s4 + $0xf8] sm:$0xff] }
 0x333   : > { %v1810_v9 = vpop.trf.xlu0  ;;  %v2103_v49 = vmax.f32 %v2101_v28, %v2102_v17  ;;  %2888 = vmatprep.subr.bf16.mxu1 %v2887_v37  ;;  %2919 = vmatprep.subr.bf16.mxu0 %v3116_v7  ;;  %v2197_v17 = vld [vmem:[%s4436_s4 + $0x148] sm:$0xff]  ;;  %v2186_v6 = vld [vmem:[%s4436_s4 + $0xf0] sm:$0xff]  ;;  %v2171_v12 = vld [vmem:[%s4436_s4 + $0x78] sm:$0xff] }
 0x334   : > { %v1961_v47 = vsel %vm1921_vm11, %v1810_v9, -inf  ;;  %v2920_v28 = vpack.c.bf16 %v2197_v17, %v2196_v27  ;;  %v2170_v37 = vld [vmem:[%s4436_s4 + $0x70] sm:$0xff] }
 0x335   : > { %v2104_v9 = vrot.slane %v2103_v49, 4 }
 0x336   : > { %2921 = vmatpush3.bf16.msra.mxu0 %v2920_v28 }
 0x337   : > { %v1811_v60 = vpop.trf.xlu0  ;;  %v2105_v4 = vmax.f32 %v2103_v49, %v2104_v9  ;;  %2922 = vmatprep.subr.bf16.mxu0 %v3116_v7  ;;  %v2199_v49 = vld [vmem:[%s4436_s4 + $0x158] sm:$0xff] }
 0x338   : > { %v1963_v33 = vsel %vm1921_vm11, %v1811_v60, -inf  ;;  %v1962_v60 = vmax.f32 %v1956_v58, %v1961_v47 }
 0x339   : > { %v1964_v45 = vmax.f32 %v1957_v40, %v1963_v33  ;;  %v2106_v63 = vrot.slane %v2105_v4, 2 }
 0x33b   : > { %v1812_v19 = vpop.trf.xlu0 }
 0x33c   : > { %v1965_v20 = vsel %vm1921_vm11, %v1812_v19, -inf }
 0x33d   : > { %v1966_v51 = vmax.f32 %v1958_v41, %v1965_v20  ;;  %v2893_v20 = vpack.c.bf16 %v2165_v26, %v2164_v24  ;;  %v2107_v41 = vmax.f32 %v2105_v4, %v2106_v63  ;;  %v1998_v63 = vsel %vm1921_vm11, %v4058_v39, -inf }
 0x33e   : > { %v2006_v26 = vsel %vm1942_vm13, %v4074_v29, -inf  ;;  %v2000_v39 = vsel %vm1921_vm11, %v4062_v52, -inf  ;;  %v1948_v52 = vrot.slane %v4092_v48, 4 }
 0x33f   : > { %v1813_v11 = vpop.trf.xlu0 }
 0x340   : > { %v1967_v56 = vsel %vm1921_vm11, %v1813_v11, -inf  ;;  %v2162_v11 = vld [vmem:[%s4436_s4 + $0x30] sm:$0xff] }
 0x341   : > { %v1968_v61 = vmax.f32 %v1960_v53, %v1967_v56  ;;  %v2889_v54 = vpack.c.bf16 %v2163_v46, %v2162_v11  ;;  %v1996_v53 = vsel %vm1921_vm11, %v4054_v50, -inf  ;;  %v2168_v50 = vld [vmem:[%s4436_s4 + $0x60] sm:$0xff]  ;;  %v2903_v46 = vpack.c.bf16 %v2187_v42, %v2186_v6 }
 0x343   : > { %v1814_v15 = vpop.trf.xlu0  ;;  %2890 = vmatpush3.bf16.msra.mxu1 %v2889_v54  ;;  %v2203_v54 = vld [vmem:[%s4436_s4 + $0x178] sm:$0xff] }
 0x344   : > { %v1969_v18 = vsel %vm1921_vm11, %v1814_v15, -inf  ;;  %v2180_v15 = vld [vmem:[%s4436_s4 + $0xc0] sm:$0xff] }
 0x345   : > { %v1970_v25 = vmax.f32 %v1962_v60, %v1969_v18  ;;  %v2891_v23 = vpack.c.bf16 %v2181_v21, %v2180_v15  ;;  %v2108_v60 = vrot.slane %v2107_v41, 1 }
 0x347   : > { %v1815_v32 = vpop.trf.xlu0  ;;  %2892 = vmatprep.subr.bf16.mxu1 %v2891_v23  ;;  %v2109_v3 = vmax.f32 %v2107_v41, %v2108_v60 }
 0x348   : > { %v1971_v34 = vsel %vm1921_vm11, %v1815_v32, -inf  ;;  %2894 = vmatpush3.bf16.msra.mxu1 %v2893_v20 }
 0x349   : > { %v1972_v8 = vmax.f32 %v1964_v45, %v1971_v34  ;;  %v2183_v34 = vld [vmem:[%s4436_s4 + $0xd8] sm:$0xff] }
 0x34a   : > { %v2895_v45 = vpack.c.bf16 %v2183_v34, %v2182_v44  ;;  %v2002_v44 = vsel %vm1921_vm11, %v4066_v57, -inf  ;;  %v3119_v57 = vmov 1966171168  }
 0x34b   : > { %v1816_v31 = vpop.trf.xlu0 }
 0x34c   : > { %v1973_v0 = vsel %vm1921_vm11, %v1816_v31, -inf  ;;  %v2167_v31 = vld [vmem:[%s4436_s4 + $0x58] sm:$0xff]  ;;  %2896 = vmatprep.subr.bf16.mxu1 %v2895_v45 }
 0x34d   : > { %v1974_v55 = vmax.f32 %v1966_v51, %v1973_v0  ;;  %v2166_v51 = vld [vmem:[%s4436_s4 + $0x50] sm:$0xff] }
 0x34e   : > { %v2897_v0 = vpack.c.bf16 %v2167_v31, %v2166_v51 }
 0x34f   : > { %v1978_v19 = vmax.f32 %v1972_v8, %v1974_v55  ;;  %v1817_v62 = vpop.trf.xlu0  ;;  %v2923_v55 = vpack.c.bf16 %v2199_v49, %v2198_v36 }
 0x350   : > { %v1975_v35 = vsel %vm1921_vm11, %v1817_v62, -inf  ;;  %2898 = vmatpush3.bf16.msra.mxu1 %v2897_v0  ;;  %v2004_v62 = vsel %vm1921_vm11, %v4070_v59, -inf }
 0x351   : > { %v1976_v2 = vmax.f32 %v1968_v61, %v1975_v35  ;;  %v2184_v61 = vld [vmem:[%s4436_s4 + $0xe0] sm:$0xff]  ;;  %2924 = vmatpush3.bf16.msra.mxu0 %v2923_v55 }
 0x352   : > { %2925 = vmatprep.subr.bf16.mxu0 %v3116_v7 }
 0x353   : > { %v1977_v30 = vmax.f32 %v1976_v2, %v1970_v25  ;;  %v1818_v43 = vpop.trf.xlu0  ;;  %v2169_v25 = vld [vmem:[%s4436_s4 + $0x68] sm:$0xff]  ;;  %v2200_v2 = vld [vmem:[%s4436_s4 + $0x160] sm:$0xff] }
 0x354   : > { %v1986_v35 = vsel %vm1921_vm11, %v1818_v43, -inf  ;;  %v2901_v4 = vpack.c.bf16 %v2169_v25, %v2168_v50 }
 0x355   : > { %v1979_v5 = vmax.f32 %v1977_v30, %v1978_v19  ;;  %v2185_v19 = vld [vmem:[%s4436_s4 + $0xe8] sm:$0xff] }
 0x356   : > { %v2899_v9 = vpack.c.bf16 %v2185_v19, %v2184_v61  ;;  %v2201_v30 = vld [vmem:[%s4436_s4 + $0x168] sm:$0xff] }
 0x357   : > { %v1980_v13 = vrot.slane %v1979_v5, 4  ;;  %v4234_v14 = vpop.trf.xlu0 }
 0x358   : > { %2900 = vmatprep.subr.bf16.mxu1 %v2899_v9  ;;  %v1987_v15 = vsel %vm1921_vm11, %v4234_v14, -inf }
 0x359   : > { %v1981_v16 = vmax.f32 %v1979_v5, %v1980_v13  ;;  %v2926_v5 = vpack.c.bf16 %v2201_v30, %v2200_v2  ;;  %v2202_v13 = vld [vmem:[%s4436_s4 + $0x170] sm:$0xff]  ;;  %2902 = vmatpush3.bf16.msra.mxu1 %v2901_v4 }
 0x35a   : > { %2904 = vmatprep.subr.bf16.mxu1 %v2903_v46  ;;  %v2929_v21 = vpack.c.bf16 %v2203_v54, %v2202_v13  ;;  %v2362_v54 = vld [vmem:[%s4438_s6] sm:$0xff] }
 0x35b   : > { %v1982_v32 = vrot.slane %v1981_v16, 2  ;;  %v4254_v33 = vpop.trf.xlu0  ;;  %2927 = vmatpush3.bf16.msra.mxu0 %v2926_v5 }
 0x35c   : > { %2928 = vmatprep.subr.bf16.mxu0 %v3116_v7  ;;  %v1988_v14 = vsel %vm1921_vm11, %v4254_v33, -inf  ;;  %v1949_v33 = vmax.f32 %v4092_v48, %v1948_v52 }
 0x35d   : > { %v1983_v40 = vmax.f32 %v1981_v16, %v1982_v32  ;;  %v2905_v16 = vpack.c.bf16 %v2171_v12, %v2170_v37 }
 0x35e   : > { %v1950_v49 = vrot.slane %v1949_v33, 2 }
 0x35f   : > { %v1821_v47 = vpop.trf.xlu0  ;;  %v1984_v56 = vrot.slane %v1983_v40, 1  ;;  %2906 = vmatpush3.bf16.msra.mxu1 %v2905_v16  ;;  %2930 = vmatpush3.bf16.msra.mxu0 %v2929_v21 }
 0x360   : > { %v1989_v8 = vsel %vm1921_vm11, %v1821_v47, -inf  ;;  %2931 = vmatprep.subr.bf16.mxu1 %v3116_v7  ;;  %v2073_v47 = vrot.slane %v4186_v1, 4 }
 0x361   : > { %v1997_v58 = vmax.f32 %v1989_v8, %v1996_v53  ;;  %v1985_v18 = vmax.f32 %v1983_v40, %v1984_v56  ;;  %v1951_v8 = vmax.f32 %v1949_v33, %v1950_v49 }
 0x362   : > { %v2074_v0 = vmax.f32 %v4186_v1, %v2073_v47 }
 0x363   : > { %v2005_v59 = vmax.f32 %v1997_v58, %v2004_v62  ;;  %2111 = vrot.lane.b32.xlu1 %v1985_v18, %s3117_s18  ;;  %v1822_v43 = vpop.trf.xlu0  ;;  %v2130_v18 = vunpack.c.l.s4 %v3119_v57  ;;  %v1952_v60 = vrot.slane %v1951_v8, 1 }
 0x364   : > { %v1990_v11 = vsel %vm1921_vm11, %v1822_v43, -inf  ;;  %v2075_v55 = vrot.slane %v2074_v0, 2 }
 0x365   : > { %v1991_v38 = vmax.f32 %v1986_v35, %v1990_v11  ;;  %v2131_v62 = vunpack.c.0.s8 %v2130_v18  ;;  %v2133_v35 = vshrl.u32 %v318_v22, 7  ;;  %v1953_v48 = vmax.f32 %v1951_v8, %v1952_v60  ;;  %v2364_v22 = vld [vmem:[%s4438_s6 + $0x10] sm:$0xff] }
 0x366   : > { %v2076_v61 = vmax.f32 %v2074_v0, %v2075_v55 }
 0x367   : > { %v1999_v23 = vmax.f32 %v1991_v38, %v1998_v63  ;;  %2119 = vrot.lane.b32.xlu1 %v2109_v3, %s3117_s18  ;;  %v1823_v24 = vpop.trf.xlu0  ;;  %v2134_v30 = vsub.s32 %v2131_v62, %v2133_v35  ;;  %v2208_v46 = vsub.s32 0, %v2133_v35  ;;  %v2212_v12 = vsub.s32 1, %v2133_v35  ;;  %v2363_v38 = vld [vmem:[%s4438_s6 + $0x8] sm:$0xff]  ;;  %s2629_s18 = sshll.u32 %s4601_s28, 4 }
 0x368   : > { %v1992_v27 = vsel %vm1921_vm11, %v1823_v24, -inf  ;;  %v2077_v9 = vrot.slane %v2076_v61, 1  ;;  %v2216_v13 = vsub.s32 2, %v2133_v35  ;;  %v2932_v21 = vpack.c.bf16 %v2363_v38, %v2362_v54  ;;  %s4390_s21 = scalar_lea.hbm %s4605_s16, %s2629_s18 }
 0x369   : > { %v2007_v32 = vmax.f32 %v1999_v23, %v2006_v26  ;;  %v1993_v20 = vmax.f32 %v1987_v15, %v1992_v27  ;;  %v2365_v23 = vld [vmem:[%s4438_s6 + $0x18] sm:$0xff]  ;;  %v2366_v26 = vld [vmem:[%s4438_s6 + $0x20] sm:$0xff]  ;;  %v2367_v27 = vld [vmem:[%s4438_s6 + $0x28] sm:$0x1f] }
 0x36a   : > { %v2078_v43 = vmax.f32 %v2076_v61, %v2077_v9  ;;  %v2935_v24 = vpack.c.bf16 %v2365_v23, %v2364_v22 }
 0x36b   : > { %v2001_v17 = vmax.f32 %v1993_v20, %v2000_v39  ;;  %v1824_v28 = vpop.trf.xlu0 }
 0x36c   : > { %v1994_v40 = vsel %vm1921_vm11, %v1824_v28, -inf }
 0x36d   : > { %v2008_v41 = vmax.f32 %v2007_v32, %v2001_v17  ;;  %v1995_v29 = vmax.f32 %v1988_v14, %v1994_v40  ;;  %v2938_v32 = vpack.c.bf16 %v2367_v27, %v2366_v26  ;;  %v2204_v17 = vld [vmem:[%s4602_s0] sm:$0x1] }
 0x36f   : > { %v2003_v34 = vmax.f32 %v1995_v29, %v2002_v44  ;;  %v2368_v29 = vld [vmem:[%s4603_s17] sm:$0x1] }
 0x371   : > { %v2009_v45 = vmax.f32 %v2003_v34, %v2005_v59 }
 0x373   : > { %v2010_v51 = vmax.f32 %v2008_v41, %v2009_v45 }
 0x375   : > { %v2011_v31 = vrot.slane %v2010_v51, 4 }
 0x377   : > { %v2012_v36 = vmax.f32 %v2010_v51, %v2011_v31 }
 0x379   : > { %v2013_v56 = vrot.slane %v2012_v36, 2  ;;  %v2116_v19 = vpop.permute.xlu1 %2115 }
 0x37b   : > { %v2014_v53 = vmax.f32 %v2012_v36, %v2013_v56 }
 0x37d   : > { %v2015_v58 = vrot.slane %v2014_v53, 1 }
 0x37f   : > { %v2016_v50 = vmax.f32 %v2014_v53, %v2015_v58 }
 0x381   : > { %v2123_v2 = vsel %vm1921_vm11, %v2016_v50, %v2116_v19 }
 0x3d5   : > { %v2112_v25 = vpop.permute.xlu1 %2111 }
 0x3d6   : > { %v2122_v1 = vsel %vm1921_vm11, %v1953_v48, %v2112_v25 }
 0x3d7   : > { %v2128_v59 = vcombine.low %v2122_v1, %v2123_v2 }
 0x3d9   : > { %v2120_v4 = vpop.permute.xlu1 %2119  ;;  %v2135_v6 = vrot.slane %v2128_v59, %v2134_v30 }
 0x3da   : > { %v2124_v5 = vsel %vm1921_vm11, %v2078_v43, %v2120_v4 }
 0x3db   : > { %v2142_v42 = vrot.slane %v2124_v5, %v2134_v30 }
 0x3dd   : > { %v2143_v37 = vcombine.low %v2135_v6, %v2142_v42 }
 0x3df   : > { %v2150_v11 = vrot.slane %v2143_v37, %v2134_v30 }
 0x3e1   : > { %2154 = vst.msk [vmem:[#allocation3] sm:$0x7] %vm2152_vm10, %v2150_v11 }
 0x3e8   : > { %v2155_v3 = vld [vmem:[#allocation3] sm:$0x7] }
 0x3e9   : > { %v2209_v16 = vrot.slane %v2155_v3, %v2208_v46  ;;  %v2213_v63 = vrot.slane %v2155_v3, %v2212_v12  ;;  %v2217_v15 = vrot.slane %v2155_v3, %v2216_v13 }
 0x3eb   : > { %2285 = vmatprep.mubr.f32.mxu1 %v2213_v63  ;;  %2780 = vmatmul.mubr.f32.vlgmr.msra.gmra.mrb[24].mxu0 %v2217_v15 }
 0x3ec   : > { %2286 = vmatmul.mubr.f32.vlgmr.msra.gmra.mrb[16].mxu1 %v2209_v16 }
 0x3ed   : > { %2933 = vmatpush3.bf16.msra.mxu1 %v2932_v21  ;;  %2794 = vmatprep.mubr.msk.f32.mxu1 %vm3118_vm12, %v3113_v10  ;;  %v2361_v10 = vld [vmem:[%s316_s20] sm:$0x1] }
 0x3ee   : > { %2934 = vmatprep.subr.bf16.mxu1 %v3116_v7 }
 0x3f1   : > { %2936 = vmatpush3.bf16.msra.mxu1 %v2935_v24 }
 0x3f2   : > { %2937 = vmatprep.subr.bf16.mxu1 %v3116_v7 }
 0x3f5   : > { %2940 = vmatpush3.bf16.msk.msra.mxu1 %vm2939_vm9, %v2938_v32 }
 0x3f8   : > { %2795 = vmatmul.mubr.msk.f32.vlgmr.msra.gmra.mrb[18].mxu1 %vm2369_vm1, %v2361_v10 }
 0x4be   : > { %v2357_v20 = vpop.f32.mrb[24].mxu0 }
 0x4bf   : > { %v2684_v39 = vpop.f32.mrb[16].mxu1  ;;  %v2781_v14 = vpop.f32.mrb[25].mxu0 }
 0x4c0   : > { %v2685_v7 = vpop.f32.mrb[17].mxu1 }
 0x4c1   : > { %v2686_v28 = vadd.f32 %v2685_v7, %v2684_v39 }
 0x4c3   : > { %v2288_v40 = vadd.f32 %v2686_v28, %v2204_v17 }
 0x4c5   : > { %v2358_v41 = vadd.f32 %v2357_v20, %v2288_v40 }
 0x4cb   : > { %v2443_v44 = vpop.f32.mrb[18].mxu1 }
 0x4cc   : > { %v2444_v34 = vadd.f32 %v2443_v44, %v2368_v29  ;;  %v2796_v45 = vpop.f32.mrb[19].mxu1 }
 0x4ce   : > { %2448 = vrot.lane.b32.xlu0 %v2444_v34, %s3120_s8 }
 0x540   : > { %v2449_v51 = vpop.permute.xlu0 %2448 }
 0x541   : > { %v2452_v31 = vsel %vm2451_vm2, %v2358_v41, %v2449_v51 }
 0x542   : > { %v2454_v52 = vsel %vm2453_vm3, %v2452_v31, 0.0 }
 0x543   : > { %2455 = vst [vmem:[%s308_s30] sm:$0x1] %v2454_v52 }
 0x544   : > { %3033 = shalt.err (!%p3030_p3)
}
 0x545   : > { %s3034_s13 = scalar_lea.hbm %s4390_s21, 16  ;;  %s3038_s9 = scalar_lea.hbm %s4605_s16, 32 }
 0x546   : > { %p3035_p4 = scmp.ne.s32.totalorder %s4390_s21, %s3034_s13  ;;  %p3039_p9 = scmp.lt.u32.totalorder %s4390_s21, %s4605_s16 }
 0x547   : > { %p3040_p10 = scmp.lt.u32.totalorder %s3038_s9, %s3034_s13  ;;  %p3042_p12 = scmp.lt.u32.totalorder %s3034_s13, %s4390_s21 }
 0x548   : > { %p3036_p7 = pnand %p3035_p4, %p3205_p5 }
 0x549   : > { %p3041_p11 = por %p3040_p10, %p3039_p9 }
 0x54a   : > { %p3037_p8 = pneg %p3036_p7 }
 0x54b   : > { %p3043_p13 = por %p3042_p12, %p3041_p11 }
 0x54d   : > { %p3044_p0 = pnand %p3043_p13, %p3037_p8 }
 0x54f   : > { %3047 = shalt.err (!%p3044_p0)
}
 0x550   : > { %2942 = dma.vmem_to_hbm [thread:$0]  (%p3205_p5), %s4392_s11, 16, %s4390_s21, %s2457_s24  }
 0x551 PF: > { %s4606_s22 = sld [smem:[#allocation10_spill]]  ;;  %s4607_s0 = sld [smem:[#allocation7_spill]] }
 0x557   : > { %p2948_p1 = scmp.ge.s32.totalorder %s4606_s22, 2  ;;  %s2481_s7 = sand.u32 1, %s4607_s0  }
 0x558   : > { %s2482_s17 = scalar_lea.sflag [#allocation5], %s2481_s7 }
 0x559   : > { %p2945_p2 = pnand %p2948_p1, %p3209_p6 }
 0x55b   : > { %3065 = dma.done.wait (!%p2945_p2), %s2482_s17, 16  }
 0x55c   : > { %3067 = vsyncadd (!%p2945_p2), %s2482_s17, 4294967280  ;;  %s4609_s30 = sld [smem:[#allocation12_spill]]  ;;  %s4610_s27 = sld [smem:[#allocation8_spill]] }
 0x55d   : > { %s4611_s28 = sld [smem:[#allocation9_spill]]  ;;  %s4612_s29 = sld [smem:[#allocation13_spill]] }
 0x562   : > { %p18_p3 = scmp.ge.s32.totalorder %s4609_s30, 4  }
 0x564   :  { %20 = sbr.rel (!%p18_p3) target bundleno = 8 (0x8), region = 181 }
 0x56b   :  { %2486 = vsyncpa [#allocation5], 1 }
 0x56c   :  { %2488 = vsyncpa [#allocation5 + $0x1], 1 }

</bundles_post_ra>
